<compile_context>
chip_gen: v5e
topology: v5e:2x2
jax: 0.10.0
libtpu: 0.0.40
codegen_flags: <defaults>
</compile_context>

<pallas_src>
import jax
import jax.numpy as jnp
from jax.experimental import pallas as pl
from jax.experimental.pallas import tpu as pltpu

# ---- model / graph hyperparameters (small synthetic sizes) --------------------
BATCH = 4            # graphs per call
GROUP = 2            # graphs fused block-diagonally per grid step
NSTEPS = BATCH // GROUP
N_NODES = 16         # nodes per graph
N_EDGES = 48         # directed edges per graph
IN_DIM = 2           # TSP node coordinates
IN_DIM_EDGE = 1      # edge distance
HIDDEN = 32          # hidden_dim
OUT_DIM = 32         # out_dim (== hidden_dim, as in the TSP configs)
N_LAYERS = 3         # L
ASSIGN_DIM = 8       # assign_dim
N_CLASSES = 2        # n_classes
MLP_H0 = (2 * OUT_DIM) // 2   # 32
MLP_H1 = (2 * OUT_DIM) // 4   # 16
PROJ = 4 * HIDDEN + ASSIGN_DIM   # fused node-projection lanes [D|B|A|E|S_prev] = 136
OUT_LANES = 128      # lane-dense output width
EPS = 1e-6

NG = GROUP * N_NODES   # 32 nodes per fused step
EG = GROUP * N_EDGES   # 96 edges per fused step


def bigatedgcn_kernel(
    # per-step (block-diagonal) inputs
    h0_ref, e0_ref, src_ref, dst_ref, dstT_ref,
    # packed shared weights
    Wemb_ref,          # [8, H] f32: rows 0..1 Wh, 2 bh, 3 We, 4 be
    Wn_ref,            # [L, H, PROJ] bf16: lanes [WD|WB|WA|WE|Ws_{l-1}]
    WC_ref,            # [L, H, H]   bf16
    bL_ref,            # [L, 2, PROJ] f32: row0 = [bD|bB|bA|bE|bs_{l-1}], row1[:H] = bC
    W0S_ref,           # [H, 2*MLP_H0 + A] bf16: [W0a|W0b|Ws_{L-1}]
    W1_ref,            # [MLP_H0, MLP_H1] bf16
    W2_ref,            # [MLP_H1, OUT_LANES] bf16 (lanes 0:N_CLASSES real, rest zero)
    bro_ref,           # [8, OUT_LANES] f32: row0 b0, row1 bs_{L-1}, row2 b1, row3 b2(padded)
    # outputs (lane-dense)
    edge_out_ref,      # [1, EG, OUT_LANES]
    S_ref,             # [1, NG, OUT_LANES]  (lanes l*A:(l+1)*A = layer l soft assignment)
):
    f32, bf16 = jnp.float32, jnp.bfloat16
    H, A = HIDDEN, ASSIGN_DIM

    def mxu(a, b):   # bf16 operands, f32 accumulation
        return jnp.dot(a.astype(bf16), b.astype(bf16), preferred_element_type=f32)

    def softmax_exact(z):     # exact divide (parity with PyTorch softmax)
        z = z - jnp.max(z, axis=-1, keepdims=True)
        p = jnp.exp(z)
        return p / jnp.sum(p, axis=-1, keepdims=True)

    src = src_ref[0]       # [EG, NG] bf16 block-diagonal src one-hot
    dst = dst_ref[0]       # [EG, NG] bf16
    dstT = dstT_ref[0]     # [NG, EG] bf16
    bro = bro_ref[...]     # [8, OUT_LANES] f32

    # ---- input embeddings on the VPU (K=2 / K=1 removed from the MXU) ---------
    W = Wemb_ref[...]                           # [8, H] f32
    h0 = h0_ref[0]                              # [NG, IN_DIM]
    e0 = e0_ref[0]                              # [EG, IN_DIM_EDGE]
    h = W[2:3, :]                               # bh
    for d in range(IN_DIM):
        h = h + h0[:, d:d + 1] * W[d:d + 1, :]
    e = e0[:, 0:1] * W[3:4, :] + W[4:5, :]      # We (in_dim_edge == 1) + be

    # ---- L GatedGCN layers (statically unrolled) -------------------------------
    S_cols = []
    for l in range(N_LAYERS):
        h_in, e_in = h, e
        bl = bL_ref[l]                                          # [2, PROJ] f32

        # fused node projection (lane order [D | B | A | E | S_{l-1}])
        P = mxu(h, Wn_ref[l]) + bl[0:1, :]                      # [NG, PROJ]
        if l >= 1:   # soft assignment of the PREVIOUS layer's output h (fused lanes)
            S_cols.append(softmax_exact(P[:, 4 * H:4 * H + A]))
        DBh = P[:, :2 * H]
        Ah = P[:, 2 * H:3 * H]
        Eh = P[:, 3 * H:4 * H]

        Ce = mxu(e, WC_ref[l]) + bl[1:2, :H]                    # [EG, H]

        # edge gathers: two plain matmuls, no zero-padded concat
        G1 = mxu(src, DBh)                                      # [EG, 2H] = [src@Dh | src@Bh]
        G2 = mxu(dst, Eh)                                       # [EG, H]  =  dst@Eh
        e_new = Ce + G1[:, :H] + G2
        Bh_j = G1[:, H:]

        sigma = jax.nn.sigmoid(e_new)                           # f32

        # fused scatter-add over incoming edges: agg = dstT @ [sigma*Bh | sigma]
        M = jnp.concatenate([sigma * Bh_j, sigma], axis=1)      # [EG, 2H]
        agg = mxu(dstT, M)                                      # [NG, 2H]
        num, den = agg[:, :H], agg[:, H:]
        h_new = Ah + num * pl.reciprocal(den + EPS, approx=True)

        # (batch_norm disabled) -> ReLU -> residual
        h = h_in + jnp.maximum(h_new, 0.0)
        e = e_in + jnp.maximum(e_new, 0.0)

    # ---- edge readout: MLP(cat[h_src, h_dst]); last layer's assignment fused ---
    HW = mxu(h, W0S_ref[...])                                   # [NG, 2*MLP_H0 + A]
    S_cols.append(softmax_exact(HW[:, 2 * MLP_H0:] + bro[1:2, :A]))

    y = mxu(src, HW[:, :MLP_H0]) + mxu(dst, HW[:, MLP_H0:2 * MLP_H0]) + bro[0:1, :MLP_H0]
    y = jnp.maximum(y, 0.0)                                     # [EG, MLP_H0]
    y = jnp.maximum(mxu(y, W1_ref[...]) + bro[2:3, :MLP_H1], 0.0)   # [EG, MLP_H1]
    edge_out_ref[0] = mxu(y, W2_ref[...]) + bro[3:4, :]         # [EG, 128] lane-dense store

    # lane-pack all layers' soft assignments into one full-lane store
    pad = jnp.zeros((NG, OUT_LANES - N_LAYERS * A), f32)
    S_ref[0] = jnp.concatenate(S_cols + [pad], axis=1)          # [NG, 128]


def bigatedgcn_forward(h0, e0, SRC, DST, DSTT, params):
    # stack GROUP graphs per step (matches block-diagonal incidence layout)
    h0s = h0.reshape(NSTEPS, NG, IN_DIM)
    e0s = e0.reshape(NSTEPS, EG, IN_DIM_EDGE)
    batched = (h0s, e0s, SRC, DST, DSTT)
    args = batched + tuple(params)

    def batched_spec(a):
        nd = a.ndim
        return pl.BlockSpec((1,) + a.shape[1:], lambda s, nd=nd: (s,) + (0,) * (nd - 1))

    def shared_spec(a):
        nd = a.ndim
        return pl.BlockSpec(a.shape, lambda s, nd=nd: (0,) * nd)

    in_specs = [batched_spec(a) for a in batched] + [shared_spec(a) for a in params]

    out_shapes = (
        jax.ShapeDtypeStruct((NSTEPS, EG, OUT_LANES), jnp.float32),
        jax.ShapeDtypeStruct((NSTEPS, NG, OUT_LANES), jnp.float32),
    )
    out_specs = (
        pl.BlockSpec((1, EG, OUT_LANES), lambda s: (s, 0, 0)),
        pl.BlockSpec((1, NG, OUT_LANES), lambda s: (s, 0, 0)),
    )
    edge_full, S_full = pl.pallas_call(
        bigatedgcn_kernel,
        out_shape=out_shapes,
        grid=(NSTEPS,),
        in_specs=in_specs,
        out_specs=out_specs,
        compiler_params=pltpu.CompilerParams(
            dimension_semantics=("parallel",)),   # 2 medium steps -> both v7x TCs busy
    )(*args)

    # slice the lane-dense slabs back to the module's output shapes (cheap XLA ops)
    edge_logits = edge_full.reshape(NSTEPS, GROUP, N_EDGES, OUT_LANES)[..., :N_CLASSES]
    edge_logits = edge_logits.reshape(BATCH, N_EDGES, N_CLASSES)
    S = S_full.reshape(NSTEPS, GROUP, N_NODES, OUT_LANES)[..., :N_LAYERS * ASSIGN_DIM]
    S = S.reshape(BATCH, N_NODES, N_LAYERS, ASSIGN_DIM).transpose(0, 2, 1, 3)
    return edge_logits, S


# ---- static-graph block-diagonal incidence matrices: built ONCE, outside jit ----
def build_incidence(src_idx, dst_idx):
    B, E = src_idx.shape
    offs = (jnp.arange(B, dtype=src_idx.dtype) % GROUP) * N_NODES          # node col offset
    src_oh = jax.nn.one_hot(src_idx + offs[:, None], NG, dtype=jnp.float32)  # [B, E, NG]
    dst_oh = jax.nn.one_hot(dst_idx + offs[:, None], NG, dtype=jnp.float32)
    SRC = src_oh.reshape(NSTEPS, EG, NG).astype(jnp.bfloat16)              # block-diag
    DST = dst_oh.reshape(NSTEPS, EG, NG).astype(jnp.bfloat16)
    DSTT = jnp.swapaxes(DST, -1, -2)                                       # [NSTEPS, NG, EG]
    return SRC, DST, DSTT


# ---- deterministic parameter init (PyTorch nn.Linear-style uniform) ------------
def _linear(key, fan_in, fan_out):
    k1, k2 = jax.random.split(key)
    lim = 1.0 / (fan_in ** 0.5)
    W = jax.random.uniform(k1, (fan_in, fan_out), jnp.float32, -lim, lim)
    b = jax.random.uniform(k2, (1, fan_out), jnp.float32, -lim, lim)
    return W, b


def init_params(key):
    bf = jnp.bfloat16
    keys = iter(jax.random.split(key, 64))

    Wh, bh = _linear(next(keys), IN_DIM, HIDDEN)
    We, be = _linear(next(keys), IN_DIM_EDGE, HIDDEN)
    Wemb = jnp.zeros((8, HIDDEN), jnp.float32)
    Wemb = Wemb.at[0:IN_DIM].set(Wh).at[2].set(bh[0]).at[3].set(We[0]).at[4].set(be[0])

    raw = []
    for _ in range(N_LAYERS):
        WA, bA = _linear(next(keys), HIDDEN, HIDDEN)
        WB, bB = _linear(next(keys), HIDDEN, HIDDEN)
        WC, bC = _linear(next(keys), HIDDEN, HIDDEN)
        WD, bD = _linear(next(keys), HIDDEN, HIDDEN)
        WE, bE = _linear(next(keys), HIDDEN, HIDDEN)
        Ws, bs = _linear(next(keys), HIDDEN, ASSIGN_DIM)
        raw.append((WA, bA, WB, bB, WC, bC, WD, bD, WE, bE, Ws, bs))

    Wn_l, WC_l, bL_l = [], [], []
    for l in range(N_LAYERS):
        WA, bA, WB, bB, WC, bC, WD, bD, WE, bE, _, _ = raw[l]
        if l >= 1:   # previous layer's assignment head rides on this projection
            Ws_prev, bs_prev = raw[l - 1][10], raw[l - 1][11]
        else:
            Ws_prev = jnp.zeros((HIDDEN, ASSIGN_DIM), jnp.float32)
            bs_prev = jnp.zeros((1, ASSIGN_DIM), jnp.float32)
        # lane order [D | B | A | E | S_prev]
        Wn_l.append(jnp.concatenate([WD, WB, WA, WE, Ws_prev], axis=1))            # [H, PROJ]
        bn = jnp.concatenate([bD, bB, bA, bE, bs_prev], axis=1)[0]                 # [PROJ]
        bCp = jnp.concatenate([bC, jnp.zeros((1, PROJ - HIDDEN), jnp.float32)], 1)[0]
        bL_l.append(jnp.stack([bn, bCp], axis=0))                                  # [2, PROJ]
        WC_l.append(WC)
    Wn = jnp.stack(Wn_l).astype(bf)          # [L, H, PROJ]
    WCs = jnp.stack(WC_l).astype(bf)         # [L, H, H]
    bL = jnp.stack(bL_l)                     # [L, 2, PROJ] f32

    # MLPReadout(2*OUT_DIM, n_classes, L=2): 64 -> 32 -> 16 -> n_classes
    W0, b0 = _linear(next(keys), 2 * OUT_DIM, MLP_H0)
    Ws_last, bs_last = raw[-1][10], raw[-1][11]
    W0S = jnp.concatenate([W0[:OUT_DIM], W0[OUT_DIM:], Ws_last], axis=1).astype(bf)  # [H, 2*MLP_H0+A]
    W1, b1 = _linear(next(keys), MLP_H0, MLP_H1)
    W2, b2 = _linear(next(keys), MLP_H1, N_CLASSES)
    W2pad = jnp.zeros((MLP_H1, OUT_LANES), jnp.float32).at[:, :N_CLASSES].set(W2).astype(bf)

    bro = jnp.zeros((8, OUT_LANES), jnp.float32)
    bro = bro.at[0, :MLP_H0].set(b0[0])
    bro = bro.at[1, :ASSIGN_DIM].set(bs_last[0])
    bro = bro.at[2, :MLP_H1].set(b1[0])
    bro = bro.at[3, :N_CLASSES].set(b2[0])

    return (Wemb, Wn, WCs, bL, W0S, W1.astype(bf), W2pad, bro)


if __name__ == "__main__":
    key = jax.random.PRNGKey(0)
    k_h, k_e, k_src, k_dst, k_p = jax.random.split(key, 5)

    h0 = jax.random.normal(k_h, (BATCH, N_NODES, IN_DIM), jnp.float32)        # node coords
    e0 = jax.random.normal(k_e, (BATCH, N_EDGES, IN_DIM_EDGE), jnp.float32)   # edge features
    src_idx = jax.random.randint(k_src, (BATCH, N_EDGES), 0, N_NODES)
    dst_idx = jax.random.randint(k_dst, (BATCH, N_EDGES), 0, N_NODES)

    # static graph structure: block-diagonal incidence built once, outside the jitted forward
    SRC, DST, DSTT = jax.block_until_ready(build_incidence(src_idx, dst_idx))
    params = init_params(k_p)

    fwd = jax.jit(bigatedgcn_forward)
    edge_logits, S = fwd(h0, e0, SRC, DST, DSTT, params)
    jax.block_until_ready((edge_logits, S))

    assert edge_logits.shape == (BATCH, N_EDGES, N_CLASSES)
    assert S.shape == (BATCH, N_LAYERS, N_NODES, ASSIGN_DIM)
    assert bool(jnp.all(jnp.isfinite(edge_logits))) and bool(jnp.all(jnp.isfinite(S)))
    assert bool(jnp.allclose(S.sum(-1), 1.0, atol=1e-3))   # softmax rows sum to 1 (exact divide)
    print("KERNEL_OK")
</pallas_src>

<mosaic_0001>
module attributes {stable_mosaic.version = 11 : i64} {
  func.func @bigatedgcn_kernel(%arg0: i32, %arg1: memref<1x32x2xf32, #tpu.memory_space<vmem>>, %arg2: memref<1x96x1xf32, #tpu.memory_space<vmem>>, %arg3: memref<1x96x32xbf16, #tpu.memory_space<vmem>>, %arg4: memref<1x96x32xbf16, #tpu.memory_space<vmem>>, %arg5: memref<1x32x96xbf16, #tpu.memory_space<vmem>>, %arg6: memref<8x32xf32, #tpu.memory_space<vmem>>, %arg7: memref<3x32x136xbf16, #tpu.memory_space<vmem>>, %arg8: memref<3x32x32xbf16, #tpu.memory_space<vmem>>, %arg9: memref<3x2x136xf32, #tpu.memory_space<vmem>>, %arg10: memref<32x72xbf16, #tpu.memory_space<vmem>>, %arg11: memref<32x16xbf16, #tpu.memory_space<vmem>>, %arg12: memref<16x128xbf16, #tpu.memory_space<vmem>>, %arg13: memref<8x128xf32, #tpu.memory_space<vmem>>, %arg14: memref<1x96x128xf32, #tpu.memory_space<vmem>>, %arg15: memref<1x32x128xf32, #tpu.memory_space<vmem>>) attributes {dimension_semantics = [#tpu.dimension_semantics<parallel>], iteration_bounds = array<i64: 2>, scalar_prefetch = 0 : i64, scratch_operands = 0 : i64, tpu.core_type = #tpu.core_type<tc>, window_params = [{transform_indices = @transform_0, window_bounds = array<i64: 1, 32, 2>}, {transform_indices = @transform_1, window_bounds = array<i64: 1, 96, 1>}, {transform_indices = @transform_2, window_bounds = array<i64: 1, 96, 32>}, {transform_indices = @transform_3, window_bounds = array<i64: 1, 96, 32>}, {transform_indices = @transform_4, window_bounds = array<i64: 1, 32, 96>}, {pipeline_mode = #tpu.pipeline_mode<synchronous>, transform_indices = @transform_5, window_bounds = array<i64: 8, 32>}, {pipeline_mode = #tpu.pipeline_mode<synchronous>, transform_indices = @transform_6, window_bounds = array<i64: 3, 32, 136>}, {pipeline_mode = #tpu.pipeline_mode<synchronous>, transform_indices = @transform_7, window_bounds = array<i64: 3, 32, 32>}, {pipeline_mode = #tpu.pipeline_mode<synchronous>, transform_indices = @transform_8, window_bounds = array<i64: 3, 2, 136>}, {pipeline_mode = #tpu.pipeline_mode<synchronous>, transform_indices = @transform_9, window_bounds = array<i64: 32, 72>}, {pipeline_mode = #tpu.pipeline_mode<synchronous>, transform_indices = @transform_10, window_bounds = array<i64: 32, 16>}, {pipeline_mode = #tpu.pipeline_mode<synchronous>, transform_indices = @transform_11, window_bounds = array<i64: 16, 128>}, {pipeline_mode = #tpu.pipeline_mode<synchronous>, transform_indices = @transform_12, window_bounds = array<i64: 8, 128>}, {transform_indices = @transform_13, window_bounds = array<i64: 1, 96, 128>}, {transform_indices = @transform_14, window_bounds = array<i64: 1, 32, 128>}]} {
    %c0 = arith.constant 0 : index
    %c0_0 = arith.constant 0 : index
    %c0_1 = arith.constant 0 : index
    %0 = vector.load %arg3[%c0, %c0_0, %c0_1] : memref<1x96x32xbf16, #tpu.memory_space<vmem>>, vector<1x96x32xbf16>
    %1 = vector.shape_cast %0 : vector<1x96x32xbf16> to vector<96x32xbf16>
    %c0_2 = arith.constant 0 : index
    %c0_3 = arith.constant 0 : index
    %c0_4 = arith.constant 0 : index
    %2 = vector.load %arg4[%c0_2, %c0_3, %c0_4] : memref<1x96x32xbf16, #tpu.memory_space<vmem>>, vector<1x96x32xbf16>
    %3 = vector.shape_cast %2 : vector<1x96x32xbf16> to vector<96x32xbf16>
    %c0_5 = arith.constant 0 : index
    %c0_6 = arith.constant 0 : index
    %c0_7 = arith.constant 0 : index
    %4 = vector.load %arg5[%c0_5, %c0_6, %c0_7] : memref<1x32x96xbf16, #tpu.memory_space<vmem>>, vector<1x32x96xbf16>
    %5 = vector.shape_cast %4 : vector<1x32x96xbf16> to vector<32x96xbf16>
    %c0_8 = arith.constant 0 : index
    %c0_9 = arith.constant 0 : index
    %6 = vector.load %arg13[%c0_8, %c0_9] : memref<8x128xf32, #tpu.memory_space<vmem>>, vector<8x128xf32>
    %c0_10 = arith.constant 0 : index
    %c0_11 = arith.constant 0 : index
    %7 = vector.load %arg6[%c0_10, %c0_11] : memref<8x32xf32, #tpu.memory_space<vmem>>, vector<8x32xf32>
    %c0_12 = arith.constant 0 : index
    %c0_13 = arith.constant 0 : index
    %c0_14 = arith.constant 0 : index
    %8 = vector.load %arg1[%c0_12, %c0_13, %c0_14] : memref<1x32x2xf32, #tpu.memory_space<vmem>>, vector<1x32x2xf32>
    %9 = vector.shape_cast %8 : vector<1x32x2xf32> to vector<32x2xf32>
    %c0_15 = arith.constant 0 : index
    %c0_16 = arith.constant 0 : index
    %c0_17 = arith.constant 0 : index
    %10 = vector.load %arg2[%c0_15, %c0_16, %c0_17] : memref<1x96x1xf32, #tpu.memory_space<vmem>>, vector<1x96x1xf32>
    %11 = vector.shape_cast %10 : vector<1x96x1xf32> to vector<96x1xf32>
    %12 = vector.extract_strided_slice %7 {offsets = [2, 0], sizes = [1, 32], strides = [1, 1]} : vector<8x32xf32> to vector<1x32xf32>
    %13 = vector.extract_strided_slice %9 {offsets = [0, 0], sizes = [32, 1], strides = [1, 1]} : vector<32x2xf32> to vector<32x1xf32>
    %14 = vector.extract_strided_slice %7 {offsets = [0, 0], sizes = [1, 32], strides = [1, 1]} : vector<8x32xf32> to vector<1x32xf32>
    %15 = vector.broadcast %13 : vector<32x1xf32> to vector<32x32xf32>
    %16 = vector.broadcast %14 : vector<1x32xf32> to vector<32x32xf32>
    %17 = arith.mulf %15, %16 : vector<32x32xf32>
    %18 = vector.broadcast %12 : vector<1x32xf32> to vector<32x32xf32>
    %19 = arith.addf %18, %17 : vector<32x32xf32>
    %20 = vector.extract_strided_slice %9 {offsets = [0, 1], sizes = [32, 1], strides = [1, 1]} : vector<32x2xf32> to vector<32x1xf32>
    %21 = vector.extract_strided_slice %7 {offsets = [1, 0], sizes = [1, 32], strides = [1, 1]} : vector<8x32xf32> to vector<1x32xf32>
    %22 = vector.broadcast %20 : vector<32x1xf32> to vector<32x32xf32>
    %23 = vector.broadcast %21 : vector<1x32xf32> to vector<32x32xf32>
    %24 = arith.mulf %22, %23 : vector<32x32xf32>
    %25 = arith.addf %19, %24 : vector<32x32xf32>
    %26 = vector.extract_strided_slice %7 {offsets = [3, 0], sizes = [1, 32], strides = [1, 1]} : vector<8x32xf32> to vector<1x32xf32>
    %27 = vector.broadcast %11 : vector<96x1xf32> to vector<96x32xf32>
    %28 = vector.broadcast %26 : vector<1x32xf32> to vector<96x32xf32>
    %29 = arith.mulf %27, %28 : vector<96x32xf32>
    %30 = vector.extract_strided_slice %7 {offsets = [4, 0], sizes = [1, 32], strides = [1, 1]} : vector<8x32xf32> to vector<1x32xf32>
    %31 = vector.broadcast %30 : vector<1x32xf32> to vector<96x32xf32>
    %32 = arith.addf %29, %31 : vector<96x32xf32>
    %c0_18 = arith.constant 0 : index
    %c0_19 = arith.constant 0 : index
    %c0_20 = arith.constant 0 : index
    %33 = vector.load %arg9[%c0_18, %c0_19, %c0_20] : memref<3x2x136xf32, #tpu.memory_space<vmem>>, vector<1x2x136xf32>
    %34 = vector.shape_cast %33 : vector<1x2x136xf32> to vector<2x136xf32>
    %c0_21 = arith.constant 0 : index
    %c0_22 = arith.constant 0 : index
    %c0_23 = arith.constant 0 : index
    %35 = vector.load %arg7[%c0_21, %c0_22, %c0_23] : memref<3x32x136xbf16, #tpu.memory_space<vmem>>, vector<1x32x136xbf16>
    %36 = vector.shape_cast %35 : vector<1x32x136xbf16> to vector<32x136xbf16>
    %37 = arith.truncf %25 : vector<32x32xf32> to vector<32x32xbf16>
    %cst = arith.constant dense<0.000000e+00> : vector<32x136xf32>
    %38 = tpu.matmul %37, %36, %cst {dimension_numbers = #tpu.dot_dimension_numbers<[1], [0], [0], [1], [0, 0, 1, 1], [], []>} : vector<32x32xbf16>, vector<32x136xbf16>, vector<32x136xf32> -> vector<32x136xf32>
    %39 = vector.extract_strided_slice %34 {offsets = [0, 0], sizes = [1, 136], strides = [1, 1]} : vector<2x136xf32> to vector<1x136xf32>
    %40 = vector.broadcast %39 : vector<1x136xf32> to vector<32x136xf32>
    %41 = arith.addf %38, %40 : vector<32x136xf32>
    %42 = vector.extract_strided_slice %41 {offsets = [0, 0], sizes = [32, 64], strides = [1, 1]} : vector<32x136xf32> to vector<32x64xf32>
    %43 = vector.extract_strided_slice %41 {offsets = [0, 64], sizes = [32, 32], strides = [1, 1]} : vector<32x136xf32> to vector<32x32xf32>
    %44 = vector.extract_strided_slice %41 {offsets = [0, 96], sizes = [32, 32], strides = [1, 1]} : vector<32x136xf32> to vector<32x32xf32>
    %c0_24 = arith.constant 0 : index
    %c0_25 = arith.constant 0 : index
    %c0_26 = arith.constant 0 : index
    %45 = vector.load %arg8[%c0_24, %c0_25, %c0_26] : memref<3x32x32xbf16, #tpu.memory_space<vmem>>, vector<1x32x32xbf16>
    %46 = vector.shape_cast %45 : vector<1x32x32xbf16> to vector<32x32xbf16>
    %47 = arith.truncf %32 : vector<96x32xf32> to vector<96x32xbf16>
    %cst_27 = arith.constant dense<0.000000e+00> : vector<96x32xf32>
    %48 = tpu.matmul %47, %46, %cst_27 {dimension_numbers = #tpu.dot_dimension_numbers<[1], [0], [0], [1], [0, 0, 1, 1], [], []>} : vector<96x32xbf16>, vector<32x32xbf16>, vector<96x32xf32> -> vector<96x32xf32>
    %49 = vector.extract_strided_slice %34 {offsets = [1, 0], sizes = [1, 32], strides = [1, 1]} : vector<2x136xf32> to vector<1x32xf32>
    %50 = vector.broadcast %49 : vector<1x32xf32> to vector<96x32xf32>
    %51 = arith.addf %48, %50 : vector<96x32xf32>
    %52 = arith.truncf %42 : vector<32x64xf32> to vector<32x64xbf16>
    %cst_28 = arith.constant dense<0.000000e+00> : vector<96x64xf32>
    %53 = tpu.matmul %1, %52, %cst_28 {dimension_numbers = #tpu.dot_dimension_numbers<[1], [0], [0], [1], [0, 0, 1, 1], [], []>} : vector<96x32xbf16>, vector<32x64xbf16>, vector<96x64xf32> -> vector<96x64xf32>
    %54 = arith.truncf %44 : vector<32x32xf32> to vector<32x32xbf16>
    %cst_29 = arith.constant dense<0.000000e+00> : vector<96x32xf32>
    %55 = tpu.matmul %3, %54, %cst_29 {dimension_numbers = #tpu.dot_dimension_numbers<[1], [0], [0], [1], [0, 0, 1, 1], [], []>} : vector<96x32xbf16>, vector<32x32xbf16>, vector<96x32xf32> -> vector<96x32xf32>
    %56 = vector.extract_strided_slice %53 {offsets = [0, 0], sizes = [96, 32], strides = [1, 1]} : vector<96x64xf32> to vector<96x32xf32>
    %57 = arith.addf %51, %56 : vector<96x32xf32>
    %58 = arith.addf %57, %55 : vector<96x32xf32>
    %59 = vector.extract_strided_slice %53 {offsets = [0, 32], sizes = [96, 32], strides = [1, 1]} : vector<96x64xf32> to vector<96x32xf32>
    %60 = arith.negf %58 : vector<96x32xf32>
    %61 = math.exp %60 : vector<96x32xf32>
    %cst_30 = arith.constant 1.000000e+00 : f32
    %62 = vector.broadcast %cst_30 : f32 to vector<96x32xf32>
    %63 = arith.addf %62, %61 : vector<96x32xf32>
    %64 = arith.divf %62, %63 : vector<96x32xf32>
    %65 = arith.mulf %64, %59 : vector<96x32xf32>
    %66 = tpu.concatenate %65, %64 in 1 : vector<96x32xf32>, vector<96x32xf32> -> vector<96x64xf32>
    %67 = arith.truncf %66 : vector<96x64xf32> to vector<96x64xbf16>
    %cst_31 = arith.constant dense<0.000000e+00> : vector<32x64xf32>
    %68 = tpu.matmul %5, %67, %cst_31 {dimension_numbers = #tpu.dot_dimension_numbers<[1], [0], [0], [1], [0, 0, 1, 1], [], []>} : vector<32x96xbf16>, vector<96x64xbf16>, vector<32x64xf32> -> vector<32x64xf32>
    %69 = vector.extract_strided_slice %68 {offsets = [0, 0], sizes = [32, 32], strides = [1, 1]} : vector<32x64xf32> to vector<32x32xf32>
    %70 = vector.extract_strided_slice %68 {offsets = [0, 32], sizes = [32, 32], strides = [1, 1]} : vector<32x64xf32> to vector<32x32xf32>
    %cst_32 = arith.constant 9.99999997E-7 : f32
    %71 = vector.broadcast %cst_32 : f32 to vector<32x32xf32>
    %72 = arith.addf %70, %71 : vector<32x32xf32>
    %73 = tpu.reciprocal %72 {approx = true} : vector<32x32xf32> -> vector<32x32xf32>
    %74 = arith.mulf %69, %73 : vector<32x32xf32>
    %75 = arith.addf %43, %74 : vector<32x32xf32>
    %cst_33 = arith.constant 0.000000e+00 : f32
    %76 = vector.broadcast %cst_33 : f32 to vector<32x32xf32>
    %77 = arith.maximumf %75, %76 : vector<32x32xf32>
    %78 = arith.addf %25, %77 : vector<32x32xf32>
    %cst_34 = arith.constant 0.000000e+00 : f32
    %79 = vector.broadcast %cst_34 : f32 to vector<96x32xf32>
    %80 = arith.maximumf %58, %79 : vector<96x32xf32>
    %81 = arith.addf %32, %80 : vector<96x32xf32>
    %c1 = arith.constant 1 : index
    %c0_35 = arith.constant 0 : index
    %c0_36 = arith.constant 0 : index
    %82 = vector.load %arg9[%c1, %c0_35, %c0_36] : memref<3x2x136xf32, #tpu.memory_space<vmem>>, vector<1x2x136xf32>
    %83 = vector.shape_cast %82 : vector<1x2x136xf32> to vector<2x136xf32>
    %c1_37 = arith.constant 1 : index
    %c0_38 = arith.constant 0 : index
    %c0_39 = arith.constant 0 : index
    %84 = vector.load %arg7[%c1_37, %c0_38, %c0_39] : memref<3x32x136xbf16, #tpu.memory_space<vmem>>, vector<1x32x136xbf16>
    %85 = vector.shape_cast %84 : vector<1x32x136xbf16> to vector<32x136xbf16>
    %86 = arith.truncf %78 : vector<32x32xf32> to vector<32x32xbf16>
    %cst_40 = arith.constant dense<0.000000e+00> : vector<32x136xf32>
    %87 = tpu.matmul %86, %85, %cst_40 {dimension_numbers = #tpu.dot_dimension_numbers<[1], [0], [0], [1], [0, 0, 1, 1], [], []>} : vector<32x32xbf16>, vector<32x136xbf16>, vector<32x136xf32> -> vector<32x136xf32>
    %88 = vector.extract_strided_slice %83 {offsets = [0, 0], sizes = [1, 136], strides = [1, 1]} : vector<2x136xf32> to vector<1x136xf32>
    %89 = vector.broadcast %88 : vector<1x136xf32> to vector<32x136xf32>
    %90 = arith.addf %87, %89 : vector<32x136xf32>
    %91 = vector.extract_strided_slice %90 {offsets = [0, 128], sizes = [32, 8], strides = [1, 1]} : vector<32x136xf32> to vector<32x8xf32>
    %cst_41 = arith.constant dense<0xFF800000> : vector<32xf32>
    %92 = vector.multi_reduction <maximumf>, %91, %cst_41 [1] : vector<32x8xf32> to vector<32xf32>
    %93 = vector.shape_cast %92 : vector<32xf32> to vector<32x1xf32>
    %94 = vector.broadcast %93 : vector<32x1xf32> to vector<32x8xf32>
    %95 = arith.subf %91, %94 : vector<32x8xf32>
    %96 = math.exp %95 : vector<32x8xf32>
    %cst_42 = arith.constant dense<0.000000e+00> : vector<32xf32>
    %97 = vector.multi_reduction <add>, %96, %cst_42 [1] : vector<32x8xf32> to vector<32xf32>
    %98 = vector.shape_cast %97 : vector<32xf32> to vector<32x1xf32>
    %99 = vector.broadcast %98 : vector<32x1xf32> to vector<32x8xf32>
    %100 = arith.divf %96, %99 : vector<32x8xf32>
    %101 = vector.extract_strided_slice %90 {offsets = [0, 0], sizes = [32, 64], strides = [1, 1]} : vector<32x136xf32> to vector<32x64xf32>
    %102 = vector.extract_strided_slice %90 {offsets = [0, 64], sizes = [32, 32], strides = [1, 1]} : vector<32x136xf32> to vector<32x32xf32>
    %103 = vector.extract_strided_slice %90 {offsets = [0, 96], sizes = [32, 32], strides = [1, 1]} : vector<32x136xf32> to vector<32x32xf32>
    %c1_43 = arith.constant 1 : index
    %c0_44 = arith.constant 0 : index
    %c0_45 = arith.constant 0 : index
    %104 = vector.load %arg8[%c1_43, %c0_44, %c0_45] : memref<3x32x32xbf16, #tpu.memory_space<vmem>>, vector<1x32x32xbf16>
    %105 = vector.shape_cast %104 : vector<1x32x32xbf16> to vector<32x32xbf16>
    %106 = arith.truncf %81 : vector<96x32xf32> to vector<96x32xbf16>
    %cst_46 = arith.constant dense<0.000000e+00> : vector<96x32xf32>
    %107 = tpu.matmul %106, %105, %cst_46 {dimension_numbers = #tpu.dot_dimension_numbers<[1], [0], [0], [1], [0, 0, 1, 1], [], []>} : vector<96x32xbf16>, vector<32x32xbf16>, vector<96x32xf32> -> vector<96x32xf32>
    %108 = vector.extract_strided_slice %83 {offsets = [1, 0], sizes = [1, 32], strides = [1, 1]} : vector<2x136xf32> to vector<1x32xf32>
    %109 = vector.broadcast %108 : vector<1x32xf32> to vector<96x32xf32>
    %110 = arith.addf %107, %109 : vector<96x32xf32>
    %111 = arith.truncf %101 : vector<32x64xf32> to vector<32x64xbf16>
    %cst_47 = arith.constant dense<0.000000e+00> : vector<96x64xf32>
    %112 = tpu.matmul %1, %111, %cst_47 {dimension_numbers = #tpu.dot_dimension_numbers<[1], [0], [0], [1], [0, 0, 1, 1], [], []>} : vector<96x32xbf16>, vector<32x64xbf16>, vector<96x64xf32> -> vector<96x64xf32>
    %113 = arith.truncf %103 : vector<32x32xf32> to vector<32x32xbf16>
    %cst_48 = arith.constant dense<0.000000e+00> : vector<96x32xf32>
    %114 = tpu.matmul %3, %113, %cst_48 {dimension_numbers = #tpu.dot_dimension_numbers<[1], [0], [0], [1], [0, 0, 1, 1], [], []>} : vector<96x32xbf16>, vector<32x32xbf16>, vector<96x32xf32> -> vector<96x32xf32>
    %115 = vector.extract_strided_slice %112 {offsets = [0, 0], sizes = [96, 32], strides = [1, 1]} : vector<96x64xf32> to vector<96x32xf32>
    %116 = arith.addf %110, %115 : vector<96x32xf32>
    %117 = arith.addf %116, %114 : vector<96x32xf32>
    %118 = vector.extract_strided_slice %112 {offsets = [0, 32], sizes = [96, 32], strides = [1, 1]} : vector<96x64xf32> to vector<96x32xf32>
    %119 = arith.negf %117 : vector<96x32xf32>
    %120 = math.exp %119 : vector<96x32xf32>
    %cst_49 = arith.constant 1.000000e+00 : f32
    %121 = vector.broadcast %cst_49 : f32 to vector<96x32xf32>
    %122 = arith.addf %121, %120 : vector<96x32xf32>
    %123 = arith.divf %121, %122 : vector<96x32xf32>
    %124 = arith.mulf %123, %118 : vector<96x32xf32>
    %125 = tpu.concatenate %124, %123 in 1 : vector<96x32xf32>, vector<96x32xf32> -> vector<96x64xf32>
    %126 = arith.truncf %125 : vector<96x64xf32> to vector<96x64xbf16>
    %cst_50 = arith.constant dense<0.000000e+00> : vector<32x64xf32>
    %127 = tpu.matmul %5, %126, %cst_50 {dimension_numbers = #tpu.dot_dimension_numbers<[1], [0], [0], [1], [0, 0, 1, 1], [], []>} : vector<32x96xbf16>, vector<96x64xbf16>, vector<32x64xf32> -> vector<32x64xf32>
    %128 = vector.extract_strided_slice %127 {offsets = [0, 0], sizes = [32, 32], strides = [1, 1]} : vector<32x64xf32> to vector<32x32xf32>
    %129 = vector.extract_strided_slice %127 {offsets = [0, 32], sizes = [32, 32], strides = [1, 1]} : vector<32x64xf32> to vector<32x32xf32>
    %cst_51 = arith.constant 9.99999997E-7 : f32
    %130 = vector.broadcast %cst_51 : f32 to vector<32x32xf32>
    %131 = arith.addf %129, %130 : vector<32x32xf32>
    %132 = tpu.reciprocal %131 {approx = true} : vector<32x32xf32> -> vector<32x32xf32>
    %133 = arith.mulf %128, %132 : vector<32x32xf32>
    %134 = arith.addf %102, %133 : vector<32x32xf32>
    %cst_52 = arith.constant 0.000000e+00 : f32
    %135 = vector.broadcast %cst_52 : f32 to vector<32x32xf32>
    %136 = arith.maximumf %134, %135 : vector<32x32xf32>
    %137 = arith.addf %78, %136 : vector<32x32xf32>
    %cst_53 = arith.constant 0.000000e+00 : f32
    %138 = vector.broadcast %cst_53 : f32 to vector<96x32xf32>
    %139 = arith.maximumf %117, %138 : vector<96x32xf32>
    %140 = arith.addf %81, %139 : vector<96x32xf32>
    %c2 = arith.constant 2 : index
    %c0_54 = arith.constant 0 : index
    %c0_55 = arith.constant 0 : index
    %141 = vector.load %arg9[%c2, %c0_54, %c0_55] : memref<3x2x136xf32, #tpu.memory_space<vmem>>, vector<1x2x136xf32>
    %142 = vector.shape_cast %141 : vector<1x2x136xf32> to vector<2x136xf32>
    %c2_56 = arith.constant 2 : index
    %c0_57 = arith.constant 0 : index
    %c0_58 = arith.constant 0 : index
    %143 = vector.load %arg7[%c2_56, %c0_57, %c0_58] : memref<3x32x136xbf16, #tpu.memory_space<vmem>>, vector<1x32x136xbf16>
    %144 = vector.shape_cast %143 : vector<1x32x136xbf16> to vector<32x136xbf16>
    %145 = arith.truncf %137 : vector<32x32xf32> to vector<32x32xbf16>
    %cst_59 = arith.constant dense<0.000000e+00> : vector<32x136xf32>
    %146 = tpu.matmul %145, %144, %cst_59 {dimension_numbers = #tpu.dot_dimension_numbers<[1], [0], [0], [1], [0, 0, 1, 1], [], []>} : vector<32x32xbf16>, vector<32x136xbf16>, vector<32x136xf32> -> vector<32x136xf32>
    %147 = vector.extract_strided_slice %142 {offsets = [0, 0], sizes = [1, 136], strides = [1, 1]} : vector<2x136xf32> to vector<1x136xf32>
    %148 = vector.broadcast %147 : vector<1x136xf32> to vector<32x136xf32>
    %149 = arith.addf %146, %148 : vector<32x136xf32>
    %150 = vector.extract_strided_slice %149 {offsets = [0, 128], sizes = [32, 8], strides = [1, 1]} : vector<32x136xf32> to vector<32x8xf32>
    %cst_60 = arith.constant dense<0xFF800000> : vector<32xf32>
    %151 = vector.multi_reduction <maximumf>, %150, %cst_60 [1] : vector<32x8xf32> to vector<32xf32>
    %152 = vector.shape_cast %151 : vector<32xf32> to vector<32x1xf32>
    %153 = vector.broadcast %152 : vector<32x1xf32> to vector<32x8xf32>
    %154 = arith.subf %150, %153 : vector<32x8xf32>
    %155 = math.exp %154 : vector<32x8xf32>
    %cst_61 = arith.constant dense<0.000000e+00> : vector<32xf32>
    %156 = vector.multi_reduction <add>, %155, %cst_61 [1] : vector<32x8xf32> to vector<32xf32>
    %157 = vector.shape_cast %156 : vector<32xf32> to vector<32x1xf32>
    %158 = vector.broadcast %157 : vector<32x1xf32> to vector<32x8xf32>
    %159 = arith.divf %155, %158 : vector<32x8xf32>
    %160 = vector.extract_strided_slice %149 {offsets = [0, 0], sizes = [32, 64], strides = [1, 1]} : vector<32x136xf32> to vector<32x64xf32>
    %161 = vector.extract_strided_slice %149 {offsets = [0, 64], sizes = [32, 32], strides = [1, 1]} : vector<32x136xf32> to vector<32x32xf32>
    %162 = vector.extract_strided_slice %149 {offsets = [0, 96], sizes = [32, 32], strides = [1, 1]} : vector<32x136xf32> to vector<32x32xf32>
    %c2_62 = arith.constant 2 : index
    %c0_63 = arith.constant 0 : index
    %c0_64 = arith.constant 0 : index
    %163 = vector.load %arg8[%c2_62, %c0_63, %c0_64] : memref<3x32x32xbf16, #tpu.memory_space<vmem>>, vector<1x32x32xbf16>
    %164 = vector.shape_cast %163 : vector<1x32x32xbf16> to vector<32x32xbf16>
    %165 = arith.truncf %140 : vector<96x32xf32> to vector<96x32xbf16>
    %cst_65 = arith.constant dense<0.000000e+00> : vector<96x32xf32>
    %166 = tpu.matmul %165, %164, %cst_65 {dimension_numbers = #tpu.dot_dimension_numbers<[1], [0], [0], [1], [0, 0, 1, 1], [], []>} : vector<96x32xbf16>, vector<32x32xbf16>, vector<96x32xf32> -> vector<96x32xf32>
    %167 = vector.extract_strided_slice %142 {offsets = [1, 0], sizes = [1, 32], strides = [1, 1]} : vector<2x136xf32> to vector<1x32xf32>
    %168 = vector.broadcast %167 : vector<1x32xf32> to vector<96x32xf32>
    %169 = arith.addf %166, %168 : vector<96x32xf32>
    %170 = arith.truncf %160 : vector<32x64xf32> to vector<32x64xbf16>
    %cst_66 = arith.constant dense<0.000000e+00> : vector<96x64xf32>
    %171 = tpu.matmul %1, %170, %cst_66 {dimension_numbers = #tpu.dot_dimension_numbers<[1], [0], [0], [1], [0, 0, 1, 1], [], []>} : vector<96x32xbf16>, vector<32x64xbf16>, vector<96x64xf32> -> vector<96x64xf32>
    %172 = arith.truncf %162 : vector<32x32xf32> to vector<32x32xbf16>
    %cst_67 = arith.constant dense<0.000000e+00> : vector<96x32xf32>
    %173 = tpu.matmul %3, %172, %cst_67 {dimension_numbers = #tpu.dot_dimension_numbers<[1], [0], [0], [1], [0, 0, 1, 1], [], []>} : vector<96x32xbf16>, vector<32x32xbf16>, vector<96x32xf32> -> vector<96x32xf32>
    %174 = vector.extract_strided_slice %171 {offsets = [0, 0], sizes = [96, 32], strides = [1, 1]} : vector<96x64xf32> to vector<96x32xf32>
    %175 = arith.addf %169, %174 : vector<96x32xf32>
    %176 = arith.addf %175, %173 : vector<96x32xf32>
    %177 = vector.extract_strided_slice %171 {offsets = [0, 32], sizes = [96, 32], strides = [1, 1]} : vector<96x64xf32> to vector<96x32xf32>
    %178 = arith.negf %176 : vector<96x32xf32>
    %179 = math.exp %178 : vector<96x32xf32>
    %cst_68 = arith.constant 1.000000e+00 : f32
    %180 = vector.broadcast %cst_68 : f32 to vector<96x32xf32>
    %181 = arith.addf %180, %179 : vector<96x32xf32>
    %182 = arith.divf %180, %181 : vector<96x32xf32>
    %183 = arith.mulf %182, %177 : vector<96x32xf32>
    %184 = tpu.concatenate %183, %182 in 1 : vector<96x32xf32>, vector<96x32xf32> -> vector<96x64xf32>
    %185 = arith.truncf %184 : vector<96x64xf32> to vector<96x64xbf16>
    %cst_69 = arith.constant dense<0.000000e+00> : vector<32x64xf32>
    %186 = tpu.matmul %5, %185, %cst_69 {dimension_numbers = #tpu.dot_dimension_numbers<[1], [0], [0], [1], [0, 0, 1, 1], [], []>} : vector<32x96xbf16>, vector<96x64xbf16>, vector<32x64xf32> -> vector<32x64xf32>
    %187 = vector.extract_strided_slice %186 {offsets = [0, 0], sizes = [32, 32], strides = [1, 1]} : vector<32x64xf32> to vector<32x32xf32>
    %188 = vector.extract_strided_slice %186 {offsets = [0, 32], sizes = [32, 32], strides = [1, 1]} : vector<32x64xf32> to vector<32x32xf32>
    %cst_70 = arith.constant 9.99999997E-7 : f32
    %189 = vector.broadcast %cst_70 : f32 to vector<32x32xf32>
    %190 = arith.addf %188, %189 : vector<32x32xf32>
    %191 = tpu.reciprocal %190 {approx = true} : vector<32x32xf32> -> vector<32x32xf32>
    %192 = arith.mulf %187, %191 : vector<32x32xf32>
    %193 = arith.addf %161, %192 : vector<32x32xf32>
    %cst_71 = arith.constant 0.000000e+00 : f32
    %194 = vector.broadcast %cst_71 : f32 to vector<32x32xf32>
    %195 = arith.maximumf %193, %194 : vector<32x32xf32>
    %196 = arith.addf %137, %195 : vector<32x32xf32>
    %c0_72 = arith.constant 0 : index
    %c0_73 = arith.constant 0 : index
    %197 = vector.load %arg10[%c0_72, %c0_73] : memref<32x72xbf16, #tpu.memory_space<vmem>>, vector<32x72xbf16>
    %198 = arith.truncf %196 : vector<32x32xf32> to vector<32x32xbf16>
    %cst_74 = arith.constant dense<0.000000e+00> : vector<32x72xf32>
    %199 = tpu.matmul %198, %197, %cst_74 {dimension_numbers = #tpu.dot_dimension_numbers<[1], [0], [0], [1], [0, 0, 1, 1], [], []>} : vector<32x32xbf16>, vector<32x72xbf16>, vector<32x72xf32> -> vector<32x72xf32>
    %200 = vector.extract_strided_slice %199 {offsets = [0, 64], sizes = [32, 8], strides = [1, 1]} : vector<32x72xf32> to vector<32x8xf32>
    %201 = vector.extract_strided_slice %6 {offsets = [1, 0], sizes = [1, 8], strides = [1, 1]} : vector<8x128xf32> to vector<1x8xf32>
    %202 = vector.broadcast %201 : vector<1x8xf32> to vector<32x8xf32>
    %203 = arith.addf %200, %202 : vector<32x8xf32>
    %cst_75 = arith.constant dense<0xFF800000> : vector<32xf32>
    %204 = vector.multi_reduction <maximumf>, %203, %cst_75 [1] : vector<32x8xf32> to vector<32xf32>
    %205 = vector.shape_cast %204 : vector<32xf32> to vector<32x1xf32>
    %206 = vector.broadcast %205 : vector<32x1xf32> to vector<32x8xf32>
    %207 = arith.subf %203, %206 : vector<32x8xf32>
    %208 = math.exp %207 : vector<32x8xf32>
    %cst_76 = arith.constant dense<0.000000e+00> : vector<32xf32>
    %209 = vector.multi_reduction <add>, %208, %cst_76 [1] : vector<32x8xf32> to vector<32xf32>
    %210 = vector.shape_cast %209 : vector<32xf32> to vector<32x1xf32>
    %211 = vector.broadcast %210 : vector<32x1xf32> to vector<32x8xf32>
    %212 = arith.divf %208, %211 : vector<32x8xf32>
    %213 = vector.extract_strided_slice %199 {offsets = [0, 0], sizes = [32, 32], strides = [1, 1]} : vector<32x72xf32> to vector<32x32xf32>
    %214 = arith.truncf %213 : vector<32x32xf32> to vector<32x32xbf16>
    %cst_77 = arith.constant dense<0.000000e+00> : vector<96x32xf32>
    %215 = tpu.matmul %1, %214, %cst_77 {dimension_numbers = #tpu.dot_dimension_numbers<[1], [0], [0], [1], [0, 0, 1, 1], [], []>} : vector<96x32xbf16>, vector<32x32xbf16>, vector<96x32xf32> -> vector<96x32xf32>
    %216 = vector.extract_strided_slice %199 {offsets = [0, 32], sizes = [32, 32], strides = [1, 1]} : vector<32x72xf32> to vector<32x32xf32>
    %217 = arith.truncf %216 : vector<32x32xf32> to vector<32x32xbf16>
    %cst_78 = arith.constant dense<0.000000e+00> : vector<96x32xf32>
    %218 = tpu.matmul %3, %217, %cst_78 {dimension_numbers = #tpu.dot_dimension_numbers<[1], [0], [0], [1], [0, 0, 1, 1], [], []>} : vector<96x32xbf16>, vector<32x32xbf16>, vector<96x32xf32> -> vector<96x32xf32>
    %219 = arith.addf %215, %218 : vector<96x32xf32>
    %220 = vector.extract_strided_slice %6 {offsets = [0, 0], sizes = [1, 32], strides = [1, 1]} : vector<8x128xf32> to vector<1x32xf32>
    %221 = vector.broadcast %220 : vector<1x32xf32> to vector<96x32xf32>
    %222 = arith.addf %219, %221 : vector<96x32xf32>
    %cst_79 = arith.constant 0.000000e+00 : f32
    %223 = vector.broadcast %cst_79 : f32 to vector<96x32xf32>
    %224 = arith.maximumf %222, %223 : vector<96x32xf32>
    %c0_80 = arith.constant 0 : index
    %c0_81 = arith.constant 0 : index
    %225 = vector.load %arg11[%c0_80, %c0_81] : memref<32x16xbf16, #tpu.memory_space<vmem>>, vector<32x16xbf16>
    %226 = arith.truncf %224 : vector<96x32xf32> to vector<96x32xbf16>
    %cst_82 = arith.constant dense<0.000000e+00> : vector<96x16xf32>
    %227 = tpu.matmul %226, %225, %cst_82 {dimension_numbers = #tpu.dot_dimension_numbers<[1], [0], [0], [1], [0, 0, 1, 1], [], []>} : vector<96x32xbf16>, vector<32x16xbf16>, vector<96x16xf32> -> vector<96x16xf32>
    %228 = vector.extract_strided_slice %6 {offsets = [2, 0], sizes = [1, 16], strides = [1, 1]} : vector<8x128xf32> to vector<1x16xf32>
    %229 = vector.broadcast %228 : vector<1x16xf32> to vector<96x16xf32>
    %230 = arith.addf %227, %229 : vector<96x16xf32>
    %cst_83 = arith.constant 0.000000e+00 : f32
    %231 = vector.broadcast %cst_83 : f32 to vector<96x16xf32>
    %232 = arith.maximumf %230, %231 : vector<96x16xf32>
    %c0_84 = arith.constant 0 : index
    %c0_85 = arith.constant 0 : index
    %233 = vector.load %arg12[%c0_84, %c0_85] : memref<16x128xbf16, #tpu.memory_space<vmem>>, vector<16x128xbf16>
    %234 = arith.truncf %232 : vector<96x16xf32> to vector<96x16xbf16>
    %cst_86 = arith.constant dense<0.000000e+00> : vector<96x128xf32>
    %235 = tpu.matmul %234, %233, %cst_86 {dimension_numbers = #tpu.dot_dimension_numbers<[1], [0], [0], [1], [0, 0, 1, 1], [], []>} : vector<96x16xbf16>, vector<16x128xbf16>, vector<96x128xf32> -> vector<96x128xf32>
    %236 = vector.extract_strided_slice %6 {offsets = [3, 0], sizes = [1, 128], strides = [1, 1]} : vector<8x128xf32> to vector<1x128xf32>
    %237 = vector.broadcast %236 : vector<1x128xf32> to vector<96x128xf32>
    %238 = arith.addf %235, %237 : vector<96x128xf32>
    %c0_87 = arith.constant 0 : index
    %c0_88 = arith.constant 0 : index
    %c0_89 = arith.constant 0 : index
    %239 = vector.load %arg14[%c0_87, %c0_88, %c0_89] : memref<1x96x128xf32, #tpu.memory_space<vmem>>, vector<1x96x128xf32>
    %240 = vector.shape_cast %239 : vector<1x96x128xf32> to vector<96x128xf32>
    %241 = vector.shape_cast %238 : vector<96x128xf32> to vector<1x96x128xf32>
    tpu.vector_store %arg14[%c0_87, %c0_88, %c0_89], %241 {strides = array<i32>} : memref<1x96x128xf32, #tpu.memory_space<vmem>>, vector<1x96x128xf32>,
    %cst_90 = arith.constant 0.000000e+00 : f32
    %242 = vector.broadcast %cst_90 : f32 to vector<32x104xf32>
    %243 = tpu.concatenate %100, %159, %212, %242 in 1 : vector<32x8xf32>, vector<32x8xf32>, vector<32x8xf32>, vector<32x104xf32> -> vector<32x128xf32>
    %c0_91 = arith.constant 0 : index
    %c0_92 = arith.constant 0 : index
    %c0_93 = arith.constant 0 : index
    %244 = vector.load %arg15[%c0_91, %c0_92, %c0_93] : memref<1x32x128xf32, #tpu.memory_space<vmem>>, vector<1x32x128xf32>
    %245 = vector.shape_cast %244 : vector<1x32x128xf32> to vector<32x128xf32>
    %246 = vector.shape_cast %243 : vector<32x128xf32> to vector<1x32x128xf32>
    tpu.vector_store %arg15[%c0_91, %c0_92, %c0_93], %246 {strides = array<i32>} : memref<1x32x128xf32, #tpu.memory_space<vmem>>, vector<1x32x128xf32>,
    return
  }
  func.func @transform_0(%arg0: i32) -> (i32, i32, i32) {
    %c0_i32 = arith.constant 0 : i32
    %c0_i32_0 = arith.constant 0 : i32
    %c0_i32_1 = arith.constant 0 : i32
    return %arg0, %c0_i32, %c0_i32_0 : i32, i32, i32
  }
  func.func @transform_1(%arg0: i32) -> (i32, i32, i32) {
    %c0_i32 = arith.constant 0 : i32
    %c0_i32_0 = arith.constant 0 : i32
    %c0_i32_1 = arith.constant 0 : i32
    return %arg0, %c0_i32, %c0_i32_0 : i32, i32, i32
  }
  func.func @transform_2(%arg0: i32) -> (i32, i32, i32) {
    %c0_i32 = arith.constant 0 : i32
    %c0_i32_0 = arith.constant 0 : i32
    %c0_i32_1 = arith.constant 0 : i32
    return %arg0, %c0_i32, %c0_i32_0 : i32, i32, i32
  }
  func.func @transform_3(%arg0: i32) -> (i32, i32, i32) {
    %c0_i32 = arith.constant 0 : i32
    %c0_i32_0 = arith.constant 0 : i32
    %c0_i32_1 = arith.constant 0 : i32
    return %arg0, %c0_i32, %c0_i32_0 : i32, i32, i32
  }
  func.func @transform_4(%arg0: i32) -> (i32, i32, i32) {
    %c0_i32 = arith.constant 0 : i32
    %c0_i32_0 = arith.constant 0 : i32
    %c0_i32_1 = arith.constant 0 : i32
    return %arg0, %c0_i32, %c0_i32_0 : i32, i32, i32
  }
  func.func @transform_5(%arg0: i32) -> (i32, i32) {
    %c0_i32 = arith.constant 0 : i32
    %c0_i32_0 = arith.constant 0 : i32
    %c0_i32_1 = arith.constant 0 : i32
    return %c0_i32, %c0_i32_0 : i32, i32
  }
  func.func @transform_6(%arg0: i32) -> (i32, i32, i32) {
    %c0_i32 = arith.constant 0 : i32
    %c0_i32_0 = arith.constant 0 : i32
    %c0_i32_1 = arith.constant 0 : i32
    %c0_i32_2 = arith.constant 0 : i32
    return %c0_i32, %c0_i32_0, %c0_i32_1 : i32, i32, i32
  }
  func.func @transform_7(%arg0: i32) -> (i32, i32, i32) {
    %c0_i32 = arith.constant 0 : i32
    %c0_i32_0 = arith.constant 0 : i32
    %c0_i32_1 = arith.constant 0 : i32
    %c0_i32_2 = arith.constant 0 : i32
    return %c0_i32, %c0_i32_0, %c0_i32_1 : i32, i32, i32
  }
  func.func @transform_8(%arg0: i32) -> (i32, i32, i32) {
    %c0_i32 = arith.constant 0 : i32
    %c0_i32_0 = arith.constant 0 : i32
    %c0_i32_1 = arith.constant 0 : i32
    %c0_i32_2 = arith.constant 0 : i32
    return %c0_i32, %c0_i32_0, %c0_i32_1 : i32, i32, i32
  }
  func.func @transform_9(%arg0: i32) -> (i32, i32) {
    %c0_i32 = arith.constant 0 : i32
    %c0_i32_0 = arith.constant 0 : i32
    %c0_i32_1 = arith.constant 0 : i32
    return %c0_i32, %c0_i32_0 : i32, i32
  }
  func.func @transform_10(%arg0: i32) -> (i32, i32) {
    %c0_i32 = arith.constant 0 : i32
    %c0_i32_0 = arith.constant 0 : i32
    %c0_i32_1 = arith.constant 0 : i32
    return %c0_i32, %c0_i32_0 : i32, i32
  }
  func.func @transform_11(%arg0: i32) -> (i32, i32) {
    %c0_i32 = arith.constant 0 : i32
    %c0_i32_0 = arith.constant 0 : i32
    %c0_i32_1 = arith.constant 0 : i32
    return %c0_i32, %c0_i32_0 : i32, i32
  }
  func.func @transform_12(%arg0: i32) -> (i32, i32) {
    %c0_i32 = arith.constant 0 : i32
    %c0_i32_0 = arith.constant 0 : i32
    %c0_i32_1 = arith.constant 0 : i32
    return %c0_i32, %c0_i32_0 : i32, i32
  }
  func.func @transform_13(%arg0: i32) -> (i32, i32, i32) {
    %c0_i32 = arith.constant 0 : i32
    %c0_i32_0 = arith.constant 0 : i32
    %c0_i32_1 = arith.constant 0 : i32
    return %arg0, %c0_i32, %c0_i32_0 : i32, i32, i32
  }
  func.func @transform_14(%arg0: i32) -> (i32, i32, i32) {
    %c0_i32 = arith.constant 0 : i32
    %c0_i32_0 = arith.constant 0 : i32
    %c0_i32_1 = arith.constant 0 : i32
    return %arg0, %c0_i32, %c0_i32_0 : i32, i32, i32
  }
}

</mosaic_0001>

<bundles_post_ra>
// kernel: bigatedgcn_forward.1
= control target key start
LH: loop header
LB: loop body
LE: loop exit
PB: predicated region body
PF: predicated region fallthrough
CT: control target
= control target key end

     0   :  { %s4667_s29 = smov 0   ;;  %s6284_s0 = inlined_call_operand.vmem [shape: f32[2,32,2], index: 0, kind: input, shape index: {}]   ;;  %s6285_s1 = inlined_call_operand.vmem [shape: f32[2,96,1], index: 1, kind: input, shape index: {}]   ;;  %s6286_s2 = inlined_call_operand.vmem [shape: bf16[2,96,32], index: 2, kind: input, shape index: {}]   ;;  %s6287_s3 = inlined_call_operand.vmem [shape: bf16[2,96,32], index: 3, kind: input, shape index: {}]   ;;  %s6288_s4 = inlined_call_operand.vmem [shape: bf16[2,32,96], index: 4, kind: input, shape index: {}]   ;;  %s6289_s5 = inlined_call_operand.vmem [shape: f32[8,32], index: 5, kind: input, shape index: {}]   ;;  %s6290_s6 = inlined_call_operand.vmem [shape: bf16[3,32,136], index: 6, kind: input, shape index: {}]   ;;  %s6291_s7 = inlined_call_operand.vmem [shape: bf16[3,32,32], index: 7, kind: input, shape index: {}]   ;;  %s6292_s8 = inlined_call_operand.vmem [shape: f32[3,2,136], index: 8, kind: input, shape index: {}]   ;;  %s6293_s9 = inlined_call_operand.vmem [shape: bf16[32,72], index: 9, kind: input, shape index: {}]   ;;  %s6294_s10 = inlined_call_operand.vmem [shape: bf16[32,16], index: 10, kind: input, shape index: {}]   ;;  %s6295_s11 = inlined_call_operand.vmem [shape: bf16[16,128], index: 11, kind: input, shape index: {}]   ;;  %s6296_s12 = inlined_call_operand.vmem [shape: f32[8,128], index: 12, kind: input, shape index: {}]   ;;  %s6297_s13 = inlined_call_operand.vmem [shape: f32[2,96,128], index: 13, kind: output, shape index: {0}]   ;;  %s6298_s14 = inlined_call_operand.vmem [shape: f32[2,32,128], index: 14, kind: output, shape index: {1}]  }
   0x1 LB: > { %s3865_s30 = sadd.s32 4294967295, %s4583_s29   ;;  %p3869_p0 = scmp.ge.s32.totalorder %s4583_s29, 1  ;;  %s4583_s29 = sphi %s4667_s29, %s25_s29  }
   0x2   : > { %p455_p1 = scmp.lt.s32.totalorder %s4583_s29, 3 }
   0x4   : > { %p456_p2 = pnand %p3869_p0, %p455_p1 }
   0x5   : > { %p526_p3 = scmp.lt.s32.totalorder (!%p456_p2), %s3865_s30, 1  ;;  %s6305_s22 = smov (!%p456_p2), 32  }
   0x6   : > { %459 = sbr.rel (%p456_p2) target bundleno = 4315 (0x10db), region = 72  ;;  %s6301_s24 = smov (!%p456_p2), 64  }
   0x7   : > { %s6321_s28 = smov (!%p456_p2), 32   ;;  %s4590_s25 = smov (!%p456_p2), 8  }
   0xb   : > { %v4585_v0 = vmov 1   ;;  %v4586_v1 = vmov 0   ;;  %s6333_s30 = smov (!%p526_p3, %s3865_s30), 1  ;;  %v3886_v6 = vld [vmem:[%s6290_s6 + $0x10] sm:$0xf]  ;;  %v4706_v12 = vld [vmem:[%s6289_s5] sm:$0xff] }
   0xc   : > { %4228 = vset.pattern.permute.xlu1 %v4585_v0  ;;  %4227 = vset.pattern.permute.xlu0 %v4586_v1  ;;  %s6300_s15 = sshll.u32 %s6333_s30, 5  ;;  %v4190_v7 = vld [vmem:[%s6290_s6 + $0x14] sm:$0xf0]  ;;  %v3882_v9 = vld [vmem:[%s6290_s6] sm:$0xf]  ;;  %s6299_s27 = smul.u32 96, %s6333_s30 }
   0xd   : > { %4229 = vset.pattern.permute.xlu2 %v4586_v1  ;;  %s530_s18 = scalar_lea.vmem %s6284_s0, %s6300_s15  ;;  %v3887_v8 = vor.u32 %v4190_v7, %v3886_v6  ;;  %v4189_v10 = vld [vmem:[%s6290_s6 + $0x4] sm:$0xf0]  ;;  %v628_v15 = vperm.slane %v4706_v12, 0  ;;  %v654_v17 = vperm.slane %v4706_v12, 1  ;;  %v633_v18 = vperm.slane %v4706_v12, 2  ;;  %s4211_s23 = smul.u32 48, %s6333_s30 }
   0xe   : > { %v592_v2 = vld [vmem:[%s530_s18] sm:$0xff]  ;;  %v594_v3 = vld [vmem:[%s530_s18 + $0x10] sm:$0xff]  ;;  %v593_v4 = vld [vmem:[%s530_s18 + $0x8] sm:$0xff]  ;;  %v3883_v11 = vor.u32 %v4189_v10, %v3882_v9  ;;  %s4701_s17 = scalar_lea.vmem %s6285_s1, %s6299_s27  ;;  %vm772_vm0 = vcmask 261120   ;;  %s6330_s19 = sshll.u32 %s6333_s30, 5 }
   0xf   : > { %639 = vperm.xlu1 %4228, %v592_v2   ;;  %610 = vperm.xlu0 %4227, %v592_v2   ;;  %v595_v5 = vld [vmem:[%s530_s18 + $0x18] sm:$0xff]  ;;  %v596_v16 = vld [vmem:[%s4701_s17] sm:$0xff]  ;;  %v598_v21 = vld [vmem:[%s4701_s17 + $0x10] sm:$0xff]  ;;  %s4757_s26 = scalar_lea.vmem %s6286_s2, %s4211_s23  ;;  %s4791_s21 = scalar_lea.vmem %s6287_s3, %s4211_s23 }
  0x10   : > { %620 = vperm.xlu2 %4229, %v594_v3   ;;  %785 = vmatpush.bf16.msra.mxu0 %v3887_v8  ;;  %v601_v32 = vld [vmem:[%s4701_s17 + $0x28] sm:$0xff]  ;;  %v603_v45 = vld [vmem:[%s4701_s17 + $0x38] sm:$0xff]  ;;  %v606_v46 = vld [vmem:[%s4701_s17 + $0x50] sm:$0xff]  ;;  %s6303_s23 = smov 96   ;;  %s4173_s18 = sshll.u32 %s6333_s30, 4 }
  0x11   : > { %v4733_v47 = vld [vmem:[%s6292_s8] sm:$0xf]  ;;  %v605_v61 = vld [vmem:[%s4701_s17 + $0x48] sm:$0xff]  ;;  %v602_v2 = vld [vmem:[%s4701_s17 + $0x30] sm:$0xff]  ;;  %s5249_s20 = scalar_lea.vmem %s6288_s4, %s4173_s18  ;;  %s4591_s18 = smov 80  }
  0x12   : > { %v757_v49 = vperm.slane %v4733_v47, 0  ;;  %v600_v56 = vld [vmem:[%s4701_s17 + $0x20] sm:$0xff]  ;;  %v597_v63 = vld [vmem:[%s4701_s17 + $0x8] sm:$0xff]  ;;  %v4178_v6 = vld [vmem:[%s4757_s26 + $0x18] sm:$0xff]  ;;  %s6231_s27 = scalar_lea.vmem %s6298_s14, %s6330_s19 }
  0x13   : > { %v4175_v62 = vld [vmem:[%s4757_s26] sm:$0xff]  ;;  %v4192_v7 = vld [vmem:[%s6291_s7 + $0x8] sm:$0xff] }
  0x14   : > { %786 = vmatpush.bf16.msra.mxu0 %v3883_v11  ;;  %v759_v50 = vperm.slane %v757_v49, 0  ;;  %845 = vmatpush.bf16.msra.mxu1 %v4192_v7  ;;  %v4179_v8 = vld [vmem:[%s4757_s26 + $0x20] sm:$0xff]  ;;  %v4180_v10 = vld [vmem:[%s4757_s26 + $0x28] sm:$0xff] }
  0x15   : > { %v4191_v9 = vld [vmem:[%s6291_s7] sm:$0xff] }
  0x17   : > { %643 = vperm.xlu1 %4228, %v593_v4   ;;  %615 = vperm.xlu0 %4227, %v593_v4   ;;  %v4177_v4 = vld [vmem:[%s4757_s26 + $0x10] sm:$0xff] }
  0x18   : > { %625 = vperm.xlu2 %4229, %v595_v5   ;;  %846 = vmatpush.bf16.msra.mxu1 %v4191_v9 }
  0x1f   : > { %651 = vperm.xlu1 %4228, %v595_v5   ;;  %4230 = vset.pattern.permute.xlu0 %v4585_v0  ;;  %v599_v0 = vld [vmem:[%s4701_s17 + $0x18] sm:$0xff] }
  0x20   : > { %647 = vperm.xlu0 %4230, %v594_v3   ;;  %v604_v3 = vld [vmem:[%s4701_s17 + $0x40] sm:$0xff]  ;;  %v607_v5 = vld [vmem:[%s4701_s17 + $0x58] sm:$0xff] }
  0x27   : > { %4231 = vset.pattern.permute.xlu1 %v4586_v1 }
  0x28   : > { %4232 = vset.pattern.permute.xlu0 %v4586_v1  ;;  %665 = vperm.xlu1 %4231, %v596_v16   ;;  %v4176_v1 = vld [vmem:[%s4757_s26 + $0x8] sm:$0xff] }
  0x30   : > { %675 = vperm.xlu1 %4231, %v598_v21  }
  0x38   : > { %690 = vperm.xlu1 %4231, %v601_v32  }
  0x40   : > { %700 = vperm.xlu1 %4231, %v603_v45  }
  0x48   : > { %715 = vperm.xlu1 %4231, %v606_v46  }
  0x6a   : > { %v621_v20 = vpop.permute.xlu2 %620 }
  0x6b   : > { %v631_v34 = vmul.f32 %v628_v15, %v621_v20 }
  0x6d   : > { %v636_v38 = vadd.f32 %v633_v18, %v631_v34 }
  0x72   : > { %v626_v33 = vpop.permute.xlu2 %625 }
  0x73   : > { %v632_v35 = vmul.f32 %v628_v15, %v626_v33 }
  0x75   : > { %v637_v39 = vadd.f32 %v633_v18, %v632_v35 }
  0x81   : > { %v640_v13 = vpop.permute.xlu1 %639  ;;  %v611_v14 = vpop.permute.xlu0 %610 }
  0x82   : > { %v629_v19 = vmul.f32 %v628_v15, %v611_v14  ;;  %v655_v24 = vmul.f32 %v654_v17, %v640_v13  ;;  %v4784_v13 = vperm.slane %v4706_v12, 3 }
  0x84   : > { %v634_v25 = vadd.f32 %v633_v18, %v629_v19  ;;  %v4181_v19 = vld [vmem:[%s4791_s21] sm:$0xff] }
  0x86   : > { %v4713_v29 = vadd.f32 %v655_v24, %v634_v25 }
  0x89   : > { %v644_v22 = vpop.permute.xlu1 %643  ;;  %v616_v23 = vpop.permute.xlu0 %615 }
  0x8a   : > { %v630_v26 = vmul.f32 %v628_v15, %v616_v23  ;;  %v656_v27 = vmul.f32 %v654_v17, %v644_v22  ;;  %v4794_v15 = vperm.slane %v4706_v12, 4 }
  0x8c   : > { %v635_v28 = vadd.f32 %v633_v18, %v630_v26 }
  0x8e   : > { %v4715_v30 = vadd.f32 %v656_v27, %v635_v28  ;;  %v4182_v27 = vld [vmem:[%s4791_s21 + $0x8] sm:$0xff] }
  0x90   : > { %v754_v31 = vpack.c.bf16 %v4715_v30, %v4713_v29 }
  0x91   : > { %v652_v36 = vpop.permute.xlu1 %651 }
  0x92   : > { %3888 = vmatmul.msk.bf16.vlgmr.msra.gmra.mxu0 %vm772_vm0, %v754_v31  ;;  %v648_v37 = vpop.permute.xlu0 %647  ;;  %v658_v40 = vmul.f32 %v654_v17, %v652_v36 }
  0x93   : > { %v657_v41 = vmul.f32 %v654_v17, %v648_v37  ;;  %v4183_v37 = vld [vmem:[%s4791_s21 + $0x10] sm:$0xff] }
  0x94   : > { %v4721_v42 = vadd.f32 %v658_v40, %v637_v39 }
  0x95   : > { %v4723_v43 = vadd.f32 %v657_v41, %v636_v38 }
  0x97   : > { %v755_v44 = vpack.c.bf16 %v4721_v42, %v4723_v43 }
  0x9a   : > { %v666_v14 = vpop.permute.xlu1 %665 }
  0x9b   : > { %v724_v16 = vmul.f32 %v4784_v13, %v666_v14 }
  0x9d   : > { %v4799_v20 = vadd.f32 %v4794_v15, %v724_v16 }
  0xa2   : > { %3889 = vmatmul.msk.bf16.gmra.mxu0 %vm772_vm0, %v755_v44  ;;  %v676_v25 = vpop.permute.xlu1 %675 }
  0xa3   : > { %v726_v26 = vmul.f32 %v4784_v13, %v676_v25 }
  0xa5   : > { %v4816_v31 = vadd.f32 %v4794_v15, %v726_v26 }
  0xaa   : > { %v691_v35 = vpop.permute.xlu1 %690 }
  0xab   : > { %v729_v36 = vmul.f32 %v4784_v13, %v691_v35 }
  0xad   : > { %v4829_v39 = vadd.f32 %v4794_v15, %v729_v36 }
  0xb2   : > { %v701_v46 = vpop.permute.xlu1 %700 }
 0x10f   : > { %v788_v48 = vpop.f32.mrf.mxu0 }
 0x110   : > { %v4736_v52 = vadd.f32 %v788_v48, %v759_v50  ;;  %v731_v48 = vmul.f32 %v4784_v13, %v701_v46 }
 0x117   : > { %v790_v51 = vpop.f32.mrf.mxu0 }
 0x118   : > { %v4738_v53 = vadd.f32 %v790_v51, %v759_v50 }
 0x11a   : > { %v878_v54 = vpack.c.bf16 %v4738_v53, %v4736_v52 }
 0x11c   : > { %999 = vrot.lane.b32.xlu0 %v878_v54, %s6305_s22 }
 0x11f   : > { %v793_v55 = vpop.f32.mrf.mxu0 }
 0x120   : > { %v4745_v58 = vadd.f32 %v793_v55, %v759_v50 }
 0x124   : > { %685 = vperm.xlu0 %4232, %v600_v56  }
 0x127   : > { %v795_v57 = vpop.f32.mrf.mxu0 }
 0x128   : > { %v4747_v59 = vadd.f32 %v795_v57, %v759_v50  ;;  %v4184_v50 = vld [vmem:[%s4791_s21 + $0x18] sm:$0xff] }
 0x12a   : > { %v879_v60 = vpack.c.bf16 %v4747_v59, %v4745_v58 }
 0x12c   : > { %1001 = vrot.lane.b32.xlu2 %v879_v60, %s6305_s22  ;;  %934 = vmatpush.bf16.msra.mxu2 %v879_v60 }
 0x12d   : > { %710 = vperm.xlu0 %4232, %v605_v61  }
 0x130   : > { %935 = vmatpush.bf16.msra.mxu2 %v878_v54  ;;  %v4846_v54 = vadd.f32 %v4794_v15, %v731_v48 }
 0x133   : > { %3928 = vmatmul.msk.bf16.vlgmr.msra.gmra.mxu2 %vm772_vm0, %v4175_v62 }
 0x134   : > { %670 = vperm.xlu2 %4229, %v597_v63  }
 0x13c   : > { %680 = vperm.xlu2 %4229, %v599_v0   ;;  %v4185_v0 = vld [vmem:[%s4791_s21 + $0x20] sm:$0xff] }
 0x143   : > { %3929 = vmatmul.msk.bf16.gmra.mxu2 %vm772_vm0, %v4176_v1 }
 0x144   : > { %695 = vperm.xlu2 %4229, %v602_v2  }
 0x14c   : > { %705 = vperm.xlu2 %4229, %v604_v3  }
 0x153   : > { %3930 = vmatmul.msk.bf16.gmra.mxu2 %vm772_vm0, %v4177_v4 }
 0x154   : > { %720 = vperm.xlu2 %4229, %v607_v5  }
 0x163   : > { %3931 = vmatmul.msk.bf16.gmra.mxu2 %vm772_vm0, %v4178_v6  ;;  %v716_v6 = vpop.permute.xlu1 %715 }
 0x173   : > { %3932 = vmatmul.msk.bf16.gmra.mxu2 %vm772_vm0, %v4179_v8  ;;  %v734_v8 = vmul.f32 %v4784_v13, %v716_v6 }
 0x175   : > { %v4880_v14 = vadd.f32 %v4794_v15, %v734_v8 }
 0x183   : > { %3933 = vmatmul.msk.bf16.gmra.mxu2 %vm772_vm0, %v4180_v10  ;;  %v4186_v10 = vld [vmem:[%s4791_s21 + $0x28] sm:$0xff] }
 0x186   : > { %v1002_v11 = vpop.permute.xlu2 %1001 }
 0x187   : > { %1029 = vmatpush.bf16.msra.mxu3 %v1002_v11 }
 0x18e   : > { %v671_v17 = vpop.permute.xlu2 %670  ;;  %v1000_v18 = vpop.permute.xlu0 %999 }
 0x18f   : > { %v725_v21 = vmul.f32 %v4784_v13, %v671_v17  ;;  %1030 = vmatpush.bf16.msra.mxu3 %v1000_v18 }
 0x191   : > { %v4803_v22 = vadd.f32 %v4794_v15, %v725_v21  ;;  %v4197_v21 = vld [vmem:[%s6291_s7 + $0x10] sm:$0xff] }
 0x192   : > { %3958 = vmatmul.msk.bf16.vlgmr.msra.gmra.mxu3 %vm772_vm0, %v4181_v19  ;;  %v4198_v19 = vld [vmem:[%s6291_s7 + $0x18] sm:$0xff] }
 0x193   : > { %v802_v12 = vpack.c.bf16 %v4803_v22, %v4799_v20  ;;  %1797 = vmatpush.bf16.msrb.mxu1 %v4198_v19 }
 0x195   : > { %3898 = vmatmul.msk.bf16.vlgmr.msra.gmra.mxu1 %vm772_vm0, %v802_v12 }
 0x196   : > { %v681_v23 = vpop.permute.xlu2 %680  ;;  %v686_v33 = vpop.permute.xlu0 %685 }
 0x197   : > { %v727_v24 = vmul.f32 %v4784_v13, %v681_v23  ;;  %v728_v34 = vmul.f32 %v4784_v13, %v686_v33  ;;  %1798 = vmatpush.bf16.msrb.mxu1 %v4197_v21 }
 0x199   : > { %v4813_v28 = vadd.f32 %v4794_v15, %v727_v24  ;;  %v4826_v38 = vadd.f32 %v4794_v15, %v728_v34  ;;  %v4915_v24 = vperm.slane %v4733_v47, 1 }
 0x19b   : > { %v803_v32 = vpack.c.bf16 %v4813_v28, %v4816_v31  ;;  %v804_v40 = vpack.c.bf16 %v4829_v39, %v4826_v38 }
 0x19e   : > { %v696_v44 = vpop.permute.xlu2 %695 }
 0x19f   : > { %v730_v45 = vmul.f32 %v4784_v13, %v696_v44  ;;  %v711_v60 = vpop.permute.xlu0 %710 }
 0x1a0   : > { %v733_v62 = vmul.f32 %v4784_v13, %v711_v60 }
 0x1a1   : > { %v4843_v51 = vadd.f32 %v4794_v15, %v730_v45 }
 0x1a2   : > { %3959 = vmatmul.msk.bf16.gmra.mxu3 %vm772_vm0, %v4182_v27  ;;  %v4863_v2 = vadd.f32 %v4794_v15, %v733_v62 }
 0x1a3   : > { %v805_v55 = vpack.c.bf16 %v4846_v54, %v4843_v51 }
 0x1a5   : > { %3899 = vmatmul.msk.bf16.gmra.mxu1 %vm772_vm0, %v803_v32 }
 0x1a6   : > { %v706_v57 = vpop.permute.xlu2 %705 }
 0x1a7   : > { %v732_v61 = vmul.f32 %v4784_v13, %v706_v57 }
 0x1a9   : > { %v4860_v1 = vadd.f32 %v4794_v15, %v732_v61 }
 0x1ab   : > { %v806_v3 = vpack.c.bf16 %v4863_v2, %v4860_v1 }
 0x1ae   : > { %v721_v5 = vpop.permute.xlu2 %720 }
 0x1af   : > { %v735_v7 = vmul.f32 %v4784_v13, %v721_v5 }
 0x1b1   : > { %v4877_v11 = vadd.f32 %v4794_v15, %v735_v7 }
 0x1b2   : > { %3960 = vmatmul.msk.bf16.gmra.mxu3 %vm772_vm0, %v4183_v37 }
 0x1b3   : > { %v807_v16 = vpack.c.bf16 %v4877_v11, %v4880_v14 }
 0x1b5   : > { %3900 = vmatmul.msk.bf16.gmra.mxu1 %vm772_vm0, %v804_v40 }
 0x1b6   : > { %v4835_v41 = vpop.f32.mrf.mxu2 }
 0x1be   : > { %v4839_v49 = vpop.f32.mrf.mxu2 }
 0x1c2   : > { %3961 = vmatmul.msk.bf16.gmra.mxu3 %vm772_vm0, %v4184_v50 }
 0x1c5   : > { %3901 = vmatmul.msk.bf16.gmra.mxu1 %vm772_vm0, %v805_v55 }
 0x1c6   : > { %v4852_v56 = vpop.f32.mrf.mxu2 }
 0x1ce   : > { %v4856_v63 = vpop.f32.mrf.mxu2 }
 0x1d2   : > { %3962 = vmatmul.msk.bf16.gmra.mxu3 %vm772_vm0, %v4185_v0 }
 0x1d5   : > { %3902 = vmatmul.msk.bf16.gmra.mxu1 %vm772_vm0, %v806_v3 }
 0x1d6   : > { %v4869_v4 = vpop.f32.mrf.mxu2 }
 0x1de   : > { %v4873_v9 = vpop.f32.mrf.mxu2 }
 0x1e2   : > { %3963 = vmatmul.msk.bf16.gmra.mxu3 %vm772_vm0, %v4186_v10 }
 0x1e5   : > { %3903 = vmatmul.msk.bf16.gmra.mxu1 %vm772_vm0, %v807_v16 }
 0x1e6   : > { %v4886_v17 = vpop.f32.mrf.mxu2 }
 0x1e7   : > { %1338 = vrot.lane.b32.xlu0 %v4886_v17, %s6303_s23 }
 0x1ee   : > { %v4890_v13 = vpop.f32.mrf.mxu2 }
 0x1ef   : > { %1340 = vrot.lane.b32.xlu1 %v4890_v13, %s6303_s23 }
 0x1f6   : > { %v4894_v15 = vpop.f32.mrf.mxu2 }
 0x1f7   : > { %1342 = vrot.lane.b32.xlu0 %v4894_v15, %s6303_s23 }
 0x1fe   : > { %v4898_v18 = vpop.f32.mrf.mxu2 }
 0x1ff   : > { %1344 = vrot.lane.b32.xlu1 %v4898_v18, %s6303_s23 }
 0x206   : > { %v4908_v12 = vpop.f32.mrf.mxu2 }
 0x207   : > { %1346 = vrot.lane.b32.xlu0 %v4908_v12, %s6303_s23 }
 0x20e   : > { %v4912_v23 = vpop.f32.mrf.mxu2 }
 0x20f   : > { %1334 = vrot.lane.b32.xlu0 %v4869_v4, %s6303_s23  ;;  %1348 = vrot.lane.b32.xlu1 %v4912_v23, %s6303_s23 }
 0x212   : > { %v848_v25 = vpop.f32.mrf.mxu1 }
 0x213   : > { %v849_v26 = vadd.f32 %v848_v25, %v4915_v24 }
 0x215   : > { %v1032_v27 = vpop.f32.mrf.mxu3  ;;  %v1062_v32 = vadd.f32 %v4835_v41, %v849_v26 }
 0x217   : > { %1330 = vrot.lane.b32.xlu0 %v4852_v56, %s6303_s23  ;;  %1336 = vrot.lane.b32.xlu1 %v4873_v9, %s6303_s23  ;;  %v4927_v33 = vadd.f32 %v1062_v32, %v1032_v27 }
 0x219   : > { %v1548_v37 = vmax.f32 %v4927_v33, 0.0 }
 0x21a   : > { %v850_v47 = vpop.f32.mrf.mxu1 }
 0x21b   : > { %v851_v34 = vadd.f32 %v850_v47, %v4915_v24  ;;  %v4940_v46 = vadd.f32 %v1548_v37, %v4799_v20 }
 0x21d   : > { %v1034_v35 = vpop.f32.mrf.mxu3  ;;  %v1063_v36 = vadd.f32 %v4839_v49, %v851_v34 }
 0x21f   : > { %v4932_v40 = vadd.f32 %v1063_v36, %v1034_v35  ;;  %1326 = vrot.lane.b32.xlu0 %v4835_v41, %s6303_s23  ;;  %1332 = vrot.lane.b32.xlu1 %v4856_v63, %s6303_s23 }
 0x221   : > { %v1549_v44 = vmax.f32 %v4932_v40, 0.0 }
 0x222   : > { %v853_v45 = vpop.f32.mrf.mxu1 }
 0x223   : > { %v4943_v48 = vadd.f32 %v1549_v44, %v4803_v22  ;;  %v854_v50 = vadd.f32 %v853_v45, %v4915_v24 }
 0x225   : > { %v1037_v55 = vpop.f32.mrf.mxu3  ;;  %v1754_v57 = vpack.c.bf16 %v4943_v48, %v4940_v46  ;;  %v1064_v41 = vadd.f32 %v4852_v56, %v854_v50 }
 0x227   : > { %1328 = vrot.lane.b32.xlu1 %v4839_v49, %s6303_s23  ;;  %4023 = vmatmul.msk.bf16.vlgmr.msrb.gmra.mxu1 %vm772_vm0, %v1754_v57  ;;  %v4952_v61 = vadd.f32 %v1064_v41, %v1037_v55 }
 0x229   : > { %v1550_v0 = vmax.f32 %v4952_v61, 0.0 }
 0x22a   : > { %v855_v60 = vpop.f32.mrf.mxu1 }
 0x22b   : > { %v856_v20 = vadd.f32 %v855_v60, %v4915_v24  ;;  %v4961_v6 = vadd.f32 %v1550_v0, %v4816_v31 }
 0x22d   : > { %v1039_v22 = vpop.f32.mrf.mxu3  ;;  %v1065_v62 = vadd.f32 %v4856_v63, %v856_v20 }
 0x22f   : > { %v4957_v3 = vadd.f32 %v1065_v62, %v1039_v22 }
 0x231   : > { %v1551_v5 = vmax.f32 %v4957_v3, 0.0 }
 0x232   : > { %v858_v56 = vpop.f32.mrf.mxu1 }
 0x233   : > { %v4964_v49 = vadd.f32 %v1551_v5, %v4813_v28  ;;  %v859_v7 = vadd.f32 %v858_v56, %v4915_v24 }
 0x235   : > { %v1042_v8 = vpop.f32.mrf.mxu3  ;;  %v1755_v10 = vpack.c.bf16 %v4964_v49, %v4961_v6  ;;  %v1066_v63 = vadd.f32 %v4869_v4, %v859_v7 }
 0x237   : > { %4024 = vmatmul.msk.bf16.gmra.mxu1 %vm772_vm0, %v1755_v10  ;;  %v4971_v19 = vadd.f32 %v1066_v63, %v1042_v8 }
 0x239   : > { %v1552_v28 = vmax.f32 %v4971_v19, 0.0 }
 0x23a   : > { %v860_v16 = vpop.f32.mrf.mxu1 }
 0x23b   : > { %v861_v21 = vadd.f32 %v860_v16, %v4915_v24  ;;  %v4977_v47 = vadd.f32 %v1552_v28, %v4826_v38 }
 0x23d   : > { %v1044_v31 = vpop.f32.mrf.mxu3  ;;  %v1067_v25 = vadd.f32 %v4873_v9, %v861_v21 }
 0x23f   : > { %v1079_v26 = vadd.f32 %v1067_v25, %v1044_v31 }
 0x241   : > { %v1553_v27 = vmax.f32 %v1079_v26, 0.0 }
 0x242   : > { %v863_v32 = vpop.f32.mrf.mxu1 }
 0x243   : > { %v4980_v4 = vadd.f32 %v1553_v27, %v4829_v39  ;;  %v864_v34 = vadd.f32 %v863_v32, %v4915_v24 }
 0x245   : > { %v1047_v35 = vpop.f32.mrf.mxu3  ;;  %v1068_v36 = vadd.f32 %v4886_v17, %v864_v34  ;;  %v1756_v37 = vpack.c.bf16 %v4980_v4, %v4977_v47 }
 0x247   : > { %v1080_v9 = vadd.f32 %v1068_v36, %v1047_v35  ;;  %4025 = vmatmul.msk.bf16.gmra.mxu1 %vm772_vm0, %v1756_v37  ;;  %v3969_v35 = vmul.f32 -1.442695, %v1079_v26 }
 0x249   : > { %v3970_v44 = vmul.f32 -1.442695, %v1080_v9  ;;  %v1554_v55 = vmax.f32 %v1080_v9, 0.0 }
 0x24a   : > { %v865_v45 = vpop.f32.mrf.mxu1 }
 0x24b   : > { %4323 = vpow2.f32 %v3970_v44  ;;  %v866_v38 = vadd.f32 %v865_v45, %v4915_v24  ;;  %v4992_v62 = vadd.f32 %v1554_v55, %v4843_v51  ;;  %v3966_v44 = vmul.f32 -1.442695, %v4952_v61 }
 0x24c   : > { %v3967_v45 = vmul.f32 -1.442695, %v4957_v3  ;;  %v3968_v61 = vmul.f32 -1.442695, %v4971_v19 }
 0x24d   : > { %v1049_v50 = vpop.f32.mrf.mxu3  ;;  %v1069_v39 = vadd.f32 %v4890_v13, %v866_v38 }
 0x24f   : > { %v1081_v57 = vadd.f32 %v1069_v39, %v1049_v50 }
 0x251   : > { %v4324_v41 = vpop.eup %4323  ;;  %v3971_v60 = vmul.f32 -1.442695, %v1081_v57  ;;  %v1555_v20 = vmax.f32 %v1081_v57, 0.0  ;;  %v3964_v57 = vmul.f32 -1.442695, %v4927_v33 }
 0x252   : > { %v4989_v17 = vadd.f32 1.0, %v4324_v41  ;;  %v868_v22 = vpop.f32.mrf.mxu1 }
 0x253   : > { %4325 = vpow2.f32 %v3971_v60  ;;  %v4995_v0 = vadd.f32 %v1555_v20, %v4846_v54  ;;  %v869_v5 = vadd.f32 %v868_v22, %v4915_v24 }
 0x254   : > { %4327 = vrcp.f32 %v4989_v17  ;;  %v1235_v41 = vand.u32 2147483648, %v4989_v17  ;;  %vm1229_vm2 = vweird.f32 %v4989_v17 }
 0x255   : > { %v1052_v13 = vpop.f32.mrf.mxu3  ;;  %v1070_v56 = vadd.f32 %v4894_v15, %v869_v5  ;;  %v1757_v7 = vpack.c.bf16 %v4995_v0, %v4992_v62  ;;  %v1233_v5 = vand.u32 2147483647, %v4989_v17 }
 0x257   : > { %v1082_v8 = vadd.f32 %v1070_v56, %v1052_v13  ;;  %4026 = vmatmul.msk.bf16.gmra.mxu1 %vm772_vm0, %v1757_v7  ;;  %v3965_v7 = vmul.f32 -1.442695, %v4932_v40  ;;  %vm1234_vm7 = vcmp.eq.f32.partialorder %v1233_v5, 8.507059e+37 }
 0x259   : > { %v4326_v10 = vpop.eup %4325  ;;  %v3972_v51 = vmul.f32 -1.442695, %v1082_v8  ;;  %v1556_v27 = vmax.f32 %v1082_v8, 0.0 }
 0x25a   : > { %v5003_v63 = vpop.eup %4327  ;;  %v5005_v16 = vadd.f32 1.0, %v4326_v10  ;;  %v870_v54 = vpop.f32.mrf.mxu1  ;;  %v1236_v10 = vor.u32 1.1754944e-38, %v1235_v41 }
 0x25b   : > { %4329 = vpow2.f32 %v3972_v51  ;;  %v871_v21 = vadd.f32 %v870_v54, %v4915_v24  ;;  %v1225_v31 = vmul.f32 %v5003_v63, %v4989_v17  ;;  %v5018_v55 = vadd.f32 %v1556_v27, %v4860_v1 }
 0x25c   : > { %4331 = vrcp.f32 %v5005_v16  ;;  %vm1230_vm1 = vweird.f32 %v5003_v63  ;;  %v1250_v22 = vand.u32 2147483648, %v5005_v16  ;;  %v1248_v13 = vand.u32 2147483647, %v5005_v16 }
 0x25d   : > { %v1054_v15 = vpop.f32.mrf.mxu3  ;;  %v1071_v25 = vadd.f32 %v4898_v18, %v871_v21  ;;  %v1226_v28 = vsub.f32 1.0, %v1225_v31  ;;  %vm5040_vm4 = vmor %vm1229_vm2, %vm1230_vm1  ;;  %vm1244_vm5 = vweird.f32 %v5005_v16 }
 0x25e   : > { %vm1249_vm8 = vcmp.eq.f32.partialorder %v1248_v13, 8.507059e+37 }
 0x25f   : > { %v1083_v32 = vadd.f32 %v1071_v25, %v1054_v15  ;;  %v1227_v39 = vmul.f32 %v5003_v63, %v1226_v28  ;;  %v1251_v28 = vor.u32 1.1754944e-38, %v1250_v22 }
 0x261   : > { %v4330_v34 = vpop.eup %4329  ;;  %v3973_v36 = vmul.f32 -1.442695, %v1083_v32  ;;  %v1557_v37 = vmax.f32 %v1083_v32, 0.0  ;;  %v1228_v20 = vadd.f32 %v5003_v63, %v1227_v39 }
 0x262   : > { %v4332_v9 = vpop.eup %4331  ;;  %v5014_v38 = vadd.f32 1.0, %v4330_v34  ;;  %v873_v50 = vpop.f32.mrf.mxu1 }
 0x263   : > { %4333 = vpow2.f32 %v3973_v36  ;;  %v5021_v18 = vadd.f32 %v1557_v37, %v4863_v2  ;;  %v874_v26 = vadd.f32 %v873_v50, %v4915_v24  ;;  %v1240_v3 = vmul.f32 %v4332_v9, %v5005_v16 }
 0x264   : > { %4335 = vrcp.f32 %v5014_v38  ;;  %vm1245_vm3 = vweird.f32 %v4332_v9  ;;  %v1232_v17 = vsel %vm5040_vm4, %v5003_v63, %v1228_v20  ;;  %vm1259_vm10 = vweird.f32 %v5014_v38 }
 0x265   : > { %4337 = vpow2.f32 %v3969_v35  ;;  %v1057_v60 = vpop.f32.mrf.mxu3  ;;  %v1072_v1 = vadd.f32 %v4908_v12, %v874_v26  ;;  %v1758_v2 = vpack.c.bf16 %v5021_v18, %v5018_v55  ;;  %v1241_v33 = vsub.f32 1.0, %v1240_v3  ;;  %vm1246_vm6 = vmor %vm1244_vm5, %vm1245_vm3 }
 0x266   : > { %4339 = vpow2.f32 %v3966_v44  ;;  %v5057_v35 = vsel %vm1234_vm7, %v1236_v10, %v1232_v17 }
 0x267   : > { %4341 = vpow2.f32 %v3967_v45  ;;  %v1084_v19 = vadd.f32 %v1072_v1, %v1057_v60  ;;  %4027 = vmatmul.msk.bf16.gmra.mxu1 %vm772_vm0, %v1758_v2  ;;  %v1242_v12 = vmul.f32 %v4332_v9, %v1241_v33 }
 0x268   : > { %4343 = vpow2.f32 %v3968_v61 }
 0x269   : > { %v4334_v56 = vpop.eup %4333  ;;  %v3974_v51 = vmul.f32 -1.442695, %v1084_v19  ;;  %v1243_v15 = vadd.f32 %v4332_v9, %v1242_v12  ;;  %v1558_v39 = vmax.f32 %v1084_v19, 0.0 }
 0x26a   : > { %v5044_v54 = vpop.eup %4335  ;;  %v5046_v21 = vadd.f32 1.0, %v4334_v56  ;;  %v875_v31 = vpop.f32.mrf.mxu1 }
 0x26b   : > { %v4338_v40 = vpop.eup %4337  ;;  %4345 = vpow2.f32 %v3974_v51  ;;  %v876_v25 = vadd.f32 %v875_v31, %v4915_v24  ;;  %v1255_v27 = vmul.f32 %v5044_v54, %v5014_v38  ;;  %v1247_v34 = vsel %vm1246_vm6, %v4332_v9, %v1243_v15 }
 0x26c   : > { %v4340_v32 = vpop.eup %4339  ;;  %4347 = vrcp.f32 %v5046_v21  ;;  %v5059_v16 = vsel %vm1249_vm8, %v1251_v28, %v1247_v34  ;;  %v5062_v44 = vadd.f32 1.0, %v4338_v40  ;;  %v5072_v1 = vadd.f32 %v1558_v39, %v4880_v14 }
 0x26d   : > { %v4342_v63 = vpop.eup %4341  ;;  %v1059_v36 = vpop.f32.mrf.mxu3  ;;  %v1073_v24 = vadd.f32 %v4912_v23, %v876_v25  ;;  %v1256_v37 = vsub.f32 1.0, %v1255_v27  ;;  %v4233_v45 = vpack.i.bf16 %v5059_v16, %v5057_v35  ;;  %4349 = vpow2.f32 %v3964_v57 }
 0x26e   : > { %v4344_v50 = vpop.eup %4343  ;;  %4351 = vpow2.f32 %v3965_v7  ;;  %v5078_v20 = vadd.f32 1.0, %v4340_v32  ;;  %vm1260_vm9 = vweird.f32 %v5044_v54  ;;  %v5087_v12 = vadd.f32 1.0, %v4342_v63 }
 0x26f   : > { %v1085_v26 = vadd.f32 %v1073_v24, %v1059_v36  ;;  %4234 = vrot.lane.b32.xlu2 %v4233_v45, %s6305_s22  ;;  %v1257_v41 = vmul.f32 %v5044_v54, %v1256_v37  ;;  %4353 = vrcp.f32 %v5062_v44  ;;  %v5080_v33 = vadd.f32 1.0, %v4344_v50  ;;  %vm5100_vm12 = vmor %vm1259_vm10, %vm1260_vm9 }
 0x270   : > { %v1280_v13 = vand.u32 2147483648, %v5046_v21  ;;  %v1263_v7 = vand.u32 2147483647, %v5014_v38  ;;  %v1278_v10 = vand.u32 2147483647, %v5046_v21  ;;  %vm1274_vm13 = vweird.f32 %v5046_v21 }
 0x271   : > { %v4346_v9 = vpop.eup %4345  ;;  %v3975_v61 = vmul.f32 -1.442695, %v1085_v26  ;;  %v1559_v3 = vmax.f32 %v1085_v26, 0.0  ;;  %v1258_v19 = vadd.f32 %v5044_v54, %v1257_v41 }
 0x272   : > { %v4348_v60 = vpop.eup %4347  ;;  %v5069_v23 = vadd.f32 1.0, %v4346_v9  ;;  %v1281_v27 = vor.u32 1.1754944e-38, %v1280_v13  ;;  %vm1264_vm15 = vcmp.eq.f32.partialorder %v1263_v7, 8.507059e+37  ;;  %vm1279_vm1 = vcmp.eq.f32.partialorder %v1278_v10, 8.507059e+37 }
 0x273   : > { %4355 = vpow2.f32 %v3975_v61  ;;  %v5075_v2 = vadd.f32 %v1559_v3, %v4877_v11  ;;  %v1270_v57 = vmul.f32 %v4348_v60, %v5046_v21  ;;  %v4350_v5 = vpop.eup %4349  ;;  %v1265_v11 = vand.u32 2147483648, %v5014_v38 }
 0x274   : > { %4357 = vrcp.f32 %v5069_v23  ;;  %v4352_v56 = vpop.eup %4351  ;;  %vm1275_vm11 = vweird.f32 %v4348_v60  ;;  %v1262_v38 = vsel %vm5100_vm12, %v5044_v54, %v1258_v19  ;;  %v5123_v50 = vadd.f32 1.0, %v4350_v5 }
 0x275   : > { %v1759_v14 = vpack.c.bf16 %v5075_v2, %v5072_v1  ;;  %v1271_v22 = vsub.f32 1.0, %v1270_v57  ;;  %v5095_v51 = vpop.eup %4353  ;;  %4359 = vrcp.f32 %v5080_v33  ;;  %v1266_v28 = vor.u32 1.1754944e-38, %v1265_v11  ;;  %vm1276_vm14 = vmor %vm1274_vm13, %vm1275_vm11 }
 0x276   : > { %4361 = vrcp.f32 %v5078_v20  ;;  %v1210_v37 = vmul.f32 %v5095_v51, %v5062_v44  ;;  %v5128_v26 = vadd.f32 1.0, %v4352_v56  ;;  %vm1289_vm3 = vweird.f32 %v5069_v23 }
 0x277   : > { %4028 = vmatmul.msk.bf16.gmra.mxu1 %vm772_vm0, %v1759_v14  ;;  %v1272_v8 = vmul.f32 %v4348_v60, %v1271_v22  ;;  %4363 = vrcp.f32 %v5087_v12  ;;  %v5111_v63 = vsel %vm1264_vm15, %v1266_v28, %v1262_v38  ;;  %v1295_v11 = vand.u32 2147483648, %v5069_v23 }
 0x278   : > { %v1211_v41 = vsub.f32 1.0, %v1210_v37  ;;  %v1293_v7 = vand.u32 2147483647, %v5069_v23  ;;  %vm1215_vm8 = vweird.f32 %v5095_v51  ;;  %vm1214_vm12 = vweird.f32 %v5062_v44 }
 0x279   : > { %v4356_v31 = vpop.eup %4355  ;;  %v1273_v15 = vadd.f32 %v4348_v60, %v1272_v8  ;;  %vm1216_vm13 = vmor %vm1214_vm12, %vm1215_vm8 }
 0x27a   : > { %v4358_v40 = vpop.eup %4357  ;;  %v1133_v25 = vadd.f32 1.0, %v4356_v31  ;;  %v1212_v56 = vmul.f32 %v5095_v51, %v1211_v41  ;;  %vm1294_vm9 = vcmp.eq.f32.partialorder %v1293_v7, 8.507059e+37 }
 0x27b   : > { %v1277_v32 = vsel %vm1276_vm14, %v4348_v60, %v1273_v15  ;;  %v1285_v34 = vmul.f32 %v4358_v40, %v5069_v23  ;;  %v5117_v24 = vpop.eup %4359  ;;  %vm1290_vm2 = vweird.f32 %v4358_v40  ;;  %v1296_v23 = vor.u32 1.1754944e-38, %v1295_v11 }
 0x27c   : > { %4365 = vrcp.f32 %v1133_v25  ;;  %v5113_v36 = vsel %vm1279_vm1, %v1281_v27, %v1277_v32  ;;  %v5121_v45 = vpop.eup %4361  ;;  %v1195_v61 = vmul.f32 %v5117_v24, %v5080_v33  ;;  %v1310_v13 = vand.u32 2147483648, %v1133_v25  ;;  %vm5142_vm5 = vmor %vm1289_vm3, %vm1290_vm2 }
 0x27d   : > { %v4238_v54 = vpack.i.bf16 %v5113_v36, %v5111_v63  ;;  %v1286_v21 = vsub.f32 1.0, %v1285_v34  ;;  %v5126_v39 = vpop.eup %4363  ;;  %4367 = vrcp.f32 %v5123_v50  ;;  %v1165_v57 = vmul.f32 %v5121_v45, %v5078_v20 }
 0x27e   : > { %4369 = vrcp.f32 %v5128_v26  ;;  %v1180_v19 = vmul.f32 %v5126_v39, %v5087_v12  ;;  %v1196_v5 = vsub.f32 1.0, %v1195_v61  ;;  %v1308_v10 = vand.u32 2147483647, %v1133_v25 }
 0x27f   : > { %4239 = vrot.lane.b32.xlu2 %v4238_v54, %s6305_s22  ;;  %v1287_v9 = vmul.f32 %v4358_v40, %v1286_v21  ;;  %v1166_v31 = vsub.f32 1.0, %v1165_v57  ;;  %vm1304_vm6 = vweird.f32 %v1133_v25  ;;  %v1311_v34 = vor.u32 1.1754944e-38, %v1310_v13 }
 0x280   : > { %v1197_v27 = vmul.f32 %v5117_v24, %v1196_v5  ;;  %v1181_v54 = vsub.f32 1.0, %v1180_v19  ;;  %vm1309_vm10 = vcmp.eq.f32.partialorder %v1308_v10, 8.507059e+37  ;;  %v1213_v37 = vadd.f32 %v5095_v51, %v1212_v56 }
 0x281   : > { %v1288_v14 = vadd.f32 %v4358_v40, %v1287_v9  ;;  %vm1200_vm11 = vweird.f32 %v5117_v24  ;;  %vm1199_vm14 = vweird.f32 %v5080_v33  ;;  %v1203_v19 = vand.u32 2147483647, %v5080_v33 }
 0x282   : > { %v4366_v3 = vpop.eup %4365  ;;  %v1198_v41 = vadd.f32 %v5117_v24, %v1197_v27  ;;  %vm1201_vm15 = vmor %vm1199_vm14, %vm1200_vm11  ;;  %v1167_v13 = vmul.f32 %v5121_v45, %v1166_v31  ;;  %vm1185_vm3 = vweird.f32 %v5126_v39  ;;  %v1190_v10 = vand.u32 2147483648, %v5087_v12 }
 0x283   : > { %v1300_v60 = vmul.f32 %v4366_v3, %v1133_v25  ;;  %vm1305_vm4 = vweird.f32 %v4366_v3  ;;  %v5146_v38 = vpop.eup %4367  ;;  %v1292_v15 = vsel %vm5142_vm5, %v4358_v40, %v1288_v14  ;;  %v1220_v25 = vand.u32 2147483648, %v5062_v44 }
 0x284   : > { %v5151_v32 = vpop.eup %4369  ;;  %vm1306_vm7 = vmor %vm1304_vm6, %vm1305_vm4  ;;  %v5155_v9 = vsel %vm1294_vm9, %v1296_v23, %v1292_v15  ;;  %v1217_v14 = vsel %vm1216_vm13, %v5095_v51, %v1213_v37  ;;  %v1135_v5 = vmul.f32 %v5146_v38, %v5123_v50  ;;  %v1202_v11 = vsel %vm1201_vm15, %v5117_v24, %v1198_v41 }
 0x285   : > { %v1301_v22 = vsub.f32 1.0, %v1300_v60  ;;  %v1205_v60 = vand.u32 2147483648, %v5080_v33  ;;  %v1150_v57 = vmul.f32 %v5151_v32, %v5128_v26  ;;  %vm1204_vm2 = vcmp.eq.f32.partialorder %v1203_v19, 8.507059e+37 }
 0x286   : > { %vm1170_vm4 = vweird.f32 %v5121_v45  ;;  %v1136_v17 = vsub.f32 1.0, %v1135_v5  ;;  %v1168_v31 = vadd.f32 %v5121_v45, %v1167_v13  ;;  %vm1184_vm5 = vweird.f32 %v5087_v12  ;;  %v1339_v13 = vpop.permute.xlu0 %1338 }
 0x287   : > { %v1302_v8 = vmul.f32 %v4366_v3, %v1301_v22  ;;  %v1182_v22 = vmul.f32 %v5126_v39, %v1181_v54  ;;  %v1206_v56 = vor.u32 1.1754944e-38, %v1205_v60  ;;  %v1151_v51 = vsub.f32 1.0, %v1150_v57  ;;  %vm1186_vm6 = vmor %vm1184_vm5, %vm1185_vm3 }
 0x288   : > { %v1188_v15 = vand.u32 2147483647, %v5087_v12  ;;  %v1173_v27 = vand.u32 2147483647, %v5078_v20  ;;  %v1191_v54 = vor.u32 1.1754944e-38, %v1190_v10  ;;  %v1137_v12 = vmul.f32 %v5146_v38, %v1136_v17 }
 0x289   : > { %v1303_v28 = vadd.f32 %v4366_v3, %v1302_v8  ;;  %v1183_v33 = vadd.f32 %v5126_v39, %v1182_v22  ;;  %v5184_v8 = vsel %vm1204_vm2, %v1206_v56, %v1202_v11  ;;  %vm1155_vm11 = vweird.f32 %v5151_v32 }
 0x28a   : > { %vm1189_vm9 = vcmp.eq.f32.partialorder %v1188_v15, 8.507059e+37  ;;  %vm1140_vm12 = vweird.f32 %v5146_v38  ;;  %v1138_v41 = vadd.f32 %v5146_v38, %v1137_v12  ;;  %vm1154_vm13 = vweird.f32 %v5128_v26 }
 0x28b   : > { %v1307_v21 = vsel %vm1306_vm7, %v4366_v3, %v1303_v28  ;;  %v1218_v3 = vand.u32 2147483647, %v5062_v44  ;;  %v1221_v44 = vor.u32 1.1754944e-38, %v1220_v25  ;;  %v1175_v28 = vand.u32 2147483648, %v5078_v20  ;;  %vm1156_vm14 = vmor %vm1154_vm13, %vm1155_vm11 }
 0x28c   : > { %v5157_v40 = vsel %vm1309_vm10, %v1311_v34, %v1307_v21  ;;  %vm1169_vm7 = vweird.f32 %v5078_v20  ;;  %v1187_v23 = vsel %vm1186_vm6, %v5126_v39, %v1183_v33  ;;  %v1152_v34 = vmul.f32 %v5151_v32, %v1151_v51 }
 0x28d   : > { %v4243_v61 = vpack.i.bf16 %v5157_v40, %v5155_v9  ;;  %vm1219_vm1 = vcmp.eq.f32.partialorder %v1218_v3, 8.507059e+37  ;;  %vm1171_vm8 = vmor %vm1169_vm7, %vm1170_vm4  ;;  %v1176_v37 = vor.u32 1.1754944e-38, %v1175_v28  ;;  %v5201_v25 = vsel %vm1189_vm9, %v1191_v54, %v1187_v23 }
 0x28e   : > { %v5180_v7 = vsel %vm1219_vm1, %v1221_v44, %v1217_v14  ;;  %v1172_v21 = vsel %vm1171_vm8, %v5121_v45, %v1168_v31  ;;  %vm1174_vm10 = vcmp.eq.f32.partialorder %v1173_v27, 8.507059e+37  ;;  %v1160_v39 = vand.u32 2147483648, %v5128_v26  ;;  %v1343_v31 = vpop.permute.xlu0 %1342 }
 0x28f   : > { %4244 = vrot.lane.b32.xlu2 %v4243_v61, %s6305_s22  ;;  %v4248_v24 = vpack.i.bf16 %v5180_v7, %v5184_v8  ;;  %v1153_v61 = vadd.f32 %v5151_v32, %v1152_v34  ;;  %v5205_v20 = vsel %vm1174_vm10, %v1176_v37, %v1172_v21  ;;  %v1158_v3 = vand.u32 2147483647, %v5128_v26 }
 0x290   : > { %v4253_v45 = vpack.i.bf16 %v5201_v25, %v5205_v20  ;;  %v1145_v60 = vand.u32 2147483648, %v5123_v50  ;;  %vm1139_vm15 = vweird.f32 %v5123_v50  ;;  %v1143_v57 = vand.u32 2147483647, %v5123_v50  ;;  %v1341_v50 = vpop.permute.xlu1 %1340 }
 0x291   : > { %v1157_v19 = vsel %vm1156_vm14, %v5151_v32, %v1153_v61  ;;  %vm1141_vm1 = vmor %vm1139_vm15, %vm1140_vm12  ;;  %v1161_v14 = vor.u32 1.1754944e-38, %v1160_v39  ;;  %vm1159_vm2 = vcmp.eq.f32.partialorder %v1158_v3, 8.507059e+37  ;;  %v1368_v32 = vmul.f32 %v1339_v13, %v5057_v35 }
 0x292   : > { %v1142_v22 = vsel %vm1141_vm1, %v5146_v38, %v1138_v41  ;;  %v1146_v44 = vor.u32 1.1754944e-38, %v1145_v60  ;;  %vm1144_vm3 = vcmp.eq.f32.partialorder %v1143_v57, 8.507059e+37  ;;  %v1369_v33 = vmul.f32 %v1341_v50, %v5059_v16 }
 0x293   : > { %v5220_v5 = vsel %vm1159_vm2, %v1161_v14, %v1157_v19  ;;  %v1370_v27 = vmul.f32 %v1343_v31, %v5111_v63  ;;  %vm1450_vm4 = vcmask 785408  }
 0x294   : > { %v1147_v26 = vsel %vm1144_vm3, %v1146_v44, %v1142_v22 }
 0x295   : > { %v4258_v11 = vpack.i.bf16 %v5220_v5, %v1147_v26 }
 0x296   : > { %v1347_v12 = vpop.permute.xlu0 %1346 }
 0x297   : > { %4249 = vrot.lane.b32.xlu2 %v4248_v24, %s6305_s22  ;;  %v1372_v39 = vmul.f32 %v1347_v12, %v5155_v9 }
 0x298   : > { %v1345_v15 = vpop.permute.xlu1 %1344 }
 0x299   : > { %v1371_v23 = vmul.f32 %v1345_v15, %v5113_v36 }
 0x29e   : > { %v1335_v60 = vpop.permute.xlu0 %1334 }
 0x29f   : > { %4254 = vrot.lane.b32.xlu2 %v4253_v45, %s6305_s22  ;;  %v1366_v22 = vmul.f32 %v1335_v60, %v5184_v8 }
 0x2a0   : > { %v1349_v37 = vpop.permute.xlu1 %1348 }
 0x2a1   : > { %v1373_v45 = vmul.f32 %v1349_v37, %v5157_v40 }
 0x2a6   : > { %v1331_v50 = vpop.permute.xlu0 %1330 }
 0x2a7   : > { %4259 = vrot.lane.b32.xlu2 %v4258_v11, %s6305_s22 }
 0x2a8   : > { %v1337_v63 = vpop.permute.xlu1 %1336 }
 0x2a9   : > { %v1367_v44 = vmul.f32 %v1337_v63, %v5180_v7 }
 0x2ae   : > { %v1327_v15 = vpop.permute.xlu0 %1326 }
 0x2c9   : > { %v4235_v56 = vpop.permute.xlu2 %4234 }
 0x2ca   : > { %v4237_v51 = vunpack.i.h.bf16 %v4235_v56  ;;  %v4236_v10 = vunpack.i.l.bf16 %v4235_v56  ;;  %v1333_v56 = vpop.permute.xlu1 %1332 }
 0x2cc   : > { %v1428_v38 = vsel %vm772_vm0, %v1368_v32, %v4236_v10  ;;  %v1429_v17 = vsel %vm772_vm0, %v1369_v33, %v4237_v51  ;;  %v1364_v51 = vmul.f32 %v1331_v50, %v5205_v20  ;;  %v1365_v10 = vmul.f32 %v1333_v56, %v5201_v25 }
 0x2cd   : > { %v1437_v24 = vpack.c.bf16 %v1429_v17, %v1428_v38 }
 0x2d9   : > { %v4240_v28 = vpop.permute.xlu2 %4239 }
 0x2da   : > { %v4242_v34 = vunpack.i.h.bf16 %v4240_v28  ;;  %v4241_v54 = vunpack.i.l.bf16 %v4240_v28  ;;  %v1329_v28 = vpop.permute.xlu1 %1328 }
 0x2dc   : > { %v1430_v35 = vsel %vm772_vm0, %v1370_v27, %v4241_v54  ;;  %v1431_v16 = vsel %vm772_vm0, %v1371_v23, %v4242_v34  ;;  %v1362_v23 = vmul.f32 %v1327_v15, %v1147_v26 }
 0x2dd   : > { %v1438_v21 = vpack.c.bf16 %v1431_v16, %v1430_v35  ;;  %v4187_v16 = vld [vmem:[%s5249_s20] sm:$0xff] }
 0x2e9   : > { %v4245_v61 = vpop.permute.xlu2 %4244 }
 0x2ea   : > { %v4247_v41 = vunpack.i.h.bf16 %v4245_v61  ;;  %v4246_v3 = vunpack.i.l.bf16 %v4245_v61 }
 0x2ec   : > { %v1432_v36 = vsel %vm772_vm0, %v1372_v39, %v4246_v3  ;;  %v1433_v57 = vsel %vm772_vm0, %v1373_v45, %v4247_v41 }
 0x2ed   : > { %v1439_v19 = vpack.c.bf16 %v1433_v57, %v1432_v36 }
 0x2ef   : > { %1459 = vmatpush.bf16.msrb.mxu0 %v1439_v19 }
 0x2f1   : > { %v4250_v14 = vpop.permute.xlu2 %4249 }
 0x2f2   : > { %v4252_v11 = vunpack.i.h.bf16 %v4250_v14  ;;  %v4251_v13 = vunpack.i.l.bf16 %v4250_v14 }
 0x2f3   : > { %1460 = vmatpush.bf16.msrb.mxu0 %v1438_v21 }
 0x2f4   : > { %v1426_v9 = vsel %vm772_vm0, %v1366_v22, %v4251_v13  ;;  %v1427_v40 = vsel %vm772_vm0, %v1367_v44, %v4252_v11 }
 0x2f5   : > { %v1436_v32 = vpack.c.bf16 %v1427_v40, %v1426_v9 }
 0x2f7   : > { %1461 = vmatpush.bf16.msrb.mxu0 %v1437_v24  ;;  %v1363_v24 = vmul.f32 %v1329_v28, %v5220_v5  ;;  %v4188_v5 = vld [vmem:[%s5249_s20 + $0x8] sm:$0xff] }
 0x2f9   : > { %v4255_v33 = vpop.permute.xlu2 %4254 }
 0x2fa   : > { %v4257_v8 = vunpack.i.h.bf16 %v4255_v33  ;;  %v4256_v38 = vunpack.i.l.bf16 %v4255_v33 }
 0x2fb   : > { %1462 = vmatpush.bf16.msrb.mxu0 %v1436_v32 }
 0x2fc   : > { %v1424_v7 = vsel %vm772_vm0, %v1364_v51, %v4256_v38  ;;  %v1425_v17 = vsel %vm772_vm0, %v1365_v10, %v4257_v8 }
 0x2fd   : > { %v1435_v31 = vpack.c.bf16 %v1425_v17, %v1424_v7 }
 0x2ff   : > { %1463 = vmatpush.bf16.msrb.mxu0 %v1435_v31 }
 0x301   : > { %v4260_v27 = vpop.permute.xlu2 %4259 }
 0x302   : > { %v4262_v34 = vunpack.i.h.bf16 %v4260_v27  ;;  %v4261_v20 = vunpack.i.l.bf16 %v4260_v27  ;;  %v4195_v27 = vld [vmem:[%s6290_s6 + $0x34] sm:$0xf] }
 0x304   : > { %v1422_v25 = vsel %vm772_vm0, %v1362_v23, %v4261_v20  ;;  %v1423_v54 = vsel %vm772_vm0, %v1363_v24, %v4262_v34  ;;  %v4003_v23 = vld [vmem:[%s6290_s6 + $0x38] sm:$0xf0]  ;;  %v4193_v24 = vld [vmem:[%s6290_s6 + $0x24] sm:$0xf]  ;;  %v3995_v20 = vld [vmem:[%s6290_s6 + $0x28] sm:$0xf0] }
 0x305   : > { %v1434_v35 = vpack.c.bf16 %v1423_v54, %v1422_v25  ;;  %v4006_v34 = vor.u32 %v4195_v27, %v4003_v23  ;;  %v3998_v25 = vor.u32 %v4193_v24, %v3995_v20  ;;  %v1800_v24 = vpop.f32.mrf.mxu1 }
 0x307   : > { %1464 = vmatpush.bf16.msrb.mxu0 %v1434_v35 }
 0x30a   : > { %3984 = vmatmul.msk.bf16.vlgmr.msrb.gmra.mxu0 %vm1450_vm4, %v4187_v16 }
 0x30d   : > { %v1802_v20 = vpop.f32.mrf.mxu1 }
 0x31a   : > { %3985 = vmatmul.msk.bf16.gmra.mxu0 %vm1450_vm4, %v4188_v5 }
 0x387   : > { %v1466_v26 = vpop.f32.mrf.mxu0 }
 0x388   : > { %v1476_v21 = vadd.f32 1e-06, %v1466_v26 }
 0x38a   : > { %4371 = vrcp.f32 %v1476_v21 }
 0x38f   : > { %v1468_v12 = vpop.f32.mrf.mxu0 }
 0x390   : > { %v4372_v37 = vpop.eup %4371  ;;  %v1477_v61 = vadd.f32 1e-06, %v1468_v12 }
 0x391   : > { %1488 = vrot.lane.b32.xlu0 %v4372_v37, %s6303_s23 }
 0x392   : > { %4373 = vrcp.f32 %v1477_v61 }
 0x397   : > { %v1471_v39 = vpop.f32.mrf.mxu0 }
 0x398   : > { %v4374_v45 = vpop.eup %4373  ;;  %v1478_v41 = vadd.f32 1e-06, %v1471_v39 }
 0x399   : > { %1490 = vrot.lane.b32.xlu1 %v4374_v45, %s6303_s23 }
 0x39a   : > { %4375 = vrcp.f32 %v1478_v41 }
 0x39f   : > { %v1473_v3 = vpop.f32.mrf.mxu0 }
 0x3a0   : > { %v4376_v60 = vpop.eup %4375  ;;  %v1479_v63 = vadd.f32 1e-06, %v1473_v3 }
 0x3a1   : > { %1492 = vrot.lane.b32.xlu2 %v4376_v60, %s6303_s23 }
 0x3a2   : > { %4377 = vrcp.f32 %v1479_v63 }
 0x3a8   : > { %v4378_v36 = vpop.eup %4377 }
 0x3a9   : > { %1494 = vrot.lane.b32.xlu0 %v4378_v36, %s6303_s23  ;;  %s6313_s23 = smov 96  }
 0x3fb   : > { %v1493_v57 = vpop.permute.xlu2 %1492 }
 0x3fc   : > { %v1502_v19 = vmul.f32 %v1493_v57, %v1471_v39 }
 0x3fe   : > { %1512 = vrot.lane.b32.xlu0 %v1502_v19, %s6301_s24 }
 0x403   : > { %v1489_v14 = vpop.permute.xlu0 %1488 }
 0x404   : > { %v1500_v22 = vmul.f32 %v1489_v14, %v1466_v26 }
 0x406   : > { %1508 = vrot.lane.b32.xlu1 %v1500_v22, %s6301_s24  ;;  %v4539_v22 = vld [vmem:[%s4757_s26] sm:$0xff] }
 0x40b   : > { %v1491_v44 = vpop.permute.xlu1 %1490 }
 0x40c   : > { %v1501_v11 = vmul.f32 %v1491_v44, %v1468_v12  ;;  %v4540_v44 = vld [vmem:[%s4757_s26 + $0x8] sm:$0xff] }
 0x40e   : > { %1510 = vrot.lane.b32.xlu2 %v1501_v11, %s6301_s24  ;;  %v4541_v11 = vld [vmem:[%s4757_s26 + $0x10] sm:$0xff] }
 0x41b   : > { %v1495_v13 = vpop.permute.xlu0 %1494 }
 0x41c   : > { %v1503_v9 = vmul.f32 %v1495_v13, %v1473_v3  ;;  %v4542_v13 = vld [vmem:[%s4757_s26 + $0x18] sm:$0xff] }
 0x41e   : > { %1514 = vrot.lane.b32.xlu1 %v1503_v9, %s6301_s24  ;;  %v4543_v9 = vld [vmem:[%s4757_s26 + $0x20] sm:$0xff] }
 0x468   : > { %v1511_v40 = vpop.permute.xlu2 %1510 }
 0x469   : > { %v1521_v50 = vadd.f32 %v1511_v40, %v4738_v53  ;;  %v4001_v53 = vld [vmem:[%s6290_s6 + $0x30] sm:$0xf]  ;;  %v4544_v40 = vld [vmem:[%s4757_s26 + $0x28] sm:$0xff] }
 0x46b   : > { %v1525_v56 = vmax.f32 %v1521_v50, 0.0 }
 0x46d   : > { %1534 = vrot.lane.b32.xlu0 %v1525_v56, %s6301_s24 }
 0x470   : > { %v1513_v32 = vpop.permute.xlu0 %1512 }
 0x471   : > { %v1522_v33 = vadd.f32 %v1513_v32, %v4745_v58  ;;  %v4196_v58 = vld [vmem:[%s6290_s6 + $0x34] sm:$0xf0]  ;;  %v4545_v32 = vld [vmem:[%s4791_s21] sm:$0xff] }
 0x472   : > { %v4002_v15 = vor.u32 %v4196_v58, %v4001_v53 }
 0x473   : > { %v1526_v51 = vmax.f32 %v1522_v33, 0.0 }
 0x474   : > { %1620 = vmatpush.bf16.msra.mxu0 %v4002_v15  ;;  %v4549_v15 = vld [vmem:[%s4791_s21 + $0x20] sm:$0xff] }
 0x475   : > { %1536 = vrot.lane.b32.xlu1 %v1526_v51, %s6301_s24  ;;  %v4546_v51 = vld [vmem:[%s4791_s21 + $0x8] sm:$0xff] }
 0x478   : > { %v1509_v10 = vpop.permute.xlu1 %1508 }
 0x479   : > { %v1520_v8 = vadd.f32 %v1509_v10, %v4736_v52  ;;  %v3993_v52 = vld [vmem:[%s6290_s6 + $0x20] sm:$0xf] }
 0x47b   : > { %v1524_v38 = vmax.f32 %v1520_v8, 0.0 }
 0x47d   : > { %1532 = vrot.lane.b32.xlu2 %v1524_v38, %s6301_s24  ;;  %v4547_v38 = vld [vmem:[%s4791_s21 + $0x10] sm:$0xff] }
 0x490   : > { %v1515_v7 = vpop.permute.xlu1 %1514 }
 0x491   : > { %v1523_v17 = vadd.f32 %v1515_v7, %v4747_v59  ;;  %v4194_v59 = vld [vmem:[%s6290_s6 + $0x24] sm:$0xf0] }
 0x492   : > { %v3994_v28 = vor.u32 %v4194_v59, %v3993_v52 }
 0x493   : > { %v1527_v31 = vmax.f32 %v1523_v17, 0.0 }
 0x494   : > { %1621 = vmatpush.bf16.msra.mxu0 %v3994_v28  ;;  %v4550_v28 = vld [vmem:[%s4791_s21 + $0x28] sm:$0xff] }
 0x495   : > { %1538 = vrot.lane.b32.xlu2 %v1527_v31, %s6301_s24  ;;  %v4548_v31 = vld [vmem:[%s4791_s21 + $0x18] sm:$0xff] }
 0x498   : > { %1639 = vmatpush.bf16.msrb.mxu0 %v4006_v34 }
 0x49c   : > { %1640 = vmatpush.bf16.msrb.mxu0 %v3998_v25  ;;  %v4204_v25 = vld [vmem:[%s6291_s7 + $0x28] sm:$0xff] }
 0x49d   : > { %2635 = vmatpush.bf16.msra.mxu1 %v4204_v25 }
 0x4d7   : > { %v1533_v54 = vpop.permute.xlu2 %1532 }
 0x4d8   : > { %v5298_v16 = vadd.f32 %v1533_v54, %v4713_v29  ;;  %v4203_v54 = vld [vmem:[%s6291_s7 + $0x20] sm:$0xff] }
 0x4d9   : > { %2636 = vmatpush.bf16.msra.mxu1 %v4203_v54 }
 0x4df   : > { %v1535_v35 = vpop.permute.xlu0 %1534 }
 0x4e0   : > { %v5301_v5 = vadd.f32 %v1535_v35, %v4715_v30  ;;  %v5320_v30 = vld [vmem:[%s6292_s8 + $0x4] sm:$0xf]  ;;  %v1805_v35 = vpop.f32.mrf.mxu1 }
 0x4e2   : > { %v1579_v26 = vpack.c.bf16 %v5301_v5, %v5298_v16 }
 0x4e4   : > { %4007 = vmatmul.msk.bf16.vlgmr.msra.gmra.mxu0 %vm772_vm0, %v1579_v26 }
 0x4e7   : > { %v1537_v21 = vpop.permute.xlu1 %1536 }
 0x4e8   : > { %v5307_v37 = vadd.f32 %v1537_v21, %v4723_v43  ;;  %v1582_v43 = vperm.slane %v5320_v30, 0  ;;  %v1807_v21 = vpop.f32.mrf.mxu1 }
 0x4ef   : > { %v1539_v12 = vpop.permute.xlu2 %1538 }
 0x4f0   : > { %v5310_v61 = vadd.f32 %v1539_v12, %v4721_v42  ;;  %v1586_v42 = vperm.slane %v1582_v43, 0 }
 0x4f2   : > { %v1580_v29 = vpack.c.bf16 %v5310_v61, %v5307_v37 }
 0x4f4   : > { %4008 = vmatmul.msk.bf16.gmra.mxu0 %vm772_vm0, %v1580_v29 }
 0x504   : > { %4009 = vmatmul.msk.bf16.vlgmr.msrb.gmra.mxu0 %vm772_vm0, %v1579_v26  ;;  %v5403_v26 = vperm.slane %v5320_v30, 1 }
 0x506   : > { %v1803_v43 = vadd.f32 %v1802_v20, %v5403_v26 }
 0x514   : > { %4010 = vmatmul.msk.bf16.gmra.mxu0 %vm772_vm0, %v1580_v29  ;;  %v1801_v29 = vadd.f32 %v1800_v24, %v5403_v26 }
 0x561   : > { %v1623_v39 = vpop.f32.mrf.mxu0 }
 0x562   : > { %v5323_v41 = vadd.f32 %v1623_v39, %v1586_v42 }
 0x569   : > { %v1625_v45 = vpop.f32.mrf.mxu0 }
 0x56a   : > { %v5325_v3 = vadd.f32 %v1625_v45, %v1586_v42 }
 0x56c   : > { %v1830_v60 = vpack.c.bf16 %v5325_v3, %v5323_v41 }
 0x56e   : > { %1873 = vrot.lane.b32.xlu1 %v1830_v60, %s6305_s22 }
 0x571   : > { %v1628_v63 = vpop.f32.mrf.mxu0 }
 0x572   : > { %v5330_v57 = vadd.f32 %v1628_v63, %v1586_v42  ;;  %v1810_v63 = vpop.f32.mrf.mxu1 }
 0x579   : > { %v1630_v36 = vpop.f32.mrf.mxu0 }
 0x57a   : > { %v5332_v19 = vadd.f32 %v1630_v36, %v1586_v42 }
 0x57c   : > { %v1831_v14 = vpack.c.bf16 %v5332_v19, %v5330_v57 }
 0x57e   : > { %1875 = vrot.lane.b32.xlu0 %v1831_v14, %s6305_s22  ;;  %1838 = vmatpush.bf16.msrb.mxu2 %v1831_v14 }
 0x582   : > { %1839 = vmatpush.bf16.msrb.mxu2 %v1830_v60 }
 0x585   : > { %4029 = vmatmul.msk.bf16.vlgmr.msrb.gmra.mxu2 %vm772_vm0, %v4539_v22  ;;  %v1806_v22 = vadd.f32 %v1805_v35, %v5403_v26  ;;  %v1811_v35 = vadd.f32 %v1810_v63, %v5403_v26 }
 0x595   : > { %4030 = vmatmul.msk.bf16.gmra.mxu2 %vm772_vm0, %v4540_v44 }
 0x5a5   : > { %4031 = vmatmul.msk.bf16.gmra.mxu2 %vm772_vm0, %v4541_v11 }
 0x5b5   : > { %4032 = vmatmul.msk.bf16.gmra.mxu2 %vm772_vm0, %v4542_v13 }
 0x5c5   : > { %4033 = vmatmul.msk.bf16.gmra.mxu2 %vm772_vm0, %v4543_v9 }
 0x5d5   : > { %4034 = vmatmul.msk.bf16.gmra.mxu2 %vm772_vm0, %v4544_v40 }
 0x5e0   : > { %v1874_v56 = vpop.permute.xlu1 %1873 }
 0x5f0   : > { %v1876_v50 = vpop.permute.xlu0 %1875 }
 0x5f1   : > { %1885 = vmatpush.bf16.msrb.mxu3 %v1876_v50 }
 0x5f5   : > { %1886 = vmatpush.bf16.msrb.mxu3 %v1874_v56  ;;  %v1812_v56 = vpop.f32.mrf.mxu1 }
 0x5f8   : > { %4035 = vmatmul.msk.bf16.vlgmr.msrb.gmra.mxu3 %vm772_vm0, %v4545_v32 }
 0x608   : > { %v1841_v33 = vpop.f32.mrf.mxu2  ;;  %4036 = vmatmul.msk.bf16.gmra.mxu3 %vm772_vm0, %v4546_v51 }
 0x609   : > { %v1918_v39 = vadd.f32 %v1841_v33, %v1801_v29 }
 0x610   : > { %v1843_v10 = vpop.f32.mrf.mxu2 }
 0x611   : > { %v1919_v45 = vadd.f32 %v1843_v10, %v1803_v43 }
 0x618   : > { %v1846_v8 = vpop.f32.mrf.mxu2  ;;  %4037 = vmatmul.msk.bf16.gmra.mxu3 %vm772_vm0, %v4547_v38 }
 0x619   : > { %v1920_v13 = vadd.f32 %v1846_v8, %v1806_v22 }
 0x620   : > { %v1848_v7 = vpop.f32.mrf.mxu2 }
 0x628   : > { %v5355_v17 = vpop.f32.mrf.mxu2  ;;  %4038 = vmatmul.msk.bf16.gmra.mxu3 %vm772_vm0, %v4548_v31 }
 0x630   : > { %v5359_v53 = vpop.f32.mrf.mxu2 }
 0x638   : > { %v5361_v58 = vpop.f32.mrf.mxu2  ;;  %4039 = vmatmul.msk.bf16.gmra.mxu3 %vm772_vm0, %v4549_v15 }
 0x639   : > { %2194 = vrot.lane.b32.xlu2 %v5361_v58, %s6313_s23 }
 0x640   : > { %v5367_v52 = vpop.f32.mrf.mxu2 }
 0x641   : > { %2196 = vrot.lane.b32.xlu0 %v5367_v52, %s6313_s23 }
 0x648   : > { %v5371_v59 = vpop.f32.mrf.mxu2  ;;  %4040 = vmatmul.msk.bf16.gmra.mxu3 %vm772_vm0, %v4550_v28 }
 0x649   : > { %2198 = vrot.lane.b32.xlu2 %v5371_v59, %s6313_s23 }
 0x650   : > { %v5377_v27 = vpop.f32.mrf.mxu2 }
 0x651   : > { %2200 = vrot.lane.b32.xlu0 %v5377_v27, %s6313_s23 }
 0x658   : > { %v5381_v23 = vpop.f32.mrf.mxu2 }
 0x659   : > { %2202 = vrot.lane.b32.xlu2 %v5381_v23, %s6313_s23 }
 0x660   : > { %v5385_v34 = vpop.f32.mrf.mxu2 }
 0x661   : > { %2190 = vrot.lane.b32.xlu2 %v5355_v17, %s6313_s23  ;;  %2204 = vrot.lane.b32.xlu0 %v5385_v34, %s6313_s23 }
 0x669   : > { %2186 = vrot.lane.b32.xlu2 %v1846_v8, %s6313_s23  ;;  %2192 = vrot.lane.b32.xlu0 %v5359_v53, %s6313_s23 }
 0x671   : > { %2182 = vrot.lane.b32.xlu2 %v1841_v33, %s6313_s23  ;;  %2188 = vrot.lane.b32.xlu0 %v1848_v7, %s6313_s23  ;;  %v1808_v33 = vadd.f32 %v1807_v21, %v5403_v26  ;;  %v1922_v21 = vadd.f32 %v5355_v17, %v1811_v35 }
 0x673   : > { %v1921_v51 = vadd.f32 %v1848_v7, %v1808_v33 }
 0x679   : > { %2184 = vrot.lane.b32.xlu0 %v1843_v10, %s6313_s23 }
 0x67b   : > { %v1888_v12 = vpop.f32.mrf.mxu3 }
 0x67c   : > { %v5408_v42 = vadd.f32 %v1918_v39, %v1888_v12  ;;  %v1813_v39 = vadd.f32 %v1812_v56, %v5403_v26 }
 0x67e   : > { %v2387_v36 = vmax.f32 %v5408_v42, 0.0 }
 0x680   : > { %v2399_v44 = vadd.f32 %v2387_v36, %v4940_v46 }
 0x683   : > { %v1890_v60 = vpop.f32.mrf.mxu3 }
 0x684   : > { %v5411_v14 = vadd.f32 %v1919_v45, %v1890_v60 }
 0x686   : > { %v2388_v30 = vmax.f32 %v5411_v14, 0.0 }
 0x688   : > { %v2400_v11 = vadd.f32 %v2388_v30, %v4943_v48  ;;  %v1815_v48 = vpop.f32.mrf.mxu1 }
 0x68a   : > { %v2592_v9 = vpack.c.bf16 %v2400_v11, %v2399_v44  ;;  %v1816_v44 = vadd.f32 %v1815_v48, %v5403_v26 }
 0x68b   : > { %v1893_v40 = vpop.f32.mrf.mxu3 }
 0x68c   : > { %v1932_v50 = vadd.f32 %v1920_v13, %v1893_v40  ;;  %4092 = vmatmul.msk.bf16.vlgmr.msra.gmra.mxu1 %vm772_vm0, %v2592_v9 }
 0x68e   : > { %v4043_v32 = vmul.f32 -1.442695, %v1932_v50  ;;  %v2389_v38 = vmax.f32 %v1932_v50, 0.0  ;;  %v1924_v50 = vadd.f32 %v5361_v58, %v1816_v44 }
 0x690   : > { %4379 = vpow2.f32 %v4043_v32  ;;  %v2401_v8 = vadd.f32 %v2389_v38, %v4961_v6  ;;  %v1817_v45 = vpop.f32.mrf.mxu1 }
 0x691   : > { %v1818_v58 = vadd.f32 %v1817_v45, %v5403_v26 }
 0x693   : > { %v1895_v10 = vpop.f32.mrf.mxu3 }
 0x694   : > { %v1933_v31 = vadd.f32 %v1921_v51, %v1895_v10 }
 0x696   : > { %v4380_v15 = vpop.eup %4379  ;;  %v4044_v28 = vmul.f32 -1.442695, %v1933_v31  ;;  %v2390_v46 = vmax.f32 %v1933_v31, 0.0 }
 0x697   : > { %v1980_v24 = vadd.f32 1.0, %v4380_v15 }
 0x698   : > { %4381 = vpow2.f32 %v4044_v28  ;;  %v2402_v20 = vadd.f32 %v2390_v46, %v4964_v49  ;;  %v1923_v49 = vadd.f32 %v5359_v53, %v1813_v39  ;;  %v1820_v33 = vpop.f32.mrf.mxu1 }
 0x699   : > { %4383 = vrcp.f32 %v1980_v24  ;;  %vm2025_vm6 = vweird.f32 %v1980_v24  ;;  %v2029_v31 = vand.u32 2147483647, %v1980_v24  ;;  %v2031_v15 = vand.u32 2147483648, %v1980_v24 }
 0x69a   : > { %v2593_v25 = vpack.c.bf16 %v2402_v20, %v2401_v8 }
 0x69b   : > { %v1898_v54 = vpop.f32.mrf.mxu3  ;;  %v2032_v8 = vor.u32 1.1754944e-38, %v2031_v15  ;;  %vm2030_vm11 = vcmp.eq.f32.partialorder %v2029_v31, 8.507059e+37 }
 0x69c   : > { %4093 = vmatmul.msk.bf16.gmra.mxu1 %vm772_vm0, %v2593_v25  ;;  %v5425_v43 = vadd.f32 %v1922_v21, %v1898_v54  ;;  %v1925_v25 = vadd.f32 %v5367_v52, %v1818_v58  ;;  %v1821_v52 = vadd.f32 %v1820_v33, %v5403_v26 }
 0x69e   : > { %v4382_v7 = vpop.eup %4381  ;;  %v2391_v36 = vmax.f32 %v5425_v43, 0.0 }
 0x69f   : > { %v4384_v12 = vpop.eup %4383  ;;  %v1981_v29 = vadd.f32 1.0, %v4382_v7 }
 0x6a0   : > { %v2021_v6 = vmul.f32 %v4384_v12, %v1980_v24  ;;  %v2403_v11 = vadd.f32 %v2391_v36, %v4977_v47  ;;  %vm2026_vm5 = vweird.f32 %v4384_v12 }
 0x6a1   : > { %4385 = vrcp.f32 %v1981_v29  ;;  %v2046_v47 = vand.u32 2147483648, %v1981_v29  ;;  %v2044_v46 = vand.u32 2147483647, %v1981_v29  ;;  %vm2027_vm8 = vmor %vm2025_vm6, %vm2026_vm5  ;;  %vm2040_vm9 = vweird.f32 %v1981_v29 }
 0x6a2   : > { %v2022_v30 = vsub.f32 1.0, %v2021_v6 }
 0x6a3   : > { %v1900_v60 = vpop.f32.mrf.mxu3  ;;  %v2047_v20 = vor.u32 1.1754944e-38, %v2046_v47  ;;  %vm2045_vm12 = vcmp.eq.f32.partialorder %v2044_v46, 8.507059e+37 }
 0x6a4   : > { %v5429_v63 = vadd.f32 %v1923_v49, %v1900_v60  ;;  %v2023_v9 = vmul.f32 %v4384_v12, %v2022_v30 }
 0x6a6   : > { %v2392_v22 = vmax.f32 %v5429_v63, 0.0  ;;  %v2024_v10 = vadd.f32 %v4384_v12, %v2023_v9 }
 0x6a7   : > { %v4386_v17 = vpop.eup %4385 }
 0x6a8   : > { %v2404_v13 = vadd.f32 %v2392_v22, %v4980_v4  ;;  %v2036_v40 = vmul.f32 %v4386_v17, %v1981_v29  ;;  %vm2041_vm7 = vweird.f32 %v4386_v17  ;;  %v2028_v48 = vsel %vm2027_vm8, %v4384_v12, %v2024_v10  ;;  %v1822_v29 = vpop.f32.mrf.mxu1 }
 0x6a9   : > { %vm2042_vm10 = vmor %vm2040_vm9, %vm2041_vm7  ;;  %v5439_v35 = vsel %vm2030_vm11, %v2032_v8, %v2028_v48  ;;  %v1926_v22 = vadd.f32 %v5371_v59, %v1821_v52  ;;  %v4046_v48 = vmul.f32 -1.442695, %v5429_v63 }
 0x6aa   : > { %v2594_v53 = vpack.c.bf16 %v2404_v13, %v2403_v11  ;;  %v2037_v56 = vsub.f32 1.0, %v2036_v40 }
 0x6ab   : > { %v1903_v32 = vpop.f32.mrf.mxu3 }
 0x6ac   : > { %v1936_v51 = vadd.f32 %v1924_v50, %v1903_v32  ;;  %4094 = vmatmul.msk.bf16.gmra.mxu1 %vm772_vm0, %v2594_v53  ;;  %v2038_v38 = vmul.f32 %v4386_v17, %v2037_v56  ;;  %v1823_v53 = vadd.f32 %v1822_v29, %v5403_v26  ;;  %v4045_v32 = vmul.f32 -1.442695, %v5425_v43 }
 0x6ae   : > { %v4047_v28 = vmul.f32 -1.442695, %v1936_v51  ;;  %v2039_v4 = vadd.f32 %v4386_v17, %v2038_v38  ;;  %v2393_v21 = vmax.f32 %v1936_v51, 0.0  ;;  %v1927_v59 = vadd.f32 %v5377_v27, %v1823_v53 }
 0x6b0   : > { %4387 = vpow2.f32 %v4047_v28  ;;  %v2043_v54 = vsel %vm2042_vm10, %v4386_v17, %v2039_v4  ;;  %v2405_v36 = vadd.f32 %v2393_v21, %v4992_v62  ;;  %v1825_v62 = vpop.f32.mrf.mxu1 }
 0x6b1   : > { %v5441_v7 = vsel %vm2045_vm12, %v2047_v20, %v2043_v54  ;;  %v1826_v4 = vadd.f32 %v1825_v62, %v5403_v26 }
 0x6b2   : > { %v4283_v6 = vpack.i.bf16 %v5441_v7, %v5439_v35 }
 0x6b3   : > { %v1905_v24 = vpop.f32.mrf.mxu3  ;;  %v1928_v43 = vadd.f32 %v5381_v23, %v1826_v4 }
 0x6b4   : > { %v1937_v39 = vadd.f32 %v1925_v25, %v1905_v24 }
 0x6b6   : > { %v4388_v12 = vpop.eup %4387  ;;  %v4048_v45 = vmul.f32 -1.442695, %v1937_v39  ;;  %v2394_v49 = vmax.f32 %v1937_v39, 0.0 }
 0x6b7   : > { %v5445_v60 = vadd.f32 1.0, %v4388_v12 }
 0x6b8   : > { %4389 = vpow2.f32 %v4048_v45  ;;  %v2406_v30 = vadd.f32 %v2394_v49, %v4995_v0  ;;  %v1827_v20 = vpop.f32.mrf.mxu1 }
 0x6b9   : > { %4391 = vrcp.f32 %v5445_v60  ;;  %vm2085_vm13 = vweird.f32 %v5445_v60  ;;  %v2089_v24 = vand.u32 2147483647, %v5445_v60  ;;  %v1828_v45 = vadd.f32 %v1827_v20, %v5403_v26 }
 0x6ba   : > { %v2595_v17 = vpack.c.bf16 %v2406_v30, %v2405_v36 }
 0x6bb   : > { %v1908_v44 = vpop.f32.mrf.mxu3  ;;  %vm2090_vm3 = vcmp.eq.f32.partialorder %v2089_v24, 8.507059e+37 }
 0x6bc   : > { %v1938_v11 = vadd.f32 %v1926_v22, %v1908_v44  ;;  %4095 = vmatmul.msk.bf16.gmra.mxu1 %vm772_vm0, %v2595_v17 }
 0x6be   : > { %v4390_v13 = vpop.eup %4389  ;;  %v4049_v9 = vmul.f32 -1.442695, %v1938_v11  ;;  %v2395_v10 = vmax.f32 %v1938_v11, 0.0 }
 0x6bf   : > { %v5453_v40 = vpop.eup %4391  ;;  %v1985_v50 = vadd.f32 1.0, %v4390_v13 }
 0x6c0   : > { %4393 = vpow2.f32 %v4049_v9  ;;  %v2081_v0 = vmul.f32 %v5453_v40, %v5445_v60  ;;  %v2407_v8 = vadd.f32 %v2395_v10, %v5018_v55  ;;  %vm2086_vm14 = vweird.f32 %v5453_v40 }
 0x6c1   : > { %4395 = vrcp.f32 %v1985_v50  ;;  %v2106_v21 = vand.u32 2147483648, %v1985_v50  ;;  %v2104_v12 = vand.u32 2147483647, %v1985_v50  ;;  %vm5477_vm1 = vmor %vm2085_vm13, %vm2086_vm14  ;;  %vm2100_vm2 = vweird.f32 %v1985_v50 }
 0x6c2   : > { %v2082_v56 = vsub.f32 1.0, %v2081_v0  ;;  %4397 = vpow2.f32 %v4045_v32 }
 0x6c3   : > { %v1910_v33 = vpop.f32.mrf.mxu3  ;;  %v2107_v44 = vor.u32 1.1754944e-38, %v2106_v21  ;;  %vm2105_vm6 = vcmp.eq.f32.partialorder %v2104_v12, 8.507059e+37 }
 0x6c4   : > { %v1939_v51 = vadd.f32 %v1927_v59, %v1910_v33  ;;  %v2083_v47 = vmul.f32 %v5453_v40, %v2082_v56  ;;  %v4042_v59 = vmul.f32 -1.442695, %v5411_v14 }
 0x6c6   : > { %v4394_v38 = vpop.eup %4393  ;;  %v4050_v31 = vmul.f32 -1.442695, %v1939_v51  ;;  %v2396_v15 = vmax.f32 %v1939_v51, 0.0  ;;  %v2084_v25 = vadd.f32 %v5453_v40, %v2083_v47 }
 0x6c7   : > { %v4396_v28 = vpop.eup %4395  ;;  %v5462_v46 = vadd.f32 1.0, %v4394_v38 }
 0x6c8   : > { %4399 = vpow2.f32 %v4050_v31  ;;  %v2408_v27 = vadd.f32 %v2396_v15, %v5021_v18  ;;  %v2096_v58 = vmul.f32 %v4396_v28, %v1985_v50  ;;  %v2091_v18 = vand.u32 2147483648, %v5445_v60  ;;  %v4398_v55 = vpop.eup %4397 }
 0x6c9   : > { %4401 = vrcp.f32 %v5462_v46  ;;  %vm2101_vm15 = vweird.f32 %v4396_v28  ;;  %v2088_v36 = vsel %vm5477_vm1, %v5453_v40, %v2084_v25  ;;  %v1929_v50 = vadd.f32 %v5385_v34, %v1828_v45 }
 0x6ca   : > { %v2097_v54 = vsub.f32 1.0, %v2096_v58  ;;  %v2596_v39 = vpack.c.bf16 %v2408_v27, %v2407_v8  ;;  %4403 = vpow2.f32 %v4046_v48  ;;  %v2092_v60 = vor.u32 1.1754944e-38, %v2091_v18  ;;  %vm2102_vm5 = vmor %vm2100_vm2, %vm2101_vm15 }
 0x6cb   : > { %v1913_v23 = vpop.f32.mrf.mxu3  ;;  %v5509_v4 = vadd.f32 1.0, %v4398_v55  ;;  %vm2115_vm8 = vweird.f32 %v5462_v46  ;;  %v2119_v25 = vand.u32 2147483647, %v5462_v46 }
 0x6cc   : > { %v2098_v63 = vmul.f32 %v4396_v28, %v2097_v54  ;;  %v1940_v29 = vadd.f32 %v1928_v43, %v1913_v23  ;;  %4096 = vmatmul.msk.bf16.gmra.mxu1 %vm772_vm0, %v2596_v39  ;;  %v5493_v9 = vsel %vm2090_vm3, %v2092_v60, %v2088_v36 }
 0x6cd   : > { %vm2120_vm13 = vcmp.eq.f32.partialorder %v2119_v25, 8.507059e+37 }
 0x6ce   : > { %v4400_v52 = vpop.eup %4399  ;;  %v2099_v30 = vadd.f32 %v4396_v28, %v2098_v63  ;;  %v4051_v22 = vmul.f32 -1.442695, %v1940_v29  ;;  %v2397_v33 = vmax.f32 %v1940_v29, 0.0 }
 0x6cf   : > { %v5485_v17 = vpop.eup %4401  ;;  %v5487_v26 = vadd.f32 1.0, %v4400_v52 }
 0x6d0   : > { %v2103_v11 = vsel %vm2102_vm5, %v4396_v28, %v2099_v30  ;;  %4405 = vpow2.f32 %v4051_v22  ;;  %v2111_v13 = vmul.f32 %v5485_v17, %v5462_v46  ;;  %v4404_v0 = vpop.eup %4403  ;;  %v4041_v28 = vmul.f32 -1.442695, %v5408_v42 }
 0x6d1   : > { %4407 = vrcp.f32 %v5487_v26  ;;  %v5495_v40 = vsel %vm2105_vm6, %v2107_v44, %v2103_v11  ;;  %v5502_v10 = vadd.f32 1.0, %v4404_v0  ;;  %v2409_v27 = vadd.f32 %v2397_v33, %v5072_v1 }
 0x6d2   : > { %v4263_v53 = vpack.i.bf16 %v5495_v40, %v5493_v9  ;;  %v2112_v62 = vsub.f32 1.0, %v2111_v13  ;;  %4409 = vpow2.f32 %v4042_v59  ;;  %vm2116_vm7 = vweird.f32 %v5485_v17 }
 0x6d3   : > { %v1915_v56 = vpop.f32.mrf.mxu3  ;;  %v2121_v42 = vand.u32 2147483648, %v5462_v46  ;;  %v2136_v8 = vand.u32 2147483648, %v5487_v26  ;;  %v2134_v1 = vand.u32 2147483647, %v5487_v26  ;;  %vm5523_vm10 = vmor %vm2115_vm8, %vm2116_vm7  ;;  %vm2130_vm11 = vweird.f32 %v5487_v26 }
 0x6d4   : > { %v1941_v32 = vadd.f32 %v1929_v50, %v1915_v56  ;;  %4264 = vrot.lane.b32.xlu1 %v4263_v53, %s6305_s22  ;;  %v2113_v38 = vmul.f32 %v5485_v17, %v2112_v62  ;;  %v2076_v25 = vand.u32 2147483648, %v5502_v10 }
 0x6d5   : > { %v2122_v39 = vor.u32 1.1754944e-38, %v2121_v42  ;;  %v2137_v63 = vor.u32 1.1754944e-38, %v2136_v8  ;;  %vm2135_vm14 = vcmp.eq.f32.partialorder %v2134_v1, 8.507059e+37 }
 0x6d6   : > { %v4406_v51 = vpop.eup %4405  ;;  %v4052_v31 = vmul.f32 -1.442695, %v1941_v32  ;;  %v2398_v15 = vmax.f32 %v1941_v32, 0.0  ;;  %v2114_v43 = vadd.f32 %v5485_v17, %v2113_v38 }
 0x6d7   : > { %v4408_v34 = vpop.eup %4407  ;;  %v5505_v47 = vadd.f32 1.0, %v4406_v51 }
 0x6d8   : > { %v2126_v14 = vmul.f32 %v4408_v34, %v5487_v26  ;;  %4411 = vpow2.f32 %v4052_v31  ;;  %v2410_v58 = vadd.f32 %v2398_v15, %v5075_v2  ;;  %vm2131_vm9 = vweird.f32 %v4408_v34  ;;  %v4410_v2 = vpop.eup %4409 }
 0x6d9   : > { %4413 = vrcp.f32 %v5505_v47  ;;  %v2118_v21 = vsel %vm5523_vm10, %v5485_v17, %v2114_v43  ;;  %vm2132_vm12 = vmor %vm2130_vm11, %vm2131_vm9  ;;  %v5546_v60 = vadd.f32 1.0, %v4410_v2  ;;  %vm2145_vm1 = vweird.f32 %v5505_v47 }
 0x6da   : > { %4415 = vrcp.f32 %v5502_v10  ;;  %v2127_v48 = vsub.f32 1.0, %v2126_v14  ;;  %v2597_v20 = vpack.c.bf16 %v2410_v58, %v2409_v27  ;;  %v5535_v49 = vsel %vm2120_vm13, %v2122_v39, %v2118_v21 }
 0x6db   : > { %4417 = vrcp.f32 %v5509_v4  ;;  %v2151_v32 = vand.u32 2147483648, %v5505_v47  ;;  %v2149_v38 = vand.u32 2147483647, %v5505_v47  ;;  %vm2070_vm11 = vweird.f32 %v5502_v10 }
 0x6dc   : > { %v2128_v54 = vmul.f32 %v4408_v34, %v2127_v48  ;;  %4097 = vmatmul.msk.bf16.gmra.mxu1 %vm772_vm0, %v2597_v20  ;;  %4419 = vpow2.f32 %v4041_v28  ;;  %v2074_v2 = vand.u32 2147483647, %v5502_v10  ;;  %vm2055_vm13 = vweird.f32 %v5509_v4 }
 0x6dd   : > { %v2152_v43 = vor.u32 1.1754944e-38, %v2151_v32  ;;  %vm2150_vm8 = vcmp.eq.f32.partialorder %v2149_v38, 8.507059e+37  ;;  %v2059_v21 = vand.u32 2147483647, %v5509_v4 }
 0x6de   : > { %v4412_v18 = vpop.eup %4411  ;;  %v2129_v23 = vadd.f32 %v4408_v34, %v2128_v54 }
 0x6df   : > { %v4414_v46 = vpop.eup %4413  ;;  %v1989_v12 = vadd.f32 1.0, %v4412_v18  ;;  %v2061_v18 = vand.u32 2147483648, %v5509_v4 }
 0x6e0   : > { %v5532_v29 = vpop.eup %4415  ;;  %v2133_v55 = vsel %vm2132_vm12, %v4408_v34, %v2129_v23  ;;  %v2141_v45 = vmul.f32 %v4414_v46, %v5505_v47  ;;  %vm2146_vm15 = vweird.f32 %v4414_v46 }
 0x6e1   : > { %v5537_v52 = vsel %vm2135_vm14, %v2137_v63, %v2133_v55  ;;  %4421 = vrcp.f32 %v1989_v12  ;;  %v5541_v22 = vpop.eup %4417  ;;  %v2066_v17 = vmul.f32 %v5532_v29, %v5502_v10  ;;  %v2166_v33 = vand.u32 2147483648, %v1989_v12  ;;  %vm5558_vm3 = vmor %vm2145_vm1, %vm2146_vm15 }
 0x6e2   : > { %v4268_v36 = vpack.i.bf16 %v5537_v52, %v5535_v49  ;;  %v2142_v30 = vsub.f32 1.0, %v2141_v45  ;;  %v4420_v26 = vpop.eup %4419  ;;  %v2051_v44 = vmul.f32 %v5541_v22, %v5509_v4  ;;  %4423 = vrcp.f32 %v5546_v60 }
 0x6e3   : > { %v2067_v50 = vsub.f32 1.0, %v2066_v17  ;;  %v5550_v62 = vadd.f32 1.0, %v4420_v26  ;;  %v2164_v15 = vand.u32 2147483647, %v1989_v12  ;;  %vm2160_vm5 = vweird.f32 %v1989_v12 }
 0x6e4   : > { %4269 = vrot.lane.b32.xlu1 %v4268_v36, %s6305_s22  ;;  %v2143_v11 = vmul.f32 %v4414_v46, %v2142_v30  ;;  %v2052_v0 = vsub.f32 1.0, %v2051_v44  ;;  %v2167_v47 = vor.u32 1.1754944e-38, %v2166_v33  ;;  %vm2071_vm7 = vweird.f32 %v5532_v29 }
 0x6e5   : > { %v2068_v51 = vmul.f32 %v5532_v29, %v2067_v50  ;;  %4425 = vrcp.f32 %v5550_v62  ;;  %vm2165_vm9 = vcmp.eq.f32.partialorder %v2164_v15, 8.507059e+37  ;;  %vm2056_vm10 = vweird.f32 %v5541_v22  ;;  %vm2072_vm12 = vmor %vm2070_vm11, %vm2071_vm7 }
 0x6e6   : > { %v2144_v59 = vadd.f32 %v4414_v46, %v2143_v11  ;;  %v2053_v28 = vmul.f32 %v5541_v22, %v2052_v0  ;;  %vm2057_vm14 = vmor %vm2055_vm13, %vm2056_vm10  ;;  %v2077_v10 = vor.u32 1.1754944e-38, %v2076_v25  ;;  %vm2075_vm15 = vcmp.eq.f32.partialorder %v2074_v2, 8.507059e+37 }
 0x6e7   : > { %v4422_v13 = vpop.eup %4421  ;;  %v2069_v42 = vadd.f32 %v5532_v29, %v2068_v51  ;;  %vm2060_vm1 = vcmp.eq.f32.partialorder %v2059_v21, 8.507059e+37  ;;  %v2014_v11 = vand.u32 2147483647, %v5546_v60  ;;  %vm1995_vm7 = vweird.f32 %v5550_v62  ;;  %v2197_v51 = vpop.permute.xlu0 %2196 }
 0x6e8   : > { %v2156_v53 = vmul.f32 %v4422_v13, %v1989_v12  ;;  %vm2161_vm2 = vweird.f32 %v4422_v13  ;;  %v2148_v14 = vsel %vm5558_vm3, %v4414_v46, %v2144_v59  ;;  %v4424_v58 = vpop.eup %4423  ;;  %v2054_v54 = vadd.f32 %v5541_v22, %v2053_v28 }
 0x6e9   : > { %vm2162_vm6 = vmor %vm2160_vm5, %vm2161_vm2  ;;  %v5568_v8 = vsel %vm2150_vm8, %v2152_v43, %v2148_v14  ;;  %v2073_v23 = vsel %vm2072_vm12, %v5532_v29, %v2069_v42  ;;  %v2006_v46 = vmul.f32 %v4424_v58, %v5546_v60  ;;  %v2062_v12 = vor.u32 1.1754944e-38, %v2061_v18 }
 0x6ea   : > { %v2157_v56 = vsub.f32 1.0, %v2156_v53  ;;  %v2058_v39 = vsel %vm2057_vm14, %v5541_v22, %v2054_v54  ;;  %v5590_v55 = vsel %vm2075_vm15, %v2077_v10, %v2073_v23  ;;  %vm2011_vm2 = vweird.f32 %v4424_v58 }
 0x6eb   : > { %v4426_v24 = vpop.eup %4425  ;;  %v2007_v4 = vsub.f32 1.0, %v2006_v46  ;;  %v5592_v45 = vsel %vm2060_vm1, %v2062_v12, %v2058_v39  ;;  %v2016_v22 = vand.u32 2147483648, %v5546_v60  ;;  %vm2010_vm5 = vweird.f32 %v5546_v60 }
 0x6ec   : > { %v2158_v31 = vmul.f32 %v4422_v13, %v2157_v56  ;;  %v1991_v63 = vmul.f32 %v4426_v24, %v5550_v62  ;;  %v4278_v36 = vpack.i.bf16 %v5590_v55, %v5592_v45  ;;  %vm1996_vm3 = vweird.f32 %v4426_v24 }
 0x6ed   : > { %v2008_v30 = vmul.f32 %v4424_v58, %v2007_v4  ;;  %v1999_v50 = vand.u32 2147483647, %v5550_v62  ;;  %vm1997_vm8 = vmor %vm1995_vm7, %vm1996_vm3  ;;  %v2017_v0 = vor.u32 1.1754944e-38, %v2016_v22 }
 0x6ee   : > { %v2159_v27 = vadd.f32 %v4422_v13, %v2158_v31  ;;  %v1992_v29 = vsub.f32 1.0, %v1991_v63 }
 0x6ef   : > { %v2009_v26 = vadd.f32 %v4424_v58, %v2008_v30  ;;  %vm2000_vm10 = vcmp.eq.f32.partialorder %v1999_v50, 8.507059e+37  ;;  %v2201_v43 = vpop.permute.xlu0 %2200 }
 0x6f0   : > { %v2163_v48 = vsel %vm2162_vm6, %v4422_v13, %v2159_v27  ;;  %v1993_v17 = vmul.f32 %v4426_v24, %v1992_v29  ;;  %v2001_v13 = vand.u32 2147483648, %v5550_v62  ;;  %vm2012_vm6 = vmor %vm2010_vm5, %vm2011_vm2  ;;  %v2195_v62 = vpop.permute.xlu2 %2194  ;;  %v2227_v42 = vmul.f32 %v2201_v43, %v5537_v52 }
 0x6f1   : > { %v5570_v20 = vsel %vm2165_vm9, %v2167_v47, %v2163_v48  ;;  %v2013_v53 = vsel %vm2012_vm6, %v4424_v58, %v2009_v26  ;;  %vm2015_vm9 = vcmp.eq.f32.partialorder %v2014_v11, 8.507059e+37  ;;  %v2224_v31 = vmul.f32 %v2195_v62, %v5493_v9 }
 0x6f2   : > { %v4273_v1 = vpack.i.bf16 %v5570_v20, %v5568_v8  ;;  %v1994_v44 = vadd.f32 %v4426_v24, %v1993_v17  ;;  %v2002_v56 = vor.u32 1.1754944e-38, %v2001_v13  ;;  %v5607_v32 = vsel %vm2015_vm9, %v2017_v0, %v2013_v53 }
 0x6f4   : > { %4274 = vrot.lane.b32.xlu1 %v4273_v1, %s6305_s22  ;;  %v1998_v59 = vsel %vm1997_vm8, %v4426_v24, %v1994_v44 }
 0x6f5   : > { %v2003_v60 = vsel %vm2000_vm10, %v2002_v56, %v1998_v59 }
 0x6f6   : > { %v4288_v33 = vpack.i.bf16 %v5607_v32, %v2003_v60 }
 0x6f7   : > { %v2205_v24 = vpop.permute.xlu0 %2204 }
 0x6f8   : > { %v2199_v58 = vpop.permute.xlu2 %2198  ;;  %v2229_v23 = vmul.f32 %v2205_v24, %v5570_v20 }
 0x6f9   : > { %v2226_v48 = vmul.f32 %v2199_v58, %v5535_v49 }
 0x6fc   : > { %4279 = vrot.lane.b32.xlu1 %v4278_v36, %s6305_s22 }
 0x6ff   : > { %v2193_v49 = vpop.permute.xlu0 %2192 }
 0x700   : > { %v2203_v2 = vpop.permute.xlu2 %2202  ;;  %v2223_v36 = vmul.f32 %v2193_v49, %v5590_v55 }
 0x701   : > { %v2228_v21 = vmul.f32 %v2203_v2, %v5568_v8 }
 0x704   : > { %4284 = vrot.lane.b32.xlu1 %v4283_v6, %s6305_s22  ;;  %v2225_v6 = vmul.f32 %v2197_v51, %v5495_v40 }
 0x707   : > { %v2189_v22 = vpop.permute.xlu0 %2188 }
 0x708   : > { %v2191_v39 = vpop.permute.xlu2 %2190  ;;  %v2221_v50 = vmul.f32 %v2189_v22, %v5441_v7 }
 0x709   : > { %v2222_v29 = vmul.f32 %v2191_v39, %v5592_v45 }
 0x70c   : > { %4289 = vrot.lane.b32.xlu1 %v4288_v33, %s6305_s22 }
 0x70f   : > { %v2185_v33 = vpop.permute.xlu0 %2184 }
 0x710   : > { %v2187_v26 = vpop.permute.xlu2 %2186 }
 0x711   : > { %v2220_v13 = vmul.f32 %v2187_v26, %v5439_v35 }
 0x718   : > { %v2183_v56 = vpop.permute.xlu2 %2182 }
 0x719   : > { %v2218_v51 = vmul.f32 %v2183_v56, %v2003_v60  ;;  %v5644_v60 = vpop.f32.mrf.mxu0 }
 0x746   : > { %v4265_v38 = vpop.permute.xlu1 %4264 }
 0x747   : > { %v4267_v15 = vunpack.i.h.bf16 %v4265_v38  ;;  %v4266_v34 = vunpack.i.l.bf16 %v4265_v38  ;;  %v2219_v38 = vmul.f32 %v2185_v33, %v5607_v32  ;;  %v5646_v32 = vpop.f32.mrf.mxu0 }
 0x749   : > { %v2284_v28 = vsel %vm772_vm0, %v2224_v31, %v4266_v34  ;;  %v2285_v14 = vsel %vm772_vm0, %v2225_v6, %v4267_v15  ;;  %v5635_v34 = vld [vmem:[%s5249_s20] sm:$0xff] }
 0x74a   : > { %v2293_v27 = vpack.c.bf16 %v2285_v14, %v2284_v28  ;;  %v5640_v28 = vld [vmem:[%s5249_s20 + $0x8] sm:$0xff]  ;;  %s6320_s20 = smov 64  }
 0x74f   : > { %v5648_v14 = vpop.f32.mrf.mxu0 }
 0x756   : > { %v4270_v47 = vpop.permute.xlu1 %4269 }
 0x757   : > { %v4272_v25 = vunpack.i.h.bf16 %v4270_v47  ;;  %v4271_v54 = vunpack.i.l.bf16 %v4270_v47 }
 0x759   : > { %v2286_v9 = vsel %vm772_vm0, %v2226_v48, %v4271_v54  ;;  %v2287_v40 = vsel %vm772_vm0, %v2227_v42, %v4272_v25 }
 0x75a   : > { %v2294_v1 = vpack.c.bf16 %v2287_v40, %v2286_v9 }
 0x766   : > { %v4275_v18 = vpop.permute.xlu1 %4274 }
 0x767   : > { %v4277_v46 = vunpack.i.h.bf16 %v4275_v18  ;;  %v4276_v10 = vunpack.i.l.bf16 %v4275_v18 }
 0x769   : > { %v2288_v52 = vsel %vm772_vm0, %v2228_v21, %v4276_v10  ;;  %v2289_v63 = vsel %vm772_vm0, %v2229_v23, %v4277_v46 }
 0x76a   : > { %v2295_v12 = vpack.c.bf16 %v2289_v63, %v2288_v52 }
 0x76c   : > { %2298 = vmatpush.bf16.msra.mxu0 %v2295_v12 }
 0x76e   : > { %v4280_v4 = vpop.permute.xlu1 %4279 }
 0x76f   : > { %v4282_v30 = vunpack.i.h.bf16 %v4280_v4  ;;  %v4281_v17 = vunpack.i.l.bf16 %v4280_v4 }
 0x770   : > { %2299 = vmatpush.bf16.msra.mxu0 %v2294_v1 }
 0x771   : > { %v2282_v8 = vsel %vm772_vm0, %v2222_v29, %v4281_v17  ;;  %v2283_v20 = vsel %vm772_vm0, %v2223_v36, %v4282_v30 }
 0x772   : > { %v2292_v44 = vpack.c.bf16 %v2283_v20, %v2282_v8 }
 0x774   : > { %2300 = vmatpush.bf16.msra.mxu0 %v2293_v27  ;;  %v5650_v27 = vpop.f32.mrf.mxu0 }
 0x776   : > { %v4285_v11 = vpop.permute.xlu1 %4284 }
 0x777   : > { %v4287_v53 = vunpack.i.h.bf16 %v4285_v11  ;;  %v4286_v45 = vunpack.i.l.bf16 %v4285_v11 }
 0x778   : > { %2301 = vmatpush.bf16.msra.mxu0 %v2292_v44 }
 0x779   : > { %v2280_v55 = vsel %vm772_vm0, %v2220_v13, %v4286_v45  ;;  %v2281_v0 = vsel %vm772_vm0, %v2221_v50, %v4287_v53  ;;  %v4201_v50 = vld [vmem:[%s6290_s6 + $0x54] sm:$0xf]  ;;  %v4072_v53 = vld [vmem:[%s6290_s6 + $0x58] sm:$0xf0]  ;;  %v4199_v45 = vld [vmem:[%s6290_s6 + $0x44] sm:$0xf] }
 0x77a   : > { %v2291_v59 = vpack.c.bf16 %v2281_v0, %v2280_v55  ;;  %v4075_v55 = vor.u32 %v4201_v50, %v4072_v53  ;;  %v4064_v0 = vld [vmem:[%s6290_s6 + $0x48] sm:$0xf0] }
 0x77c   : > { %2302 = vmatpush.bf16.msra.mxu0 %v2291_v59  ;;  %v4067_v59 = vor.u32 %v4199_v45, %v4064_v0 }
 0x77e   : > { %v4290_v62 = vpop.permute.xlu1 %4289 }
 0x77f   : > { %v4292_v35 = vunpack.i.h.bf16 %v4290_v62  ;;  %v4291_v31 = vunpack.i.l.bf16 %v4290_v62 }
 0x781   : > { %v2278_v7 = vsel %vm772_vm0, %v2218_v51, %v4291_v31  ;;  %v2279_v6 = vsel %vm772_vm0, %v2219_v38, %v4292_v35 }
 0x782   : > { %v2290_v15 = vpack.c.bf16 %v2279_v6, %v2278_v7 }
 0x784   : > { %2303 = vmatpush.bf16.msra.mxu0 %v2290_v15 }
 0x787   : > { %4053 = vmatmul.msk.bf16.vlgmr.msra.gmra.mxu0 %vm1450_vm4, %v5635_v34 }
 0x797   : > { %4054 = vmatmul.msk.bf16.gmra.mxu0 %vm1450_vm4, %v5640_v28 }
 0x804   : > { %v2305_v58 = vpop.f32.mrf.mxu0 }
 0x805   : > { %v2315_v43 = vadd.f32 1e-06, %v2305_v58 }
 0x807   : > { %4427 = vrcp.f32 %v2315_v43 }
 0x80c   : > { %v2307_v47 = vpop.f32.mrf.mxu0 }
 0x80d   : > { %v4428_v48 = vpop.eup %4427  ;;  %v2316_v42 = vadd.f32 1e-06, %v2307_v47 }
 0x80e   : > { %2327 = vrot.lane.b32.xlu2 %v4428_v48, %s6313_s23 }
 0x80f   : > { %4429 = vrcp.f32 %v2316_v42 }
 0x814   : > { %v2310_v25 = vpop.f32.mrf.mxu0 }
 0x815   : > { %v4430_v54 = vpop.eup %4429  ;;  %v2317_v9 = vadd.f32 1e-06, %v2310_v25 }
 0x816   : > { %2329 = vrot.lane.b32.xlu0 %v4430_v54, %s6313_s23 }
 0x817   : > { %4431 = vrcp.f32 %v2317_v9 }
 0x81c   : > { %v2312_v40 = vpop.f32.mrf.mxu0 }
 0x81d   : > { %v4432_v1 = vpop.eup %4431  ;;  %v2318_v2 = vadd.f32 1e-06, %v2312_v40 }
 0x81e   : > { %2331 = vrot.lane.b32.xlu1 %v4432_v1, %s6313_s23  ;;  %v5733_v1 = vld [vmem:[%s4757_s26] sm:$0xff] }
 0x81f   : > { %4433 = vrcp.f32 %v2318_v2  ;;  %v5738_v2 = vld [vmem:[%s4757_s26 + $0x8] sm:$0xff] }
 0x825   : > { %v4434_v24 = vpop.eup %4433 }
 0x826   : > { %2333 = vrot.lane.b32.xlu2 %v4434_v24, %s6313_s23  ;;  %v4555_v24 = vld [vmem:[%s4757_s26 + $0x10] sm:$0xff] }
 0x868   : > { %v2328_v18 = vpop.permute.xlu2 %2327 }
 0x869   : > { %v2339_v21 = vmul.f32 %v2328_v18, %v2305_v58  ;;  %v4556_v18 = vld [vmem:[%s4757_s26 + $0x18] sm:$0xff] }
 0x86b   : > { %2347 = vrot.lane.b32.xlu0 %v2339_v21, %s6320_s20  ;;  %v4557_v21 = vld [vmem:[%s4757_s26 + $0x20] sm:$0xff] }
 0x880   : > { %v2334_v23 = vpop.permute.xlu2 %2333 }
 0x881   : > { %v2342_v46 = vmul.f32 %v2334_v23, %v2312_v40  ;;  %v4558_v23 = vld [vmem:[%s4757_s26 + $0x28] sm:$0xff] }
 0x883   : > { %2353 = vrot.lane.b32.xlu0 %v2342_v46, %s6320_s20 }
 0x888   : > { %v2330_v10 = vpop.permute.xlu0 %2329 }
 0x889   : > { %v2340_v39 = vmul.f32 %v2330_v10, %v2307_v47 }
 0x88b   : > { %2349 = vrot.lane.b32.xlu1 %v2340_v39, %s6320_s20  ;;  %v4559_v39 = vld [vmem:[%s4791_s21] sm:$0xff] }
 0x890   : > { %v2332_v49 = vpop.permute.xlu1 %2331 }
 0x891   : > { %v2341_v52 = vmul.f32 %v2332_v49, %v2310_v25  ;;  %v4560_v49 = vld [vmem:[%s4791_s21 + $0x8] sm:$0xff] }
 0x893   : > { %2351 = vrot.lane.b32.xlu2 %v2341_v52, %s6320_s20  ;;  %v2638_v52 = vpop.f32.mrf.mxu1 }
 0x8dd   : > { %v2348_v63 = vpop.permute.xlu0 %2347 }
 0x8de   : > { %v2359_v12 = vadd.f32 %v2348_v63, %v5323_v41  ;;  %v4070_v41 = vld [vmem:[%s6290_s6 + $0x50] sm:$0xf] }
 0x8df   : > { %v4561_v63 = vld [vmem:[%s4791_s21 + $0x10] sm:$0xff] }
 0x8e0   : > { %v2363_v4 = vmax.f32 %v2359_v12, 0.0  ;;  %v2640_v12 = vpop.f32.mrf.mxu1 }
 0x8e2   : > { %2371 = vrot.lane.b32.xlu1 %v2363_v4, %s6320_s20 }
 0x8ed   : > { %v2352_v29 = vpop.permute.xlu2 %2351 }
 0x8ee   : > { %v2361_v36 = vadd.f32 %v2352_v29, %v5330_v57  ;;  %v4202_v57 = vld [vmem:[%s6290_s6 + $0x54] sm:$0xf0]  ;;  %v2643_v29 = vpop.f32.mrf.mxu1 }
 0x8ef   : > { %v4071_v11 = vor.u32 %v4202_v57, %v4070_v41 }
 0x8f0   : > { %v2365_v30 = vmax.f32 %v2361_v36, 0.0 }
 0x8f1   : > { %2459 = vmatpush.bf16.msrb.mxu0 %v4071_v11 }
 0x8f2   : > { %2375 = vrot.lane.b32.xlu0 %v2365_v30, %s6320_s20  ;;  %v4562_v30 = vld [vmem:[%s4791_s21 + $0x18] sm:$0xff] }
 0x8f5   : > { %v2354_v17 = vpop.permute.xlu0 %2353 }
 0x8f6   : > { %v2362_v8 = vadd.f32 %v2354_v17, %v5332_v19  ;;  %v4062_v19 = vld [vmem:[%s6290_s6 + $0x40] sm:$0xf] }
 0x8f8   : > { %v2366_v20 = vmax.f32 %v2362_v8, 0.0  ;;  %v2645_v8 = vpop.f32.mrf.mxu1 }
 0x8fa   : > { %2377 = vrot.lane.b32.xlu1 %v2366_v20, %s6320_s20 }
 0x8fd   : > { %v2350_v26 = vpop.permute.xlu1 %2349 }
 0x8fe   : > { %v2360_v22 = vadd.f32 %v2350_v26, %v5325_v3  ;;  %v4200_v3 = vld [vmem:[%s6290_s6 + $0x44] sm:$0xf0] }
 0x8ff   : > { %v4063_v13 = vor.u32 %v4200_v3, %v4062_v19  ;;  %v4564_v3 = vld [vmem:[%s4791_s21 + $0x28] sm:$0xff] }
 0x900   : > { %v2364_v44 = vmax.f32 %v2360_v22, 0.0  ;;  %v2648_v26 = vpop.f32.mrf.mxu1  ;;  %v4563_v22 = vld [vmem:[%s4791_s21 + $0x20] sm:$0xff] }
 0x901   : > { %2460 = vmatpush.bf16.msrb.mxu0 %v4063_v13 }
 0x902   : > { %2373 = vrot.lane.b32.xlu2 %v2364_v44, %s6320_s20 }
 0x905   : > { %2478 = vmatpush.bf16.msra.mxu0 %v4075_v55 }
 0x909   : > { %2479 = vmatpush.bf16.msra.mxu0 %v4067_v59 }
 0x954   : > { %v2372_v56 = vpop.permute.xlu1 %2371 }
 0x955   : > { %v5693_v62 = vadd.f32 %v2372_v56, %v5298_v16 }
 0x95c   : > { %v2374_v33 = vpop.permute.xlu2 %2373 }
 0x95d   : > { %v5696_v51 = vadd.f32 %v2374_v33, %v5301_v5  ;;  %v5715_v5 = vld [vmem:[%s6292_s8 + $0x8] sm:$0xf] }
 0x95e   : > { %v5761_v44 = vperm.slane %v5715_v5, 1 }
 0x95f   : > { %v2418_v38 = vpack.c.bf16 %v5696_v51, %v5693_v62 }
 0x960   : > { %v2649_v41 = vadd.f32 %v2648_v26, %v5761_v44  ;;  %v2639_v59 = vadd.f32 %v2638_v52, %v5761_v44 }
 0x961   : > { %4076 = vmatmul.msk.bf16.vlgmr.msrb.gmra.mxu0 %vm772_vm0, %v2418_v38 }
 0x964   : > { %v2376_v35 = vpop.permute.xlu0 %2375 }
 0x965   : > { %v5702_v7 = vadd.f32 %v2376_v35, %v5307_v37  ;;  %v2421_v37 = vperm.slane %v5715_v5, 0  ;;  %v2641_v35 = vadd.f32 %v2640_v12, %v5761_v44 }
 0x96c   : > { %v2378_v31 = vpop.permute.xlu1 %2377 }
 0x96d   : > { %v5705_v6 = vadd.f32 %v2378_v31, %v5310_v61  ;;  %v2425_v61 = vperm.slane %v2421_v37, 0  ;;  %v2644_v37 = vadd.f32 %v2643_v29, %v5761_v44 }
 0x96f   : > { %v2419_v16 = vpack.c.bf16 %v5705_v6, %v5702_v7 }
 0x971   : > { %4077 = vmatmul.msk.bf16.gmra.mxu0 %vm772_vm0, %v2419_v16 }
 0x981   : > { %4078 = vmatmul.msk.bf16.vlgmr.msra.gmra.mxu0 %vm772_vm0, %v2418_v38 }
 0x991   : > { %4079 = vmatmul.msk.bf16.gmra.mxu0 %vm772_vm0, %v2419_v16 }
 0x9de   : > { %v2462_v15 = vpop.f32.mrf.mxu0 }
 0x9df   : > { %v5718_v43 = vadd.f32 %v2462_v15, %v2425_v61 }
 0x9e6   : > { %v2464_v58 = vpop.f32.mrf.mxu0 }
 0x9e7   : > { %v5720_v47 = vadd.f32 %v2464_v58, %v2425_v61 }
 0x9e9   : > { %v2668_v48 = vpack.c.bf16 %v5720_v47, %v5718_v43 }
 0x9eb   : > { %2711 = vrot.lane.b32.xlu0 %v2668_v48, %s6321_s28 }
 0x9ee   : > { %v2467_v42 = vpop.f32.mrf.mxu0 }
 0x9ef   : > { %v5725_v54 = vadd.f32 %v2467_v42, %v2425_v61  ;;  %v2650_v42 = vpop.f32.mrf.mxu1 }
 0x9f6   : > { %v2469_v25 = vpop.f32.mrf.mxu0 }
 0x9f7   : > { %v5727_v9 = vadd.f32 %v2469_v25, %v2425_v61 }
 0x9f9   : > { %v2669_v40 = vpack.c.bf16 %v5727_v9, %v5725_v54 }
 0x9fb   : > { %2713 = vrot.lane.b32.xlu2 %v2669_v40, %s6321_s28  ;;  %2676 = vmatpush.bf16.msra.mxu2 %v2669_v40  ;;  %v2646_v40 = vadd.f32 %v2645_v8, %v5761_v44 }
 0x9ff   : > { %2677 = vmatpush.bf16.msra.mxu2 %v2668_v48 }
 0xa02   : > { %4098 = vmatmul.msk.bf16.vlgmr.msra.gmra.mxu2 %vm772_vm0, %v5733_v1 }
 0xa12   : > { %4099 = vmatmul.msk.bf16.gmra.mxu2 %vm772_vm0, %v5738_v2 }
 0xa22   : > { %4100 = vmatmul.msk.bf16.gmra.mxu2 %vm772_vm0, %v4555_v24 }
 0xa32   : > { %4101 = vmatmul.msk.bf16.gmra.mxu2 %vm772_vm0, %v4556_v18 }
 0xa42   : > { %4102 = vmatmul.msk.bf16.gmra.mxu2 %vm772_vm0, %v4557_v21 }
 0xa52   : > { %4103 = vmatmul.msk.bf16.gmra.mxu2 %vm772_vm0, %v4558_v23 }
 0xa55   : > { %v2714_v46 = vpop.permute.xlu2 %2713 }
 0xa56   : > { %2723 = vmatpush.bf16.msra.mxu3 %v2714_v46 }
 0xa5d   : > { %v2712_v10 = vpop.permute.xlu0 %2711 }
 0xa5e   : > { %2724 = vmatpush.bf16.msra.mxu3 %v2712_v10 }
 0xa61   : > { %4104 = vmatmul.msk.bf16.vlgmr.msra.gmra.mxu3 %vm772_vm0, %v4559_v39  ;;  %v2653_v39 = vpop.f32.mrf.mxu1 }
 0xa71   : > { %4105 = vmatmul.msk.bf16.gmra.mxu3 %vm772_vm0, %v4560_v49 }
 0xa81   : > { %4106 = vmatmul.msk.bf16.gmra.mxu3 %vm772_vm0, %v4561_v63 }
 0xa85   : > { %v2679_v4 = vpop.f32.mrf.mxu2 }
 0xa86   : > { %v2756_v56 = vadd.f32 %v2679_v4, %v2639_v59 }
 0xa8d   : > { %v2681_v36 = vpop.f32.mrf.mxu2 }
 0xa8e   : > { %v2757_v31 = vadd.f32 %v2681_v36, %v2641_v35 }
 0xa91   : > { %4107 = vmatmul.msk.bf16.gmra.mxu3 %vm772_vm0, %v4562_v30 }
 0xa95   : > { %v2684_v17 = vpop.f32.mrf.mxu2 }
 0xa96   : > { %v2758_v61 = vadd.f32 %v2684_v17, %v2644_v37 }
 0xa9d   : > { %v2686_v20 = vpop.f32.mrf.mxu2 }
 0xa9e   : > { %v2759_v24 = vadd.f32 %v2686_v20, %v2646_v40 }
 0xaa1   : > { %4108 = vmatmul.msk.bf16.gmra.mxu3 %vm772_vm0, %v4563_v22 }
 0xaa5   : > { %v2689_v57 = vpop.f32.mrf.mxu2 }
 0xaa6   : > { %v2760_v11 = vadd.f32 %v2689_v57, %v2649_v41 }
 0xaad   : > { %v2691_v19 = vpop.f32.mrf.mxu2 }
 0xab1   : > { %4109 = vmatmul.msk.bf16.gmra.mxu3 %vm772_vm0, %v4564_v3 }
 0xab5   : > { %v5766_v13 = vpop.f32.mrf.mxu2 }
 0xab6   : > { %3032 = vrot.lane.b32.xlu1 %v5766_v13, %s6313_s23 }
 0xabd   : > { %v5770_v50 = vpop.f32.mrf.mxu2 }
 0xabe   : > { %3034 = vrot.lane.b32.xlu2 %v5770_v50, %s6313_s23 }
 0xac5   : > { %v5774_v53 = vpop.f32.mrf.mxu2 }
 0xac6   : > { %3036 = vrot.lane.b32.xlu1 %v5774_v53, %s6313_s23 }
 0xacd   : > { %v5778_v45 = vpop.f32.mrf.mxu2 }
 0xace   : > { %3038 = vrot.lane.b32.xlu2 %v5778_v45, %s6313_s23 }
 0xad5   : > { %v5782_v55 = vpop.f32.mrf.mxu2 }
 0xad6   : > { %3040 = vrot.lane.b32.xlu1 %v5782_v55, %s6313_s23 }
 0xadd   : > { %v5786_v0 = vpop.f32.mrf.mxu2 }
 0xade   : > { %3028 = vrot.lane.b32.xlu1 %v2689_v57, %s6313_s23  ;;  %3042 = vrot.lane.b32.xlu2 %v5786_v0, %s6313_s23 }
 0xae4   : > { %v2726_v33 = vpop.f32.mrf.mxu3 }
 0xae5   : > { %v5792_v38 = vadd.f32 %v2756_v56, %v2726_v33  ;;  %v2654_v56 = vadd.f32 %v2653_v39, %v5761_v44 }
 0xae6   : > { %3024 = vrot.lane.b32.xlu1 %v2684_v17, %s6313_s23  ;;  %3030 = vrot.lane.b32.xlu2 %v2691_v19, %s6313_s23  ;;  %v2655_v17 = vpop.f32.mrf.mxu1 }
 0xae7   : > { %v2762_v35 = vadd.f32 %v5766_v13, %v2654_v56 }
 0xaec   : > { %v2728_v16 = vpop.f32.mrf.mxu3 }
 0xaed   : > { %v5797_v15 = vadd.f32 %v2757_v31, %v2728_v16 }
 0xaee   : > { %3020 = vrot.lane.b32.xlu1 %v2679_v4, %s6313_s23  ;;  %3026 = vrot.lane.b32.xlu2 %v2686_v20, %s6313_s23 }
 0xaf4   : > { %v2731_v58 = vpop.f32.mrf.mxu3 }
 0xaf5   : > { %v2770_v48 = vadd.f32 %v2758_v61, %v2731_v58  ;;  %v2658_v61 = vpop.f32.mrf.mxu1 }
 0xaf6   : > { %3022 = vrot.lane.b32.xlu2 %v2681_v36, %s6313_s23  ;;  %v2651_v36 = vadd.f32 %v2650_v42, %v5761_v44 }
 0xaf7   : > { %v4112_v25 = vmul.f32 -1.442695, %v2770_v48 }
 0xaf8   : > { %v2761_v8 = vadd.f32 %v2691_v19, %v2651_v36 }
 0xaf9   : > { %4435 = vpow2.f32 %v4112_v25 }
 0xafc   : > { %v2733_v18 = vpop.f32.mrf.mxu3 }
 0xafd   : > { %v2771_v21 = vadd.f32 %v2759_v24, %v2733_v18 }
 0xaff   : > { %v4436_v23 = vpop.eup %4435  ;;  %v4113_v46 = vmul.f32 -1.442695, %v2771_v21 }
 0xb00   : > { %v2818_v10 = vadd.f32 1.0, %v4436_v23 }
 0xb01   : > { %4437 = vpow2.f32 %v4113_v46  ;;  %v2656_v46 = vadd.f32 %v2655_v17, %v5761_v44 }
 0xb02   : > { %4439 = vrcp.f32 %v2818_v10  ;;  %v2869_v37 = vand.u32 2147483648, %v2818_v10  ;;  %vm2863_vm13 = vweird.f32 %v2818_v10  ;;  %v2867_v40 = vand.u32 2147483647, %v2818_v10 }
 0xb04   : > { %v2736_v49 = vpop.f32.mrf.mxu3  ;;  %vm2868_vm3 = vcmp.eq.f32.partialorder %v2867_v40, 8.507059e+37 }
 0xb05   : > { %v2772_v52 = vadd.f32 %v2760_v11, %v2736_v49 }
 0xb07   : > { %v4438_v63 = vpop.eup %4437  ;;  %v4114_v12 = vmul.f32 -1.442695, %v2772_v52  ;;  %v2870_v52 = vor.u32 1.1754944e-38, %v2869_v37 }
 0xb08   : > { %v4440_v4 = vpop.eup %4439  ;;  %v2819_v29 = vadd.f32 1.0, %v4438_v63 }
 0xb09   : > { %4441 = vpow2.f32 %v4114_v12  ;;  %v2859_v30 = vmul.f32 %v4440_v4, %v2818_v10  ;;  %vm2864_vm11 = vweird.f32 %v4440_v4 }
 0xb0a   : > { %4443 = vrcp.f32 %v2819_v29  ;;  %v2884_v42 = vand.u32 2147483648, %v2819_v29  ;;  %v2882_v25 = vand.u32 2147483647, %v2819_v29  ;;  %vm2878_vm14 = vweird.f32 %v2819_v29  ;;  %vm5810_vm15 = vmor %vm2863_vm13, %vm2864_vm11 }
 0xb0b   : > { %v2860_v26 = vsub.f32 1.0, %v2859_v30 }
 0xb0c   : > { %v2738_v20 = vpop.f32.mrf.mxu3  ;;  %v2885_v63 = vor.u32 1.1754944e-38, %v2884_v42  ;;  %vm2883_vm2 = vcmp.eq.f32.partialorder %v2882_v25, 8.507059e+37 }
 0xb0d   : > { %v2773_v22 = vadd.f32 %v2761_v8, %v2738_v20  ;;  %v2861_v11 = vmul.f32 %v4440_v4, %v2860_v26 }
 0xb0f   : > { %v4442_v41 = vpop.eup %4441  ;;  %v4115_v57 = vmul.f32 -1.442695, %v2773_v22  ;;  %v2862_v19 = vadd.f32 %v4440_v4, %v2861_v11  ;;  %v2660_v22 = vpop.f32.mrf.mxu1 }
 0xb10   : > { %v4444_v3 = vpop.eup %4443  ;;  %v5805_v59 = vadd.f32 1.0, %v4442_v41 }
 0xb11   : > { %4445 = vpow2.f32 %v4115_v57  ;;  %v2874_v33 = vmul.f32 %v4444_v3, %v2819_v29  ;;  %vm2879_vm12 = vweird.f32 %v4444_v3  ;;  %v2866_v49 = vsel %vm5810_vm15, %v4440_v4, %v2862_v19 }
 0xb12   : > { %4447 = vrcp.f32 %v5805_v59  ;;  %vm2880_vm1 = vmor %vm2878_vm14, %vm2879_vm12  ;;  %v2763_v29 = vadd.f32 %v5770_v50, %v2656_v46  ;;  %v5824_v30 = vsel %vm2868_vm3, %v2870_v52, %v2866_v49  ;;  %v2659_v50 = vadd.f32 %v2658_v61, %v5761_v44 }
 0xb13   : > { %v2875_v31 = vsub.f32 1.0, %v2874_v33  ;;  %v2899_v19 = vand.u32 2147483648, %v5805_v59  ;;  %vm2893_vm7 = vweird.f32 %v5805_v59  ;;  %v2897_v61 = vand.u32 2147483647, %v5805_v59 }
 0xb14   : > { %v2741_v16 = vpop.f32.mrf.mxu3  ;;  %v2764_v33 = vadd.f32 %v5774_v53, %v2659_v50 }
 0xb15   : > { %v2774_v58 = vadd.f32 %v2762_v35, %v2741_v16  ;;  %v2876_v48 = vmul.f32 %v4444_v3, %v2875_v31  ;;  %v2900_v49 = vor.u32 1.1754944e-38, %v2899_v19  ;;  %vm2898_vm12 = vcmp.eq.f32.partialorder %v2897_v61, 8.507059e+37 }
 0xb17   : > { %v4446_v24 = vpop.eup %4445  ;;  %v4116_v18 = vmul.f32 -1.442695, %v2774_v58  ;;  %v2877_v21 = vadd.f32 %v4444_v3, %v2876_v48 }
 0xb18   : > { %v5814_v13 = vpop.eup %4447  ;;  %v2821_v39 = vadd.f32 1.0, %v4446_v24 }
 0xb19   : > { %4449 = vpow2.f32 %v4116_v18  ;;  %v2881_v10 = vsel %vm2880_vm1, %v4444_v3, %v2877_v21  ;;  %v2889_v12 = vmul.f32 %v5814_v13, %v5805_v59  ;;  %vm2894_vm5 = vweird.f32 %v5814_v13  ;;  %v2663_v59 = vpop.f32.mrf.mxu1 }
 0xb1a   : > { %4451 = vrcp.f32 %v2821_v39  ;;  %v5822_v36 = vsel %vm2883_vm2, %v2885_v63, %v2881_v10  ;;  %v2914_v48 = vand.u32 2147483648, %v2821_v39  ;;  %v2912_v42 = vand.u32 2147483647, %v2821_v39  ;;  %vm5839_vm9 = vmor %vm2893_vm7, %vm2894_vm5 }
 0xb1b   : > { %v2890_v8 = vsub.f32 1.0, %v2889_v12  ;;  %v4313_v4 = vpack.i.bf16 %v5822_v36, %v5824_v30  ;;  %vm2908_vm8 = vweird.f32 %v2821_v39  ;;  %v2661_v21 = vadd.f32 %v2660_v22, %v5761_v44 }
 0xb1c   : > { %v2743_v17 = vpop.f32.mrf.mxu3  ;;  %v2915_v10 = vor.u32 1.1754944e-38, %v2914_v48  ;;  %vm2913_vm11 = vcmp.eq.f32.partialorder %v2912_v42, 8.507059e+37  ;;  %v2664_v50 = vadd.f32 %v2663_v59, %v5761_v44 }
 0xb1d   : > { %v2775_v20 = vadd.f32 %v2763_v29, %v2743_v17  ;;  %v2891_v11 = vmul.f32 %v5814_v13, %v2890_v8  ;;  %v2765_v63 = vadd.f32 %v5778_v45, %v2661_v21 }
 0xb1f   : > { %v4450_v26 = vpop.eup %4449  ;;  %v4117_v41 = vmul.f32 -1.442695, %v2775_v20  ;;  %v2892_v16 = vadd.f32 %v5814_v13, %v2891_v11 }
 0xb20   : > { %v4452_v57 = vpop.eup %4451  ;;  %v5828_v3 = vadd.f32 1.0, %v4450_v26 }
 0xb21   : > { %4453 = vpow2.f32 %v4117_v41  ;;  %v2904_v56 = vmul.f32 %v4452_v57, %v2821_v39  ;;  %vm2909_vm6 = vweird.f32 %v4452_v57  ;;  %v2896_v46 = vsel %vm5839_vm9, %v5814_v13, %v2892_v16 }
 0xb22   : > { %4455 = vrcp.f32 %v5828_v3  ;;  %vm2910_vm10 = vmor %vm2908_vm8, %vm2909_vm6  ;;  %v5854_v17 = vsel %vm2898_vm12, %v2900_v49, %v2896_v46  ;;  %vm2923_vm14 = vweird.f32 %v5828_v3  ;;  %v2927_v19 = vand.u32 2147483647, %v5828_v3 }
 0xb23   : > { %v2905_v35 = vsub.f32 1.0, %v2904_v56  ;;  %v2665_v56 = vpop.f32.mrf.mxu1 }
 0xb24   : > { %v2746_v31 = vpop.f32.mrf.mxu3  ;;  %vm2928_vm5 = vcmp.eq.f32.partialorder %v2927_v19, 8.507059e+37 }
 0xb25   : > { %v2776_v37 = vadd.f32 %v2764_v33, %v2746_v31  ;;  %v2906_v58 = vmul.f32 %v4452_v57, %v2905_v35  ;;  %v2766_v33 = vadd.f32 %v5782_v55, %v2664_v50 }
 0xb27   : > { %v4454_v25 = vpop.eup %4453  ;;  %v4118_v40 = vmul.f32 -1.442695, %v2776_v37  ;;  %v2907_v53 = vadd.f32 %v4452_v57, %v2906_v58  ;;  %v2929_v37 = vand.u32 2147483648, %v5828_v3 }
 0xb28   : > { %v5843_v18 = vpop.eup %4455  ;;  %v2823_v23 = vadd.f32 1.0, %v4454_v25  ;;  %v2666_v25 = vadd.f32 %v2665_v56, %v5761_v44 }
 0xb29   : > { %4457 = vpow2.f32 %v4118_v40  ;;  %v2919_v39 = vmul.f32 %v5843_v18, %v5828_v3  ;;  %v2911_v52 = vsel %vm2910_vm10, %v4452_v57, %v2907_v53  ;;  %vm2924_vm13 = vweird.f32 %v5843_v18 }
 0xb2a   : > { %4459 = vrcp.f32 %v2823_v23  ;;  %v5852_v29 = vsel %vm2913_vm11, %v2915_v10, %v2911_v52  ;;  %v2944_v16 = vand.u32 2147483648, %v2823_v23  ;;  %v2942_v42 = vand.u32 2147483647, %v2823_v23  ;;  %vm5870_vm1 = vmor %vm2923_vm14, %vm2924_vm13 }
 0xb2b   : > { %v2920_v12 = vsub.f32 1.0, %v2919_v39  ;;  %v4308_v13 = vpack.i.bf16 %v5852_v29, %v5854_v17  ;;  %vm2938_vm2 = vweird.f32 %v2823_v23  ;;  %v2930_v59 = vor.u32 1.1754944e-38, %v2929_v37 }
 0xb2c   : > { %v2748_v8 = vpop.f32.mrf.mxu3  ;;  %v2945_v46 = vor.u32 1.1754944e-38, %v2944_v16  ;;  %vm2943_vm6 = vcmp.eq.f32.partialorder %v2942_v42, 8.507059e+37  ;;  %v2767_v10 = vadd.f32 %v5786_v0, %v2666_v25  ;;  %v4111_v0 = vmul.f32 -1.442695, %v5797_v15 }
 0xb2d   : > { %v2777_v20 = vadd.f32 %v2765_v63, %v2748_v8  ;;  %v2921_v41 = vmul.f32 %v5843_v18, %v2920_v12 }
 0xb2f   : > { %v4458_v26 = vpop.eup %4457  ;;  %v4119_v22 = vmul.f32 -1.442695, %v2777_v20  ;;  %v2922_v31 = vadd.f32 %v5843_v18, %v2921_v41 }
 0xb30   : > { %v4460_v57 = vpop.eup %4459  ;;  %v5859_v11 = vadd.f32 1.0, %v4458_v26 }
 0xb31   : > { %v2934_v45 = vmul.f32 %v4460_v57, %v2823_v23  ;;  %4461 = vpow2.f32 %v4119_v22  ;;  %vm2939_vm15 = vweird.f32 %v4460_v57  ;;  %v2926_v24 = vsel %vm5870_vm1, %v5843_v18, %v2922_v31 }
 0xb32   : > { %4463 = vrcp.f32 %v5859_v11  ;;  %vm2940_vm3 = vmor %vm2938_vm2, %vm2939_vm15  ;;  %v5880_v23 = vsel %vm2928_vm5, %v2930_v59, %v2926_v24  ;;  %vm2953_vm8 = vweird.f32 %v5859_v11  ;;  %v2959_v31 = vand.u32 2147483648, %v5859_v11 }
 0xb33   : > { %v2935_v35 = vsub.f32 1.0, %v2934_v45  ;;  %v2957_v37 = vand.u32 2147483647, %v5859_v11 }
 0xb34   : > { %v2751_v58 = vpop.f32.mrf.mxu3  ;;  %v2960_v55 = vor.u32 1.1754944e-38, %v2959_v31 }
 0xb35   : > { %v2936_v48 = vmul.f32 %v4460_v57, %v2935_v35  ;;  %v2778_v61 = vadd.f32 %v2766_v33, %v2751_v58  ;;  %v4110_v33 = vmul.f32 -1.442695, %v5792_v38  ;;  %vm2958_vm14 = vcmp.eq.f32.partialorder %v2957_v37, 8.507059e+37 }
 0xb37   : > { %v4462_v40 = vpop.eup %4461  ;;  %v2937_v53 = vadd.f32 %v4460_v57, %v2936_v48  ;;  %v4120_v21 = vmul.f32 -1.442695, %v2778_v61 }
 0xb38   : > { %v4464_v3 = vpop.eup %4463  ;;  %v2825_v49 = vadd.f32 1.0, %v4462_v40 }
 0xb39   : > { %v2941_v39 = vsel %vm2940_vm3, %v4460_v57, %v2937_v53  ;;  %4465 = vpow2.f32 %v4120_v21  ;;  %v2949_v44 = vmul.f32 %v4464_v3, %v5859_v11  ;;  %vm2954_vm7 = vweird.f32 %v4464_v3 }
 0xb3a   : > { %v5878_v52 = vsel %vm2943_vm6, %v2945_v46, %v2941_v39  ;;  %4467 = vrcp.f32 %v2825_v49  ;;  %v2974_v35 = vand.u32 2147483648, %v2825_v49  ;;  %v2972_v19 = vand.u32 2147483647, %v2825_v49  ;;  %vm5894_vm10 = vmor %vm2953_vm8, %vm2954_vm7 }
 0xb3b   : > { %v4293_v18 = vpack.i.bf16 %v5878_v52, %v5880_v23  ;;  %v2950_v63 = vsub.f32 1.0, %v2949_v44  ;;  %vm2968_vm11 = vweird.f32 %v2825_v49 }
 0xb3c   : > { %v2753_v12 = vpop.f32.mrf.mxu3  ;;  %v2975_v61 = vor.u32 1.1754944e-38, %v2974_v35  ;;  %vm2973_vm13 = vcmp.eq.f32.partialorder %v2972_v19, 8.507059e+37 }
 0xb3d   : > { %v2779_v8 = vadd.f32 %v2767_v10, %v2753_v12  ;;  %4294 = vrot.lane.b32.xlu0 %v4293_v18, %s6321_s28  ;;  %v2951_v22 = vmul.f32 %v4464_v3, %v2950_v63 }
 0xb3f   : > { %v4466_v20 = vpop.eup %4465  ;;  %v4121_v26 = vmul.f32 -1.442695, %v2779_v8  ;;  %v2952_v56 = vadd.f32 %v4464_v3, %v2951_v22 }
 0xb40   : > { %v4468_v41 = vpop.eup %4467  ;;  %v5886_v57 = vadd.f32 1.0, %v4466_v20 }
 0xb41   : > { %v2964_v50 = vmul.f32 %v4468_v41, %v2825_v49  ;;  %4469 = vpow2.f32 %v4121_v26  ;;  %vm2969_vm9 = vweird.f32 %v4468_v41  ;;  %v2956_v38 = vsel %vm5894_vm10, %v4464_v3, %v2952_v56 }
 0xb42   : > { %4471 = vrcp.f32 %v5886_v57  ;;  %vm2970_vm12 = vmor %vm2968_vm11, %vm2969_vm9  ;;  %v5903_v24 = vsel %vm2958_vm14, %v2960_v55, %v2956_v38  ;;  %vm2983_vm1 = vweird.f32 %v5886_v57  ;;  %v2989_v8 = vand.u32 2147483648, %v5886_v57 }
 0xb43   : > { %v2965_v45 = vsub.f32 1.0, %v2964_v50  ;;  %4473 = vpow2.f32 %v4111_v0  ;;  %v2987_v26 = vand.u32 2147483647, %v5886_v57 }
 0xb44   : > { %4475 = vpow2.f32 %v4110_v33 }
 0xb45   : > { %v2966_v16 = vmul.f32 %v4468_v41, %v2965_v45  ;;  %v2990_v45 = vor.u32 1.1754944e-38, %v2989_v8  ;;  %vm2988_vm7 = vcmp.eq.f32.partialorder %v2987_v26, 8.507059e+37 }
 0xb47   : > { %v4470_v15 = vpop.eup %4469  ;;  %v2967_v48 = vadd.f32 %v4468_v41, %v2966_v16 }
 0xb48   : > { %v4472_v42 = vpop.eup %4471  ;;  %v2827_v25 = vadd.f32 1.0, %v4470_v15 }
 0xb49   : > { %v2971_v40 = vsel %vm2970_vm12, %v4468_v41, %v2967_v48  ;;  %v2979_v11 = vmul.f32 %v4472_v42, %v5886_v57  ;;  %v4474_v46 = vpop.eup %4473  ;;  %vm2984_vm15 = vweird.f32 %v4472_v42 }
 0xb4a   : > { %v5901_v53 = vsel %vm2973_vm13, %v2975_v61, %v2971_v40  ;;  %4477 = vrcp.f32 %v2827_v25  ;;  %v4476_v49 = vpop.eup %4475  ;;  %v2817_v44 = vadd.f32 1.0, %v4474_v46  ;;  %v3004_v20 = vand.u32 2147483648, %v2827_v25  ;;  %vm2985_vm3 = vmor %vm2983_vm1, %vm2984_vm15 }
 0xb4b   : > { %v4298_v21 = vpack.i.bf16 %v5901_v53, %v5903_v24  ;;  %v2980_v3 = vsub.f32 1.0, %v2979_v11  ;;  %v2816_v18 = vadd.f32 1.0, %v4476_v49  ;;  %v3002_v41 = vand.u32 2147483647, %v2827_v25 }
 0xb4c   : > { %4479 = vrcp.f32 %v2817_v44  ;;  %vm2998_vm5 = vweird.f32 %v2827_v25  ;;  %v3005_v56 = vor.u32 1.1754944e-38, %v3004_v20  ;;  %vm2848_vm10 = vweird.f32 %v2817_v44 }
 0xb4d   : > { %4299 = vrot.lane.b32.xlu0 %v4298_v21, %s6321_s28  ;;  %v2981_v59 = vmul.f32 %v4472_v42, %v2980_v3  ;;  %4481 = vrcp.f32 %v2816_v18  ;;  %vm3003_vm8 = vcmp.eq.f32.partialorder %v3002_v41, 8.507059e+37  ;;  %v2852_v55 = vand.u32 2147483647, %v2817_v44 }
 0xb4e   : > { %v2839_v11 = vand.u32 2147483648, %v2816_v18  ;;  %vm2833_vm13 = vweird.f32 %v2816_v18  ;;  %v2837_v3 = vand.u32 2147483647, %v2816_v18 }
 0xb4f   : > { %v2982_v63 = vadd.f32 %v4472_v42, %v2981_v59  ;;  %vm2853_vm15 = vcmp.eq.f32.partialorder %v2852_v55, 8.507059e+37 }
 0xb50   : > { %v4478_v39 = vpop.eup %4477  ;;  %v2840_v59 = vor.u32 1.1754944e-38, %v2839_v11  ;;  %vm2838_vm1 = vcmp.eq.f32.partialorder %v2837_v3, 8.507059e+37 }
 0xb51   : > { %v2994_v10 = vmul.f32 %v4478_v39, %v2827_v25  ;;  %vm2999_vm2 = vweird.f32 %v4478_v39  ;;  %v2986_v50 = vsel %vm2985_vm3, %v4472_v42, %v2982_v63  ;;  %v2854_v25 = vand.u32 2147483648, %v2817_v44 }
 0xb52   : > { %vm3000_vm6 = vmor %vm2998_vm5, %vm2999_vm2  ;;  %v4480_v35 = vpop.eup %4479  ;;  %v2991_v31 = vsel %vm2988_vm7, %v2990_v45, %v2986_v50  ;;  %vm1652_vm2 = vcmask 64512  }
 0xb53   : > { %v2995_v12 = vsub.f32 1.0, %v2994_v10  ;;  %v4482_v37 = vpop.eup %4481  ;;  %v2844_v57 = vmul.f32 %v4480_v35, %v2817_v44  ;;  %vm2849_vm9 = vweird.f32 %v4480_v35  ;;  %v2855_v46 = vor.u32 1.1754944e-38, %v2854_v25  ;;  %v3033_v10 = vpop.permute.xlu1 %3032 }
 0xb54   : > { %v2829_v58 = vmul.f32 %v4482_v37, %v2816_v18  ;;  %vm2834_vm11 = vweird.f32 %v4482_v37  ;;  %vm2850_vm12 = vmor %vm2848_vm10, %vm2849_vm9  ;;  %v3035_v18 = vpop.permute.xlu2 %3034 }
 0xb55   : > { %v2996_v22 = vmul.f32 %v4478_v39, %v2995_v12  ;;  %v2845_v15 = vsub.f32 1.0, %v2844_v57  ;;  %vm2835_vm14 = vmor %vm2833_vm13, %vm2834_vm11  ;;  %v3063_v12 = vmul.f32 %v3035_v18, %v5878_v52 }
 0xb56   : > { %v2830_v48 = vsub.f32 1.0, %v2829_v58 }
 0xb57   : > { %v2997_v0 = vadd.f32 %v4478_v39, %v2996_v22  ;;  %v2846_v38 = vmul.f32 %v4480_v35, %v2845_v15 }
 0xb58   : > { %v2831_v42 = vmul.f32 %v4482_v37, %v2830_v48 }
 0xb59   : > { %v3001_v33 = vsel %vm3000_vm6, %v4478_v39, %v2997_v0  ;;  %v2847_v61 = vadd.f32 %v4480_v35, %v2846_v38 }
 0xb5a   : > { %v3006_v16 = vsel %vm3003_vm8, %v3005_v56, %v3001_v33  ;;  %v2832_v40 = vadd.f32 %v4482_v37, %v2831_v42 }
 0xb5b   : > { %v4303_v19 = vpack.i.bf16 %v3006_v16, %v2991_v31  ;;  %v2851_v21 = vsel %vm2850_vm12, %v4480_v35, %v2847_v61  ;;  %v3037_v0 = vpop.permute.xlu1 %3036 }
 0xb5c   : > { %v5920_v49 = vsel %vm2853_vm15, %v2855_v46, %v2851_v21  ;;  %v3039_v50 = vpop.permute.xlu2 %3038  ;;  %v3064_v33 = vmul.f32 %v3037_v0, %v5903_v24 }
 0xb5d   : > { %4304 = vrot.lane.b32.xlu0 %v4303_v19, %s6321_s28  ;;  %v3065_v56 = vmul.f32 %v3039_v50, %v5901_v53 }
 0xb63   : > { %v3041_v58 = vpop.permute.xlu1 %3040 }
 0xb64   : > { %v3043_v57 = vpop.permute.xlu2 %3042  ;;  %v3066_v48 = vmul.f32 %v3041_v58, %v2991_v31 }
 0xb65   : > { %4309 = vrot.lane.b32.xlu0 %v4308_v13, %s6321_s28  ;;  %v2836_v13 = vsel %vm2835_vm14, %v4482_v37, %v2832_v40  ;;  %v3067_v38 = vmul.f32 %v3043_v57, %v3006_v16 }
 0xb66   : > { %v2841_v39 = vsel %vm2838_vm1, %v2840_v59, %v2836_v13 }
 0xb67   : > { %v4318_v44 = vpack.i.bf16 %v5920_v49, %v2841_v39 }
 0xb6b   : > { %v3029_v55 = vpop.permute.xlu1 %3028 }
 0xb6c   : > { %v3031_v25 = vpop.permute.xlu2 %3030  ;;  %v3060_v3 = vmul.f32 %v3029_v55, %v5854_v17 }
 0xb6d   : > { %4314 = vrot.lane.b32.xlu0 %v4313_v4, %s6321_s28  ;;  %v3062_v4 = vmul.f32 %v3033_v10, %v5880_v23  ;;  %v3061_v21 = vmul.f32 %v3031_v25, %v5852_v29 }
 0xb74   : > { %v3027_v59 = vpop.permute.xlu2 %3026 }
 0xb75   : > { %4319 = vrot.lane.b32.xlu0 %v4318_v44, %s6321_s28  ;;  %v3025_v44 = vpop.permute.xlu1 %3024 }
 0xbaf   : > { %v4295_v63 = vpop.permute.xlu0 %4294 }
 0xbb0   : > { %v4297_v8 = vunpack.i.h.bf16 %v4295_v63  ;;  %v4296_v20 = vunpack.i.l.bf16 %v4295_v63  ;;  %v3059_v63 = vmul.f32 %v3027_v59, %v5822_v36 }
 0xbb2   : > { %v3122_v26 = vsel %vm772_vm0, %v3062_v4, %v4296_v20  ;;  %v3123_v22 = vsel %vm772_vm0, %v3063_v12, %v4297_v8  ;;  %v3058_v12 = vmul.f32 %v3025_v44, %v5824_v30 }
 0xbb3   : > { %v3131_v41 = vpack.c.bf16 %v3123_v22, %v3122_v26  ;;  %v3023_v26 = vpop.permute.xlu2 %3022  ;;  %v3021_v22 = vpop.permute.xlu1 %3020 }
 0xbb4   : > { %v3057_v0 = vmul.f32 %v3023_v26, %v5920_v49 }
 0xbbf   : > { %v4300_v45 = vpop.permute.xlu0 %4299 }
 0xbc0   : > { %v4302_v35 = vunpack.i.h.bf16 %v4300_v45  ;;  %v4301_v19 = vunpack.i.l.bf16 %v4300_v45 }
 0xbc2   : > { %v3124_v52 = vsel %vm772_vm0, %v3064_v33, %v4301_v19  ;;  %v3125_v23 = vsel %vm772_vm0, %v3065_v56, %v4302_v35  ;;  %v5949_v35 = vpop.f32.mrf.mxu0 }
 0xbc3   : > { %v3132_v37 = vpack.c.bf16 %v3125_v23, %v3124_v52 }
 0xbca   : > { %v5951_v19 = vpop.f32.mrf.mxu0 }
 0xbcf   : > { %v4305_v15 = vpop.permute.xlu0 %4304 }
 0xbd0   : > { %v4307_v42 = vunpack.i.h.bf16 %v4305_v15  ;;  %v4306_v61 = vunpack.i.l.bf16 %v4305_v15 }
 0xbd2   : > { %v3126_v53 = vsel %vm772_vm0, %v3066_v48, %v4306_v61  ;;  %v3127_v24 = vsel %vm772_vm0, %v3067_v38, %v4307_v42  ;;  %v5953_v49 = vpop.f32.mrf.mxu0 }
 0xbd3   : > { %v3133_v40 = vpack.c.bf16 %v3127_v24, %v3126_v53 }
 0xbd5   : > { %3136 = vmatpush.bf16.msrb.mxu0 %v3133_v40 }
 0xbd7   : > { %v4310_v11 = vpop.permute.xlu0 %4309 }
 0xbd8   : > { %v4312_v46 = vunpack.i.h.bf16 %v4310_v11  ;;  %v4311_v13 = vunpack.i.l.bf16 %v4310_v11 }
 0xbd9   : > { %3137 = vmatpush.bf16.msrb.mxu0 %v3132_v37 }
 0xbda   : > { %v3120_v31 = vsel %vm772_vm0, %v3060_v3, %v4311_v13  ;;  %v3121_v16 = vsel %vm772_vm0, %v3061_v21, %v4312_v46 }
 0xbdb   : > { %v3130_v10 = vpack.c.bf16 %v3121_v16, %v3120_v31 }
 0xbdd   : > { %3138 = vmatpush.bf16.msrb.mxu0 %v3131_v41  ;;  %v3056_v41 = vmul.f32 %v3021_v22, %v2841_v39  ;;  %v5955_v39 = vpop.f32.mrf.mxu0 }
 0xbdf   : > { %v4315_v18 = vpop.permute.xlu0 %4314 }
 0xbe0   : > { %v4317_v4 = vunpack.i.h.bf16 %v4315_v18  ;;  %v4316_v29 = vunpack.i.l.bf16 %v4315_v18 }
 0xbe1   : > { %3139 = vmatpush.bf16.msrb.mxu0 %v3130_v10 }
 0xbe2   : > { %v3118_v17 = vsel %vm772_vm0, %v3058_v12, %v4316_v29  ;;  %v3119_v8 = vsel %vm772_vm0, %v3059_v63, %v4317_v4 }
 0xbe3   : > { %v3129_v20 = vpack.c.bf16 %v3119_v8, %v3118_v17 }
 0xbe5   : > { %3140 = vmatpush.bf16.msrb.mxu0 %v3129_v20 }
 0xbe7   : > { %v4320_v50 = vpop.permute.xlu0 %4319 }
 0xbe8   : > { %v4322_v45 = vunpack.i.h.bf16 %v4320_v50  ;;  %v4321_v56 = vunpack.i.l.bf16 %v4320_v50 }
 0xbea   : > { %v3116_v36 = vsel %vm772_vm0, %v3056_v41, %v4321_v56  ;;  %v3117_v30 = vsel %vm772_vm0, %v3057_v0, %v4322_v45 }
 0xbeb   : > { %v3128_v33 = vpack.c.bf16 %v3117_v30, %v3116_v36 }
 0xbed   : > { %3141 = vmatpush.bf16.msrb.mxu0 %v3128_v33 }
 0xbf0   : > { %4122 = vmatmul.msk.bf16.vlgmr.msrb.gmra.mxu0 %vm1450_vm4, %v5635_v34 }
 0xc00   : > { %4123 = vmatmul.msk.bf16.gmra.mxu0 %vm1450_vm4, %v5640_v28  ;;  %vm3277_vm4 = vcmask 589312  }
 0xc6d   : > { %v3143_v52 = vpop.f32.mrf.mxu0 }
 0xc6e   : > { %v3153_v23 = vadd.f32 1e-06, %v3143_v52 }
 0xc70   : > { %4483 = vrcp.f32 %v3153_v23 }
 0xc75   : > { %v3145_v37 = vpop.f32.mrf.mxu0 }
 0xc76   : > { %v4484_v57 = vpop.eup %4483  ;;  %v3154_v58 = vadd.f32 1e-06, %v3145_v37 }
 0xc77   : > { %3165 = vrot.lane.b32.xlu1 %v4484_v57, %s6313_s23 }
 0xc78   : > { %4485 = vrcp.f32 %v3154_v58  ;;  %v4565_v58 = vld [vmem:[%s6292_s8 + $0x4] sm:$0xf] }
 0xc7d   : > { %v3148_v34 = vpop.f32.mrf.mxu0 }
 0xc7e   : > { %v4486_v15 = vpop.eup %4485  ;;  %v3155_v28 = vadd.f32 1e-06, %v3148_v34 }
 0xc7f   : > { %3167 = vrot.lane.b32.xlu2 %v4486_v15, %s6313_s23 }
 0xc80   : > { %4487 = vrcp.f32 %v3155_v28 }
 0xc85   : > { %v3150_v48 = vpop.f32.mrf.mxu0 }
 0xc86   : > { %v4488_v38 = vpop.eup %4487  ;;  %v3156_v42 = vadd.f32 1e-06, %v3150_v48 }
 0xc87   : > { %3169 = vrot.lane.b32.xlu0 %v4488_v38, %s6313_s23 }
 0xc88   : > { %4489 = vrcp.f32 %v3156_v42 }
 0xc8e   : > { %v4490_v61 = vpop.eup %4489 }
 0xc8f   : > { %3171 = vrot.lane.b32.xlu1 %v4490_v61, %s6313_s23 }
 0xcd9   : > { %v3168_v25 = vpop.permute.xlu2 %3167 }
 0xcda   : > { %v3178_v55 = vmul.f32 %v3168_v25, %v3145_v37 }
 0xcdc   : > { %3187 = vrot.lane.b32.xlu0 %v3178_v55, %s6320_s20  ;;  %v4566_v55 = vld [vmem:[%s4757_s26 + $0x10] sm:$0xff] }
 0xce9   : > { %v3166_v53 = vpop.permute.xlu1 %3165 }
 0xcea   : > { %v3177_v24 = vmul.f32 %v3166_v53, %v3143_v52 }
 0xcec   : > { %3185 = vrot.lane.b32.xlu2 %v3177_v24, %s6320_s20 }
 0xcf9   : > { %v3170_v40 = vpop.permute.xlu0 %3169 }
 0xcfa   : > { %v3179_v11 = vmul.f32 %v3170_v40, %v3148_v34  ;;  %v1583_v34 = vperm.slane %v4565_v58, 2  ;;  %v4575_v58 = vld [vmem:[%s4791_s21 + $0x28] sm:$0xff] }
 0xcfc   : > { %3189 = vrot.lane.b32.xlu1 %v3179_v11, %s6320_s20  ;;  %v6007_v28 = vperm.slane %v1583_v34, 0 }
 0xd01   : > { %v3172_v21 = vpop.permute.xlu1 %3171 }
 0xd02   : > { %v3180_v3 = vmul.f32 %v3172_v21, %v3150_v48 }
 0xd04   : > { %3191 = vrot.lane.b32.xlu2 %v3180_v3, %s6320_s20  ;;  %v4567_v3 = vld [vmem:[%s4757_s26 + $0x18] sm:$0xff] }
 0xd46   : > { %v3186_v46 = vpop.permute.xlu2 %3185 }
 0xd47   : > { %v3197_v13 = vadd.f32 %v3186_v46, %v5718_v43  ;;  %v4206_v43 = vld [vmem:[%s6293_s9 + $0x8] sm:$0xff] }
 0xd48   : > { %3255 = vmatpush.bf16.msra.mxu0 %v4206_v43 }
 0xd49   : > { %v3201_v31 = vmax.f32 %v3197_v13, 0.0  ;;  %v4568_v13 = vld [vmem:[%s4757_s26 + $0x20] sm:$0xff] }
 0xd4b   : > { %3209 = vrot.lane.b32.xlu0 %v3201_v31, %s6320_s20 }
 0xd4e   : > { %v3188_v16 = vpop.permute.xlu0 %3187 }
 0xd4f   : > { %v3198_v59 = vadd.f32 %v3188_v16, %v5720_v47  ;;  %v4205_v47 = vld [vmem:[%s6293_s9] sm:$0xff] }
 0xd50   : > { %3256 = vmatpush.bf16.msra.mxu0 %v4205_v47 }
 0xd51   : > { %v3202_v44 = vmax.f32 %v3198_v59, 0.0  ;;  %v4570_v59 = vld [vmem:[%s4791_s21] sm:$0xff] }
 0xd53   : > { %3211 = vrot.lane.b32.xlu1 %v3202_v44, %s6320_s20 }
 0xd5e   : > { %v3192_v10 = vpop.permute.xlu2 %3191 }
 0xd5f   : > { %v3200_v18 = vadd.f32 %v3192_v10, %v5727_v9  ;;  %v5982_v9 = vld [vmem:[%s6296_s12] sm:$0xff] }
 0xd61   : > { %v3204_v63 = vmax.f32 %v3200_v18, 0.0 }
 0xd63   : > { %3215 = vrot.lane.b32.xlu0 %v3204_v63, %s6320_s20 }
 0xd6e   : > { %v3190_v12 = vpop.permute.xlu1 %3189 }
 0xd6f   : > { %v3199_v4 = vadd.f32 %v3190_v12, %v5725_v54  ;;  %v3268_v54 = vperm.slane %v5982_v9, 1 }
 0xd71   : > { %v3203_v29 = vmax.f32 %v3199_v4, 0.0  ;;  %3270 = vrot.lane.b32.xlu0 %v3268_v54, %s6320_s20  ;;  %v4572_v4 = vld [vmem:[%s4791_s21 + $0x10] sm:$0xff] }
 0xd73   : > { %3213 = vrot.lane.b32.xlu2 %v3203_v29, %s6320_s20 }
 0xdbd   : > { %v3210_v17 = vpop.permute.xlu0 %3209 }
 0xdbe   : > { %v3221_v20 = vadd.f32 %v3210_v17, %v5693_v62 }
 0xdc5   : > { %v3212_v8 = vpop.permute.xlu1 %3211 }
 0xdc6   : > { %v3222_v26 = vadd.f32 %v3212_v8, %v5696_v51  ;;  %v2422_v51 = vperm.slane %v5715_v5, 2 }
 0xdc8   : > { %v3229_v22 = vpack.c.bf16 %v3222_v26, %v3221_v20 }
 0xdca   : > { %4132 = vmatmul.msk.bf16.vlgmr.msra.gmra.mxu0 %vm772_vm0, %v3229_v22 }
 0xdcd   : > { %v3214_v50 = vpop.permute.xlu2 %3213 }
 0xdce   : > { %v3223_v41 = vadd.f32 %v3214_v50, %v5702_v7 }
 0xdd5   : > { %v3216_v0 = vpop.permute.xlu0 %3215 }
 0xdd6   : > { %v3224_v45 = vadd.f32 %v3216_v0, %v5705_v6  ;;  %v2426_v6 = vperm.slane %v2422_v51, 0 }
 0xdd8   : > { %v3230_v56 = vpack.c.bf16 %v3224_v45, %v3223_v41  ;;  %v5999_v37 = vadd.f32 %v5953_v49, %v2426_v6  ;;  %v6011_v49 = vadd.f32 %v5648_v14, %v6007_v28  ;;  %v6021_v61 = vadd.f32 %v5951_v19, %v2426_v6  ;;  %v4573_v41 = vld [vmem:[%s4791_s21 + $0x18] sm:$0xff] }
 0xdd9   : > { %v6031_v19 = vadd.f32 %v5644_v60, %v6007_v28  ;;  %v2482_v24 = vadd.f32 %v5949_v35, %v2426_v6  ;;  %v6038_v21 = vadd.f32 %v5955_v39, %v2426_v6  ;;  %v6046_v35 = vadd.f32 %v5646_v32, %v6007_v28  ;;  %v4569_v39 = vld [vmem:[%s4757_s26 + $0x28] sm:$0xff]  ;;  %s6331_s26 = smul.u32 96, %s6333_s30 }
 0xdda   : > { %4133 = vmatmul.msk.bf16.gmra.mxu0 %vm772_vm0, %v3230_v56  ;;  %v2497_v5 = vsel %vm1652_vm2, %v5999_v37, -inf  ;;  %v1659_v48 = vsel %vm1652_vm2, %v6011_v49, -inf  ;;  %v2494_v14 = vsel %vm1652_vm2, %v6021_v61, -inf  ;;  %v4571_v32 = vld [vmem:[%s4791_s21 + $0x8] sm:$0xff] }
 0xddb   : > { %v1653_v40 = vsel %vm1652_vm2, %v6031_v19, -inf  ;;  %v2491_v11 = vsel %vm1652_vm2, %v2482_v24, -inf  ;;  %v2500_v60 = vsel %vm1652_vm2, %v6038_v21, -inf  ;;  %v1656_v46 = vsel %vm1652_vm2, %v6046_v35, -inf }
 0xde3   : > { %v3271_v62 = vpop.permute.xlu0 %3270 }
 0xe47   : > { %v3258_v36 = vpop.f32.mrf.mxu0 }
 0xe48   : > { %v3273_v25 = vadd.f32 %v3271_v62, %v3258_v36 }
 0xe4f   : > { %v3260_v30 = vpop.f32.mrf.mxu0 }
 0xe50   : > { %v3390_v33 = vpack.c.bf16 %v3260_v30, %v3258_v36  ;;  %v3274_v38 = vadd.f32 %v3271_v62, %v3260_v30  ;;  %v4574_v30 = vld [vmem:[%s4791_s21 + $0x20] sm:$0xff] }
 0xe52   : > { %3394 = vrot.lane.b32.xlu2 %v3390_v33, %s6313_s23  ;;  %v3281_v42 = vsel %vm3277_vm4, %v3274_v38, -inf }
 0xe57   : > { %v3263_v52 = vpop.f32.mrf.mxu0 }
 0xe58   : > { %v5994_v23 = vadd.f32 %v3271_v62, %v3263_v52 }
 0xe5a   : > { %v3284_v7 = vsel %vm3277_vm4, %v5994_v23, -inf }
 0xe5b   : > { %3285 = vmax.xlane.f32.xlu0 %v3284_v7 }
 0xe5f   : > { %v3265_v57 = vpop.f32.mrf.mxu0 }
 0xe60   : > { %v3391_v15 = vpack.c.bf16 %v3265_v57, %v3263_v52 }
 0xe62   : > { %3396 = vrot.lane.b32.xlu1 %v3391_v15, %s6313_s23  ;;  %3445 = vmatpush.bf16.msrb.mxu1 %v3391_v15 }
 0xe63   : > { %2498 = vmax.xlane.f32.xlu0 %v2497_v5 }
 0xe66   : > { %3446 = vmatpush.bf16.msrb.mxu1 %v3390_v33 }
 0xe69   : > { %4140 = vmatmul.msk.bf16.vlgmr.msrb.gmra.mxu1 %vm772_vm0, %v5733_v1  ;;  %v3276_v1 = vadd.f32 %v3271_v62, %v3265_v57 }
 0xe6b   : > { %1660 = vmax.xlane.f32.xlu0 %v1659_v48  ;;  %v3287_v53 = vsel %vm3277_vm4, %v3276_v1, -inf  ;;  %v4208_v48 = vld [vmem:[%s6294_s10 + $0x8] sm:$0xff] }
 0xe6c   : > { %3550 = vmatpush.bf16.msrb.mxu2 %v4208_v48 }
 0xe79   : > { %4141 = vmatmul.msk.bf16.gmra.mxu1 %vm772_vm0, %v5738_v2  ;;  %v3278_v2 = vsel %vm3277_vm4, %v3273_v25, -inf }
 0xe7b   : > { %3282 = vmax.xlane.f32.xlu2 %v3281_v42 }
 0xe83   : > { %2495 = vmax.xlane.f32.xlu2 %v2494_v14 }
 0xe89   : > { %4142 = vmatmul.msk.bf16.gmra.mxu1 %vm772_vm0, %v4566_v55 }
 0xe8b   : > { %3288 = vmax.xlane.f32.xlu2 %v3287_v53 }
 0xe8c   : > { %3279 = vmax.xlane.f32.xlu1 %v3278_v2 }
 0xe93   : > { %1654 = vmax.xlane.f32.xlu2 %v1653_v40 }
 0xe94   : > { %2492 = vmax.xlane.f32.xlu1 %v2491_v11  ;;  %v6115_v11 = vperm.slane %v5982_v9, 0 }
 0xe99   : > { %4143 = vmatmul.msk.bf16.gmra.mxu1 %vm772_vm0, %v4567_v3 }
 0xe9c   : > { %2501 = vmax.xlane.f32.xlu1 %v2500_v60 }
 0xea4   : > { %1657 = vmax.xlane.f32.xlu1 %v1656_v46 }
 0xea9   : > { %4144 = vmatmul.msk.bf16.gmra.mxu1 %vm772_vm0, %v4568_v13 }
 0xeac   : > { %v3395_v16 = vpop.permute.xlu2 %3394 }
 0xeb9   : > { %4145 = vmatmul.msk.bf16.gmra.mxu1 %vm772_vm0, %v4569_v39 }
 0xece   : > { %v3286_v36 = vpop.xlane.xlu0 %3285 }
 0xecf   : > { %v3292_v33 = vsub.f32 %v5994_v23, %v3286_v36  ;;  %v6091_v23 = vadd.f32 %v5650_v27, %v6007_v28 }
 0xed1   : > { %v3298_v62 = vmul.f32 1.442695, %v3292_v33 }
 0xed4   : > { %v3397_v31 = vpop.permute.xlu1 %3396 }
 0xed5   : > { %3406 = vmatpush.bf16.msrb.mxu0 %v3397_v31 }
 0xed6   : > { %v2499_v7 = vpop.xlane.xlu0 %2498 }
 0xed7   : > { %v2505_v6 = vsub.f32 %v5999_v37, %v2499_v7  ;;  %v1662_v37 = vsel %vm1652_vm2, %v6091_v23, -inf }
 0xed9   : > { %3407 = vmatpush.bf16.msrb.mxu0 %v3395_v16  ;;  %v2511_v34 = vmul.f32 1.442695, %v2505_v6 }
 0xedc   : > { %4134 = vmatmul.msk.bf16.vlgmr.msrb.gmra.mxu0 %vm772_vm0, %v4570_v59 }
 0xede   : > { %v1661_v39 = vpop.xlane.xlu0 %1660 }
 0xee6   : > { %v3448_v42 = vpop.f32.mrf.mxu1 }
 0xeec   : > { %4135 = vmatmul.msk.bf16.gmra.mxu0 %vm772_vm0, %v4571_v32 }
 0xeee   : > { %v3283_v44 = vpop.xlane.xlu2 %3282 }
 0xeef   : > { %v3291_v10 = vsub.f32 %v3274_v38, %v3283_v44 }
 0xef1   : > { %v3296_v18 = vmul.f32 1.442695, %v3291_v10 }
 0xef3   : > { %4491 = vpow2.f32 %v3296_v18 }
 0xef6   : > { %v2496_v63 = vpop.xlane.xlu2 %2495 }
 0xef7   : > { %v2504_v52 = vsub.f32 %v6021_v61, %v2496_v63 }
 0xef9   : > { %v6058_v12 = vpop.eup %4491  ;;  %v2509_v51 = vmul.f32 1.442695, %v2504_v52 }
 0xefa   : > { %3308 = vrot.lane.b32.xlu0 %v6058_v12, %s6320_s20 }
 0xefc   : > { %4136 = vmatmul.msk.bf16.gmra.mxu0 %vm772_vm0, %v4572_v4 }
 0xefe   : > { %v3289_v29 = vpop.xlane.xlu2 %3288 }
 0xeff   : > { %v3293_v43 = vsub.f32 %v3276_v1, %v3289_v29  ;;  %v3280_v47 = vpop.xlane.xlu1 %3279  ;;  %v4207_v1 = vld [vmem:[%s6294_s10] sm:$0xff] }
 0xf00   : > { %v3290_v54 = vsub.f32 %v3273_v25, %v3280_v47  ;;  %3551 = vmatpush.bf16.msrb.mxu2 %v4207_v1  ;;  %v3450_v25 = vpop.f32.mrf.mxu1 }
 0xf01   : > { %v3300_v17 = vmul.f32 1.442695, %v3293_v43 }
 0xf02   : > { %v3294_v8 = vmul.f32 1.442695, %v3290_v54 }
 0xf03   : > { %4493 = vpow2.f32 %v3300_v17 }
 0xf04   : > { %4495 = vpow2.f32 %v3294_v8 }
 0xf06   : > { %v1655_v40 = vpop.xlane.xlu2 %1654 }
 0xf07   : > { %v2493_v20 = vpop.xlane.xlu1 %2492  ;;  %v1665_v31 = vsub.f32 %v6031_v19, %v1655_v40 }
 0xf08   : > { %v2503_v26 = vsub.f32 %v2482_v24, %v2493_v20  ;;  %v3453_v2 = vpop.f32.mrf.mxu1 }
 0xf09   : > { %v6064_v22 = vpop.eup %4493  ;;  %v1669_v18 = vmul.f32 1.442695, %v1665_v31 }
 0xf0a   : > { %v6066_v50 = vpop.eup %4495  ;;  %v2507_v0 = vmul.f32 1.442695, %v2503_v26  ;;  %3312 = vrot.lane.b32.xlu0 %v6064_v22, %s6320_s20  ;;  %v1667_v26 = vsub.f32 %v6011_v49, %v1661_v39 }
 0xf0b   : > { %3306 = vrot.lane.b32.xlu2 %v6066_v50, %s6320_s20 }
 0xf0c   : > { %4497 = vpow2.f32 %v2507_v0  ;;  %4137 = vmatmul.msk.bf16.gmra.mxu0 %vm772_vm0, %v4573_v41  ;;  %v1673_v33 = vmul.f32 1.442695, %v1667_v26 }
 0xf0d   : > { %4499 = vpow2.f32 %v3298_v62 }
 0xf0e   : > { %4501 = vpow2.f32 %v2509_v51 }
 0xf0f   : > { %4503 = vpow2.f32 %v2511_v34  ;;  %v2502_v28 = vpop.xlane.xlu1 %2501 }
 0xf10   : > { %v2506_v61 = vsub.f32 %v6038_v21, %v2502_v28  ;;  %v3455_v3 = vpop.f32.mrf.mxu1 }
 0xf12   : > { %v6074_v45 = vpop.eup %4497  ;;  %v2513_v14 = vmul.f32 1.442695, %v2506_v61 }
 0xf13   : > { %v2515_v56 = vsel %vm1652_vm2, %v6074_v45, 0.0  ;;  %v6083_v57 = vpop.eup %4499 }
 0xf14   : > { %2516 = vadd.xlane.f32.xlu1 %v2515_v56  ;;  %v6093_v15 = vpop.eup %4501  ;;  %4505 = vpow2.f32 %v2513_v14 }
 0xf15   : > { %v2518_v5 = vsel %vm1652_vm2, %v6093_v15, 0.0  ;;  %v6102_v38 = vpop.eup %4503  ;;  %4507 = vpow2.f32 %v1669_v18 }
 0xf16   : > { %v2521_v27 = vsel %vm1652_vm2, %v6102_v38, 0.0  ;;  %4509 = vpow2.f32 %v1673_v33 }
 0xf18   : > { %v3458_v29 = vpop.f32.mrf.mxu1 }
 0xf1a   : > { %v6110_v55 = vpop.eup %4505 }
 0xf1b   : > { %v2524_v53 = vsel %vm1652_vm2, %v6110_v55, 0.0  ;;  %v6123_v17 = vpop.eup %4507 }
 0xf1c   : > { %4138 = vmatmul.msk.bf16.gmra.mxu0 %vm772_vm0, %v4574_v30  ;;  %v1677_v56 = vsel %vm1652_vm2, %v6123_v17, 0.0  ;;  %v6132_v34 = vpop.eup %4509 }
 0xf20   : > { %v3460_v41 = vpop.f32.mrf.mxu1 }
 0xf28   : > { %v3463_v49 = vpop.f32.mrf.mxu1 }
 0xf2c   : > { %4139 = vmatmul.msk.bf16.gmra.mxu0 %vm772_vm0, %v4575_v58 }
 0xf2d   : > { %3310 = vrot.lane.b32.xlu1 %v6083_v57, %s6320_s20  ;;  %s6263_s20 = scalar_lea.vmem %s6297_s13, %s6331_s26 }
 0xf30   : > { %v3465_v61 = vpop.f32.mrf.mxu1 }
 0xf34   : > { %1663 = vmax.xlane.f32.xlu2 %v1662_v37  ;;  %2519 = vadd.xlane.f32.xlu0 %v2518_v5 }
 0xf3c   : > { %2522 = vadd.xlane.f32.xlu2 %v2521_v27  ;;  %v1683_v27 = vsel %vm1652_vm2, %v6132_v34, 0.0 }
 0xf57   : > { %2525 = vadd.xlane.f32.xlu1 %v2524_v53  ;;  %v1658_v53 = vpop.xlane.xlu1 %1657 }
 0xf59   : > { %v3409_v24 = vpop.f32.mrf.mxu0 }
 0xf5a   : > { %v3449_v21 = vadd.f32 %v3448_v42, %v3409_v24 }
 0xf5c   : > { %v3479_v46 = vadd.f32 %v6115_v11, %v3449_v21  ;;  %v3468_v21 = vpop.f32.mrf.mxu1 }
 0xf5e   : > { %v3491_v44 = vmax.f32 %v3479_v46, 0.0 }
 0xf61   : > { %v3411_v60 = vpop.f32.mrf.mxu0 }
 0xf62   : > { %v3451_v13 = vadd.f32 %v3450_v25, %v3411_v60 }
 0xf64   : > { %v3480_v16 = vadd.f32 %v6115_v11, %v3451_v13  ;;  %v1666_v13 = vsub.f32 %v6046_v35, %v1658_v53 }
 0xf65   : > { %v3307_v59 = vpop.permute.xlu2 %3306 }
 0xf66   : > { %v3318_v32 = vsel %vm1652_vm2, %v3307_v59, 0.0  ;;  %v3492_v10 = vmax.f32 %v3480_v16, 0.0  ;;  %v1671_v59 = vmul.f32 1.442695, %v1666_v13 }
 0xf67   : > { %3319 = vadd.xlane.f32.xlu0 %v3318_v32  ;;  %v3470_v32 = vpop.f32.mrf.mxu1 }
 0xf68   : > { %v3507_v63 = vpack.c.bf16 %v3492_v10, %v3491_v44  ;;  %4511 = vpow2.f32 %v1671_v59 }
 0xf69   : > { %v3414_v4 = vpop.f32.mrf.mxu0 }
 0xf6a   : > { %4154 = vmatmul.msk.bf16.vlgmr.msrb.gmra.mxu2 %vm772_vm0, %v3507_v63  ;;  %v3454_v19 = vadd.f32 %v3453_v2, %v3414_v4 }
 0xf6c   : > { %v3309_v43 = vpop.permute.xlu0 %3308  ;;  %v3481_v8 = vadd.f32 %v6115_v11, %v3454_v19 }
 0xf6d   : > { %v3321_v47 = vsel %vm1652_vm2, %v3309_v43, 0.0 }
 0xf6e   : > { %3322 = vadd.xlane.f32.xlu2 %v3321_v47  ;;  %v3493_v36 = vmax.f32 %v3481_v8, 0.0  ;;  %v6149_v43 = vpop.eup %4511 }
 0xf6f   : > { %v3473_v19 = vpop.f32.mrf.mxu1 }
 0xf71   : > { %v3416_v54 = vpop.f32.mrf.mxu0 }
 0xf72   : > { %v3456_v20 = vadd.f32 %v3455_v3, %v3416_v54 }
 0xf74   : > { %v3482_v0 = vadd.f32 %v6115_v11, %v3456_v20 }
 0xf76   : > { %1678 = vadd.xlane.f32.xlu2 %v1677_v56  ;;  %v3494_v30 = vmax.f32 %v3482_v0, 0.0 }
 0xf78   : > { %v3508_v62 = vpack.c.bf16 %v3494_v30, %v3493_v36 }
 0xf79   : > { %v3419_v52 = vpop.f32.mrf.mxu0 }
 0xf7a   : > { %4155 = vmatmul.msk.bf16.gmra.mxu2 %vm772_vm0, %v3508_v62  ;;  %v3459_v6 = vadd.f32 %v3458_v29, %v3419_v52 }
 0xf7c   : > { %v3313_v51 = vpop.permute.xlu0 %3312  ;;  %v3483_v5 = vadd.f32 %v6115_v11, %v3459_v6 }
 0xf7d   : > { %v3327_v7 = vsel %vm1652_vm2, %v3313_v51, 0.0 }
 0xf7e   : > { %3328 = vadd.xlane.f32.xlu0 %v3327_v7  ;;  %v3495_v42 = vmax.f32 %v3483_v5, 0.0 }
 0xf81   : > { %v3421_v58 = vpop.f32.mrf.mxu0 }
 0xf82   : > { %v3461_v37 = vadd.f32 %v3460_v41, %v3421_v58  ;;  %v1680_v41 = vsel %vm1652_vm2, %v6149_v43, 0.0  ;;  %v3475_v58 = vpop.f32.mrf.mxu1 }
 0xf84   : > { %v3484_v48 = vadd.f32 %v6115_v11, %v3461_v37 }
 0xf86   : > { %1684 = vadd.xlane.f32.xlu0 %v1683_v27  ;;  %v3496_v28 = vmax.f32 %v3484_v48, 0.0 }
 0xf87   : > { %v6142_v39 = vpop.xlane.xlu1 %2516 }
 0xf88   : > { %v3509_v14 = vpack.c.bf16 %v3496_v28, %v3495_v42  ;;  %4513 = vrcp.f32 %v6142_v39  ;;  %vm2532_vm9 = vweird.f32 %v6142_v39 }
 0xf89   : > { %v3424_v1 = vpop.f32.mrf.mxu0 }
 0xf8a   : > { %4156 = vmatmul.msk.bf16.gmra.mxu2 %vm772_vm0, %v3509_v14  ;;  %v3464_v25 = vadd.f32 %v3463_v49, %v3424_v1 }
 0xf8c   : > { %v3485_v24 = vadd.f32 %v6115_v11, %v3464_v25 }
 0xf8e   : > { %v3497_v60 = vmax.f32 %v3485_v24, 0.0  ;;  %v6151_v54 = vpop.eup %4513 }
 0xf8f   : > { %v2528_v30 = vmul.f32 %v6151_v54, %v6142_v39  ;;  %vm2533_vm5 = vweird.f32 %v6151_v54 }
 0xf90   : > { %vm2534_vm10 = vmor %vm2532_vm9, %vm2533_vm5 }
 0xf91   : > { %v3426_v2 = vpop.f32.mrf.mxu0  ;;  %v2529_v52 = vsub.f32 1.0, %v2528_v30 }
 0xf92   : > { %v3466_v40 = vadd.f32 %v3465_v61, %v3426_v2 }
 0xf93   : > { %v2530_v5 = vmul.f32 %v6151_v54, %v2529_v52 }
 0xf94   : > { %v3486_v3 = vadd.f32 %v6115_v11, %v3466_v40 }
 0xf95   : > { %v2531_v2 = vadd.f32 %v6151_v54, %v2530_v5 }
 0xf96   : > { %v3498_v46 = vmax.f32 %v3486_v3, 0.0  ;;  %v2538_v3 = vand.u32 2147483648, %v6142_v39 }
 0xf98   : > { %v3510_v31 = vpack.c.bf16 %v3498_v46, %v3497_v60 }
 0xf99   : > { %v3429_v16 = vpop.f32.mrf.mxu0 }
 0xf9a   : > { %4157 = vmatmul.msk.bf16.gmra.mxu2 %vm772_vm0, %v3510_v31  ;;  %v3469_v10 = vadd.f32 %v3468_v21, %v3429_v16 }
 0xf9c   : > { %v3487_v35 = vadd.f32 %v6115_v11, %v3469_v10 }
 0xf9e   : > { %v3499_v26 = vmax.f32 %v3487_v35, 0.0 }
 0xf9f   : > { %v3311_v44 = vpop.permute.xlu1 %3310 }
 0xfa0   : > { %v3324_v18 = vsel %vm1652_vm2, %v3311_v44, 0.0  ;;  %v2539_v44 = vor.u32 1.1754944e-38, %v2538_v3 }
 0xfa1   : > { %3325 = vadd.xlane.f32.xlu1 %v3324_v18  ;;  %v3431_v63 = vpop.f32.mrf.mxu0 }
 0xfa2   : > { %v3471_v4 = vadd.f32 %v3470_v32, %v3431_v63  ;;  %v2535_v32 = vsel %vm2534_vm10, %v6151_v54, %v2531_v2 }
 0xfa4   : > { %v3488_v29 = vadd.f32 %v6115_v11, %v3471_v4 }
 0xfa6   : > { %v3500_v47 = vmax.f32 %v3488_v29, 0.0 }
 0xfa7   : > { %v2520_v8 = vpop.xlane.xlu0 %2519  ;;  %v1664_v20 = vpop.xlane.xlu2 %1663 }
 0xfa8   : > { %4515 = vrcp.f32 %v2520_v8  ;;  %v1668_v0 = vsub.f32 %v6091_v23, %v1664_v20  ;;  %v3511_v56 = vpack.c.bf16 %v3500_v47, %v3499_v26  ;;  %v2553_v48 = vand.u32 2147483648, %v2520_v8 }
 0xfa9   : > { %1681 = vadd.xlane.f32.xlu1 %v1680_v41  ;;  %v3434_v36 = vpop.f32.mrf.mxu0  ;;  %v2551_v14 = vand.u32 2147483647, %v2520_v8  ;;  %vm2547_vm6 = vweird.f32 %v2520_v8 }
 0xfaa   : > { %v1675_v33 = vmul.f32 1.442695, %v1668_v0  ;;  %4158 = vmatmul.msk.bf16.gmra.mxu2 %vm772_vm0, %v3511_v56  ;;  %v3474_v51 = vadd.f32 %v3473_v19, %v3434_v36  ;;  %v2554_v24 = vor.u32 1.1754944e-38, %v2553_v48 }
 0xfab   : > { %vm2552_vm8 = vcmp.eq.f32.partialorder %v2551_v14, 8.507059e+37 }
 0xfac   : > { %4517 = vpow2.f32 %v1675_v33  ;;  %v3489_v27 = vadd.f32 %v6115_v11, %v3474_v51 }
 0xfae   : > { %v4516_v62 = vpop.eup %4515  ;;  %v3501_v40 = vmax.f32 %v3489_v27, 0.0 }
 0xfaf   : > { %v2543_v7 = vmul.f32 %v4516_v62, %v2520_v8  ;;  %v2523_v49 = vpop.xlane.xlu2 %2522  ;;  %vm2548_vm3 = vweird.f32 %v4516_v62 }
 0xfb0   : > { %4519 = vrcp.f32 %v2523_v49  ;;  %vm2549_vm7 = vmor %vm2547_vm6, %vm2548_vm3  ;;  %v2568_v4 = vand.u32 2147483648, %v2523_v49  ;;  %vm2562_vm13 = vweird.f32 %v2523_v49  ;;  %v2566_v35 = vand.u32 2147483647, %v2523_v49 }
 0xfb1   : > { %v2544_v23 = vsub.f32 1.0, %v2543_v7  ;;  %v3436_v6 = vpop.f32.mrf.mxu0 }
 0xfb2   : > { %v6159_v37 = vpop.eup %4517  ;;  %v3476_v28 = vadd.f32 %v3475_v58, %v3436_v6  ;;  %v2569_v29 = vor.u32 1.1754944e-38, %v2568_v4  ;;  %vm2567_vm15 = vcmp.eq.f32.partialorder %v2566_v35, 8.507059e+37 }
 0xfb3   : > { %v2545_v42 = vmul.f32 %v4516_v62, %v2544_v23  ;;  %v1686_v61 = vsel %vm1652_vm2, %v6159_v37, 0.0 }
 0xfb4   : > { %1687 = vadd.xlane.f32.xlu2 %v1686_v61  ;;  %v3490_v1 = vadd.f32 %v6115_v11, %v3476_v28  ;;  %v2536_v11 = vand.u32 2147483647, %v6142_v39 }
 0xfb5   : > { %v2546_v25 = vadd.f32 %v4516_v62, %v2545_v42 }
 0xfb6   : > { %v4520_v53 = vpop.eup %4519  ;;  %v3502_v21 = vmax.f32 %v3490_v1, 0.0  ;;  %vm2537_vm11 = vcmp.eq.f32.partialorder %v2536_v11, 8.507059e+37 }
 0xfb7   : > { %v2558_v60 = vmul.f32 %v4520_v53, %v2523_v49  ;;  %v2550_v46 = vsel %vm2549_vm7, %v4516_v62, %v2546_v25  ;;  %v2540_v18 = vsel %vm2537_vm11, %v2539_v44, %v2535_v32  ;;  %vm2563_vm12 = vweird.f32 %v4520_v53 }
 0xfb8   : > { %v2555_v13 = vsel %vm2552_vm8, %v2554_v24, %v2550_v46  ;;  %v3512_v31 = vpack.c.bf16 %v3502_v21, %v3501_v40  ;;  %v2541_v63 = vmul.f32 %v6074_v45, %v2540_v18  ;;  %vm2564_vm14 = vmor %vm2562_vm13, %vm2563_vm12  ;;  %v6189_v21 = vperm.slane %v5982_v9, 2 }
 0xfb9   : > { %v2559_v16 = vsub.f32 1.0, %v2558_v60  ;;  %v2556_v59 = vmul.f32 %v6093_v15, %v2555_v13  ;;  %vm3610_vm13 = vcmask 130048  }
 0xfba   : > { %4159 = vmatmul.msk.bf16.gmra.mxu2 %vm772_vm0, %v3512_v31 }
 0xfbb   : > { %3686 = vrot.lane.b32.xlu0 %v2556_v59, %s4590_s25  ;;  %v2560_v10 = vmul.f32 %v4520_v53, %v2559_v16 }
 0xfbd   : > { %v2561_v39 = vadd.f32 %v4520_v53, %v2560_v10 }
 0xfbf   : > { %v2565_v15 = vsel %vm2564_vm14, %v4520_v53, %v2561_v39 }
 0xfc0   : > { %v2570_v47 = vsel %vm2567_vm15, %v2569_v29, %v2565_v15 }
 0xfc1   : > { %v2571_v54 = vmul.f32 %v6102_v38, %v2570_v47  ;;  %v4209_v38 = vld [vmem:[%s6295_s11] sm:$0xff] }
 0xfc2   : > { %3684 = vrot.lane.b32.xlu1 %v2541_v63, %s4590_s25  ;;  %3636 = vmatpush.bf16.msrb.mxu3 %v4209_v38 }
 0xfca   : > { %v2526_v19 = vpop.xlane.xlu1 %2525 }
 0xfcb   : > { %4521 = vrcp.f32 %v2526_v19  ;;  %v2583_v0 = vand.u32 2147483648, %v2526_v19  ;;  %v2581_v41 = vand.u32 2147483647, %v2526_v19  ;;  %vm2577_vm1 = vweird.f32 %v2526_v19 }
 0xfcc   : > { %3688 = vrot.lane.b32.xlu2 %v2571_v54, %s4590_s25 }
 0xfcd   : > { %v2584_v36 = vor.u32 1.1754944e-38, %v2583_v0  ;;  %vm2582_vm3 = vcmp.eq.f32.partialorder %v2581_v41, 8.507059e+37 }
 0xfd1   : > { %v4522_v8 = vpop.eup %4521 }
 0xfd2   : > { %v2573_v20 = vmul.f32 %v4522_v8, %v2526_v19  ;;  %vm2578_vm0 = vweird.f32 %v4522_v8 }
 0xfd3   : > { %vm2579_vm4 = vmor %vm2577_vm1, %vm2578_vm0 }
 0xfd4   : > { %v2574_v26 = vsub.f32 1.0, %v2573_v20 }
 0xfd6   : > { %v2575_v45 = vmul.f32 %v4522_v8, %v2574_v26 }
 0xfd8   : > { %v2576_v56 = vadd.f32 %v4522_v8, %v2575_v45 }
 0xfda   : > { %v3320_v30 = vpop.xlane.xlu0 %3319  ;;  %v2580_v33 = vsel %vm2579_vm4, %v4522_v8, %v2576_v56 }
 0xfdb   : > { %4523 = vrcp.f32 %v3320_v30  ;;  %v2585_v62 = vsel %vm2582_vm3, %v2584_v36, %v2580_v33  ;;  %v3341_v58 = vand.u32 2147483648, %v3320_v30  ;;  %v3339_v5 = vand.u32 2147483647, %v3320_v30 }
 0xfdc   : > { %v2586_v52 = vmul.f32 %v6110_v55, %v2585_v62  ;;  %vm3335_vm6 = vweird.f32 %v3320_v30 }
 0xfdd   : > { %v3342_v42 = vor.u32 1.1754944e-38, %v3341_v58  ;;  %vm3340_vm8 = vcmp.eq.f32.partialorder %v3339_v5, 8.507059e+37 }
 0xfde   : > { %3690 = vrot.lane.b32.xlu0 %v2586_v52, %s4590_s25 }
 0xfe1   : > { %v4524_v51 = vpop.eup %4523  ;;  %v3323_v7 = vpop.xlane.xlu2 %3322 }
 0xfe2   : > { %v3331_v49 = vmul.f32 %v4524_v51, %v3320_v30  ;;  %4525 = vrcp.f32 %v3323_v7  ;;  %vm3336_vm5 = vweird.f32 %v4524_v51  ;;  %v3356_v25 = vand.u32 2147483648, %v3323_v7 }
 0xfe3   : > { %vm3337_vm7 = vmor %vm3335_vm6, %vm3336_vm5  ;;  %v3354_v24 = vand.u32 2147483647, %v3323_v7  ;;  %vm3350_vm10 = vweird.f32 %v3323_v7 }
 0xfe4   : > { %v3332_v23 = vsub.f32 1.0, %v3331_v49  ;;  %v3357_v3 = vor.u32 1.1754944e-38, %v3356_v25 }
 0xfe5   : > { %vm3355_vm12 = vcmp.eq.f32.partialorder %v3354_v24, 8.507059e+37 }
 0xfe6   : > { %v3333_v6 = vmul.f32 %v4524_v51, %v3332_v23 }
 0xfe8   : > { %v4526_v48 = vpop.eup %4525  ;;  %v3334_v27 = vadd.f32 %v4524_v51, %v3333_v6 }
 0xfe9   : > { %v3346_v28 = vmul.f32 %v4526_v48, %v3323_v7  ;;  %vm3351_vm9 = vweird.f32 %v4526_v48 }
 0xfea   : > { %v3338_v61 = vsel %vm3337_vm7, %v4524_v51, %v3334_v27  ;;  %vm3352_vm11 = vmor %vm3350_vm10, %vm3351_vm9 }
 0xfeb   : > { %v3347_v55 = vsub.f32 1.0, %v3346_v28  ;;  %v3343_v14 = vsel %vm3340_vm8, %v3342_v42, %v3338_v61 }
 0xfec   : > { %v3344_v53 = vmul.f32 %v6066_v50, %v3343_v14 }
 0xfed   : > { %v3348_v1 = vmul.f32 %v4526_v48, %v3347_v55  ;;  %v3553_v2 = vpop.f32.mrf.mxu2 }
 0xfee   : > { %3700 = vrot.lane.b32.xlu1 %v3344_v53, %s4591_s18  ;;  %v3554_v50 = vadd.f32 %v3553_v2, %v6189_v21 }
 0xfef   : > { %v3349_v40 = vadd.f32 %v4526_v48, %v3348_v1 }
 0xff0   : > { %v3583_v9 = vmax.f32 %v3554_v50, 0.0 }
 0xff1   : > { %v3329_v60 = vpop.xlane.xlu0 %3328  ;;  %v3353_v46 = vsel %vm3352_vm11, %v4526_v48, %v3349_v40  ;;  %v6204_v48 = vpop.xlane.xlu2 %1678 }
 0xff2   : > { %4527 = vrcp.f32 %v3329_v60  ;;  %v3358_v11 = vsel %vm3355_vm12, %v3357_v3, %v3353_v46  ;;  %v3386_v39 = vand.u32 2147483648, %v3329_v60  ;;  %v3384_v4 = vand.u32 2147483647, %v3329_v60 }
 0xff3   : > { %v3359_v13 = vmul.f32 %v6058_v12, %v3358_v11  ;;  %vm3380_vm15 = vweird.f32 %v3329_v60 }
 0xff4   : > { %v3387_v15 = vor.u32 1.1754944e-38, %v3386_v39  ;;  %vm3385_vm1 = vcmp.eq.f32.partialorder %v3384_v4, 8.507059e+37 }
 0xff5   : > { %v3555_v31 = vpop.f32.mrf.mxu2  ;;  %3702 = vrot.lane.b32.xlu2 %v3359_v13, %s4591_s18 }
 0xff6   : > { %v3556_v16 = vadd.f32 %v3555_v31, %v6189_v21 }
 0xff8   : > { %v4528_v59 = vpop.eup %4527  ;;  %v3584_v32 = vmax.f32 %v3556_v16, 0.0 }
 0xff9   : > { %v3376_v44 = vmul.f32 %v4528_v59, %v3329_v60  ;;  %vm3381_vm14 = vweird.f32 %v4528_v59  ;;  %v1685_v41 = vpop.xlane.xlu0 %1684 }
 0xffa   : > { %v3597_v18 = vpack.c.bf16 %v3584_v32, %v3583_v9  ;;  %vm3382_vm0 = vmor %vm3380_vm15, %vm3381_vm14  ;;  %4529 = vrcp.f32 %v1685_v41  ;;  %v1730_v53 = vand.u32 2147483648, %v1685_v41  ;;  %vm1724_vm8 = vweird.f32 %v1685_v41 }
 0xffb   : > { %v3377_v10 = vsub.f32 1.0, %v3376_v44  ;;  %v1728_v40 = vand.u32 2147483647, %v1685_v41 }
 0xffc   : > { %4164 = vmatmul.msk.bf16.vlgmr.msrb.gmra.mxu3 %vm3610_vm13, %v3597_v18  ;;  %v1731_v50 = vor.u32 1.1754944e-38, %v1730_v53 }
 0xffd   : > { %v3378_v63 = vmul.f32 %v4528_v59, %v3377_v10  ;;  %v3558_v12 = vpop.f32.mrf.mxu2  ;;  %vm1729_vm10 = vcmp.eq.f32.partialorder %v1728_v40, 8.507059e+37 }
 0xffe   : > { %v3559_v54 = vadd.f32 %v3558_v12, %v6189_v21 }
 0xfff   : > { %v3379_v35 = vadd.f32 %v4528_v59, %v3378_v63 }
0x1000   : > { %v3585_v26 = vmax.f32 %v3559_v54, 0.0  ;;  %v4530_v30 = vpop.eup %4529 }
0x1001   : > { %v3383_v29 = vsel %vm3382_vm0, %v4528_v59, %v3379_v35  ;;  %v1720_v62 = vmul.f32 %v4530_v30, %v1685_v41  ;;  %vm1725_vm6 = vweird.f32 %v4530_v30  ;;  %vm3720_vm0 = vcmask 195584  }
0x1002   : > { %v3388_v47 = vsel %vm3385_vm1, %v3387_v15, %v3383_v29  ;;  %vm1726_vm9 = vmor %vm1724_vm8, %vm1725_vm6 }
0x1003   : > { %v3389_v19 = vmul.f32 %v6064_v22, %v3388_v47  ;;  %v1721_v23 = vsub.f32 1.0, %v1720_v62 }
0x1005   : > { %3706 = vrot.lane.b32.xlu1 %v3389_v19, %s4591_s18  ;;  %v3560_v8 = vpop.f32.mrf.mxu2  ;;  %v1722_v28 = vmul.f32 %v4530_v30, %v1721_v23 }
0x1006   : > { %v3561_v20 = vadd.f32 %v3560_v8, %v6189_v21 }
0x1007   : > { %v1723_v1 = vadd.f32 %v4530_v30, %v1722_v28  ;;  %v1698_v28 = vand.u32 2147483647, %v6204_v48 }
0x1008   : > { %v3586_v45 = vmax.f32 %v3561_v20, 0.0 }
0x1009   : > { %v1727_v13 = vsel %vm1726_vm9, %v4530_v30, %v1723_v1 }
0x100a   : > { %v3598_v0 = vpack.c.bf16 %v3586_v45, %v3585_v26  ;;  %v1732_v32 = vsel %vm1729_vm10, %v1731_v50, %v1727_v13 }
0x100c   : > { %4165 = vmatmul.msk.bf16.gmra.mxu3 %vm3610_vm13, %v3598_v0 }
0x100d   : > { %v3563_v56 = vpop.f32.mrf.mxu2 }
0x100e   : > { %v3564_v22 = vadd.f32 %v3563_v56, %v6189_v21 }
0x1010   : > { %v3587_v52 = vmax.f32 %v3564_v22, 0.0 }
0x1014   : > { %v3326_v36 = vpop.xlane.xlu1 %3325 }
0x1015   : > { %4531 = vrcp.f32 %v3326_v36  ;;  %v3565_v33 = vpop.f32.mrf.mxu2  ;;  %v3371_v27 = vand.u32 2147483648, %v3326_v36  ;;  %v3369_v55 = vand.u32 2147483647, %v3326_v36  ;;  %vm3365_vm3 = vweird.f32 %v3326_v36 }
0x1016   : > { %v3566_v38 = vadd.f32 %v3565_v33, %v6189_v21 }
0x1017   : > { %v3372_v14 = vor.u32 1.1754944e-38, %v3371_v27  ;;  %vm3370_vm7 = vcmp.eq.f32.partialorder %v3369_v55, 8.507059e+37  ;;  %v1700_v27 = vand.u32 2147483648, %v6204_v48 }
0x1018   : > { %v3588_v51 = vmax.f32 %v3566_v38, 0.0 }
0x101a   : > { %v3599_v49 = vpack.c.bf16 %v3588_v51, %v3587_v52 }
0x101b   : > { %v4532_v7 = vpop.eup %4531 }
0x101c   : > { %v3361_v6 = vmul.f32 %v4532_v7, %v3326_v36  ;;  %4166 = vmatmul.msk.bf16.gmra.mxu3 %vm3610_vm13, %v3599_v49  ;;  %vm3366_vm4 = vweird.f32 %v4532_v7  ;;  %v1682_v59 = vpop.xlane.xlu1 %1681 }
0x101d   : > { %v3568_v5 = vpop.f32.mrf.mxu2  ;;  %vm3367_vm5 = vmor %vm3365_vm3, %vm3366_vm4  ;;  %4533 = vrcp.f32 %v1682_v59  ;;  %v1715_v20 = vand.u32 2147483648, %v1682_v59  ;;  %vm1709_vm12 = vweird.f32 %v1682_v59  ;;  %v1713_v26 = vand.u32 2147483647, %v1682_v59 }
0x101e   : > { %v3362_v58 = vsub.f32 1.0, %v3361_v6  ;;  %v3569_v24 = vadd.f32 %v3568_v5, %v6189_v21  ;;  %4535 = vrcp.f32 %v6204_v48  ;;  %vm1694_vm4 = vweird.f32 %v6204_v48 }
0x101f   : > { %v1716_v36 = vor.u32 1.1754944e-38, %v1715_v20  ;;  %vm1714_vm15 = vcmp.eq.f32.partialorder %v1713_v26, 8.507059e+37 }
0x1020   : > { %v3363_v42 = vmul.f32 %v4532_v7, %v3362_v58  ;;  %v3589_v31 = vmax.f32 %v3569_v24, 0.0 }
0x1022   : > { %v3364_v61 = vadd.f32 %v4532_v7, %v3363_v42 }
0x1023   : > { %v4534_v39 = vpop.eup %4533 }
0x1024   : > { %v3368_v25 = vsel %vm3367_vm5, %v4532_v7, %v3364_v61  ;;  %v1705_v4 = vmul.f32 %v4534_v39, %v1682_v59  ;;  %vm1710_vm11 = vweird.f32 %v4534_v39  ;;  %v4536_v0 = vpop.eup %4535  ;;  %v1701_v61 = vor.u32 1.1754944e-38, %v1700_v27 }
0x1025   : > { %v3373_v2 = vsel %vm3370_vm7, %v3372_v14, %v3368_v25  ;;  %v3570_v60 = vpop.f32.mrf.mxu2  ;;  %vm1711_vm14 = vmor %vm1709_vm12, %vm1710_vm11  ;;  %v1690_v22 = vmul.f32 %v4536_v0, %v6204_v48  ;;  %vm1695_vm1 = vweird.f32 %v4536_v0  ;;  %vm1699_vm5 = vcmp.eq.f32.partialorder %v1698_v28, 8.507059e+37 }
0x1026   : > { %v3374_v3 = vmul.f32 %v6083_v57, %v3373_v2  ;;  %v3571_v11 = vadd.f32 %v3570_v60, %v6189_v21  ;;  %v1733_v57 = vmul.f32 %v6132_v34, %v1732_v32  ;;  %v1706_v47 = vsub.f32 1.0, %v1705_v4  ;;  %vm1696_vm3 = vmor %vm1694_vm4, %vm1695_vm1 }
0x1027   : > { %v6208_v46 = vpop.xlane.xlu2 %1687  ;;  %v1691_v7 = vsub.f32 1.0, %v1690_v22 }
0x1028   : > { %3704 = vrot.lane.b32.xlu0 %v3374_v3, %s4591_s18  ;;  %v3590_v16 = vmax.f32 %v3571_v11, 0.0  ;;  %v1707_v54 = vmul.f32 %v4534_v39, %v1706_v47  ;;  %4537 = vrcp.f32 %v6208_v46  ;;  %v1745_v13 = vand.u32 2147483648, %v6208_v46 }
0x1029   : > { %v1692_v6 = vmul.f32 %v4536_v0, %v1691_v7  ;;  %vm1739_vm7 = vweird.f32 %v6208_v46 }
0x102a   : > { %v3600_v44 = vpack.c.bf16 %v3590_v16, %v3589_v31  ;;  %v1708_v8 = vadd.f32 %v4534_v39, %v1707_v54  ;;  %v1746_v31 = vor.u32 1.1754944e-38, %v1745_v13 }
0x102b   : > { %v1693_v5 = vadd.f32 %v4536_v0, %v1692_v6 }
0x102c   : > { %4167 = vmatmul.msk.bf16.gmra.mxu3 %vm3610_vm13, %v3600_v44  ;;  %v1712_v41 = vsel %vm1711_vm14, %v4534_v39, %v1708_v8 }
0x102d   : > { %v3573_v9 = vpop.f32.mrf.mxu2  ;;  %v1717_v33 = vsel %vm1714_vm15, %v1716_v36, %v1712_v41  ;;  %v3687_v49 = vpop.permute.xlu0 %3686  ;;  %v1697_v55 = vsel %vm1696_vm3, %v4536_v0, %v1693_v5 }
0x102e   : > { %v3574_v63 = vadd.f32 %v3573_v9, %v6189_v21  ;;  %v1718_v51 = vmul.f32 %v6149_v43, %v1717_v33  ;;  %v4538_v14 = vpop.eup %4537  ;;  %v1702_v1 = vsel %vm1699_vm5, %v1701_v61, %v1697_v55 }
0x102f   : > { %v3689_v10 = vpop.permute.xlu2 %3688  ;;  %v1735_v25 = vmul.f32 %v4538_v14, %v6208_v46  ;;  %v1703_v53 = vmul.f32 %v6123_v17, %v1702_v1  ;;  %vm1740_vm6 = vweird.f32 %v4538_v14  ;;  %v1743_v17 = vand.u32 2147483647, %v6208_v46  ;;  %v4576_v46 = vld [vmem:[%s6296_s12] sm:$0xff] }
0x1030   : > { %v6215_v18 = vsel %vm1652_vm2, %v1733_v57, %v3689_v10  ;;  %v3591_v15 = vmax.f32 %v3574_v63, 0.0  ;;  %vm1741_vm8 = vmor %vm1739_vm7, %vm1740_vm6  ;;  %v3603_v39 = vperm.slane %v4576_v46, 3 }
0x1031   : > { %v1736_v3 = vsub.f32 1.0, %v1735_v25  ;;  %vm1744_vm9 = vcmp.eq.f32.partialorder %v1743_v17, 8.507059e+37 }
0x1033   : > { %v1737_v48 = vmul.f32 %v4538_v14, %v1736_v3 }
0x1034   : > { %v3685_v42 = vpop.permute.xlu1 %3684 }
0x1035   : > { %v3575_v12 = vpop.f32.mrf.mxu2  ;;  %v3712_v2 = vsel %vm1652_vm2, %v1703_v53, %v3685_v42  ;;  %v1738_v11 = vadd.f32 %v4538_v14, %v1737_v48 }
0x1036   : > { %v3576_v35 = vadd.f32 %v3575_v12, %v6189_v21 }
0x1037   : > { %v1742_v50 = vsel %vm1741_vm8, %v4538_v14, %v1738_v11 }
0x1038   : > { %v3592_v29 = vmax.f32 %v3576_v35, 0.0  ;;  %v1747_v16 = vsel %vm1744_vm9, %v1746_v31, %v1742_v50 }
0x1039   : > { %v1748_v32 = vmul.f32 %v6159_v37, %v1747_v16 }
0x103a   : > { %v3601_v19 = vpack.c.bf16 %v3592_v29, %v3591_v15 }
0x103c   : > { %4168 = vmatmul.msk.bf16.gmra.mxu3 %vm3610_vm13, %v3601_v19 }
0x103d   : > { %v3578_v34 = vpop.f32.mrf.mxu2 }
0x103e   : > { %v3579_v45 = vadd.f32 %v3578_v34, %v6189_v21 }
0x1040   : > { %v3593_v38 = vmax.f32 %v3579_v45, 0.0 }
0x1045   : > { %v3580_v56 = vpop.f32.mrf.mxu2 }
0x1046   : > { %v3581_v30 = vadd.f32 %v3580_v56, %v6189_v21  ;;  %v3713_v21 = vsel %vm1652_vm2, %v1718_v51, %v3687_v49 }
0x1048   : > { %v3594_v62 = vmax.f32 %v3581_v30, 0.0 }
0x104a   : > { %v3602_v52 = vpack.c.bf16 %v3594_v62, %v3593_v38 }
0x104c   : > { %4169 = vmatmul.msk.bf16.gmra.mxu3 %vm3610_vm13, %v3602_v52 }
0x104f   : > { %v3703_v23 = vpop.permute.xlu2 %3702 }
0x1050   : > { %v3717_v58 = vsel %vm3610_vm13, %v3713_v21, %v3703_v23  ;;  %v3691_v59 = vpop.permute.xlu0 %3690 }
0x1051   : > { %v3722_v43 = vsel %vm3720_vm0, %v3717_v58, 0.0  ;;  %v3715_v44 = vsel %vm1652_vm2, %v1748_v32, %v3691_v59 }
0x1052   : > { %3726 = vst [vmem:[%s6231_s27 + $0x8] sm:$0xff] %v3722_v43 }
0x1060   : > { %v3701_v24 = vpop.permute.xlu1 %3700 }
0x1061   : > { %v3716_v40 = vsel %vm3610_vm13, %v3712_v2, %v3701_v24 }
0x1062   : > { %v3721_v60 = vsel %vm3720_vm0, %v3716_v40, 0.0 }
0x1063   : > { %3725 = vst [vmem:[%s6231_s27] sm:$0xff] %v3721_v60 }
0x1077   : > { %v3707_v57 = vpop.permute.xlu1 %3706 }
0x1078   : > { %v3719_v9 = vsel %vm3610_vm13, %v3715_v44, %v3707_v57 }
0x1079   : > { %v3724_v10 = vsel %vm3720_vm0, %v3719_v9, 0.0 }
0x107a   : > { %3728 = vst [vmem:[%s6231_s27 + $0x18] sm:$0xff] %v3724_v10 }
0x107f   : > { %v3638_v37 = vpop.f32.mrf.mxu3 }
0x1080   : > { %v3639_v63 = vadd.f32 %v3638_v37, %v3603_v39 }
0x1082   : > { %3668 = vst [vmem:[%s6263_s20] sm:$0xff] %v3639_v63 }
0x1087   : > { %v3640_v4 = vpop.f32.mrf.mxu3 }
0x1088   : > { %v3641_v12 = vadd.f32 %v3640_v4, %v3603_v39 }
0x108a   : > { %3669 = vst [vmem:[%s6263_s20 + $0x8] sm:$0xff] %v3641_v12 }
0x108f   : > { %v3643_v35 = vpop.f32.mrf.mxu3 }
0x1090   : > { %v3644_v15 = vadd.f32 %v3643_v35, %v3603_v39 }
0x1092   : > { %3670 = vst [vmem:[%s6263_s20 + $0x10] sm:$0xff] %v3644_v15 }
0x1097   : > { %v3645_v29 = vpop.f32.mrf.mxu3 }
0x1098   : > { %v3646_v47 = vadd.f32 %v3645_v29, %v3603_v39 }
0x109a   : > { %v3705_v19 = vpop.permute.xlu0 %3704  ;;  %3671 = vst [vmem:[%s6263_s20 + $0x18] sm:$0xff] %v3646_v47 }
0x109b   : > { %v3718_v54 = vsel %vm3610_vm13, %v6215_v18, %v3705_v19 }
0x109c   : > { %v3723_v34 = vsel %vm3720_vm0, %v3718_v54, 0.0 }
0x109d   : > { %3727 = vst [vmem:[%s6231_s27 + $0x10] sm:$0xff] %v3723_v34 }
0x109f   : > { %v3648_v8 = vpop.f32.mrf.mxu3 }
0x10a0   : > { %v3649_v20 = vadd.f32 %v3648_v8, %v3603_v39 }
0x10a2   : > { %3672 = vst [vmem:[%s6263_s20 + $0x20] sm:$0xff] %v3649_v20 }
0x10a7   : > { %v3650_v26 = vpop.f32.mrf.mxu3 }
0x10a8   : > { %v3651_v45 = vadd.f32 %v3650_v26, %v3603_v39 }
0x10aa   : > { %3673 = vst [vmem:[%s6263_s20 + $0x28] sm:$0xff] %v3651_v45 }
0x10af   : > { %v3653_v0 = vpop.f32.mrf.mxu3 }
0x10b0   : > { %v3654_v41 = vadd.f32 %v3653_v0, %v3603_v39 }
0x10b2   : > { %3674 = vst [vmem:[%s6263_s20 + $0x30] sm:$0xff] %v3654_v41 }
0x10b7   : > { %v3655_v56 = vpop.f32.mrf.mxu3 }
0x10b8   : > { %v3656_v36 = vadd.f32 %v3655_v56, %v3603_v39 }
0x10ba   : > { %3675 = vst [vmem:[%s6263_s20 + $0x38] sm:$0xff] %v3656_v36 }
0x10bf   : > { %v3658_v18 = vpop.f32.mrf.mxu3 }
0x10c0   : > { %v3659_v30 = vadd.f32 %v3658_v18, %v3603_v39 }
0x10c2   : > { %3676 = vst [vmem:[%s6263_s20 + $0x40] sm:$0xff] %v3659_v30 }
0x10c7   : > { %v3660_v22 = vpop.f32.mrf.mxu3 }
0x10c8   : > { %v3661_v33 = vadd.f32 %v3660_v22, %v3603_v39 }
0x10ca   : > { %3677 = vst [vmem:[%s6263_s20 + $0x48] sm:$0xff] %v3661_v33 }
0x10cf   : > { %v3663_v38 = vpop.f32.mrf.mxu3 }
0x10d0   : > { %v3664_v62 = vadd.f32 %v3663_v38, %v3603_v39 }
0x10d2   : > { %3678 = vst [vmem:[%s6263_s20 + $0x50] sm:$0xff] %v3664_v62 }
0x10d7   : > { %v3665_v52 = vpop.f32.mrf.mxu3 }
0x10d8   : > { %v3666_v51 = vadd.f32 %v3665_v52, %v3603_v39 }
0x10da   : > { %3679 = vst [vmem:[%s6263_s20 + $0x58] sm:$0xff] %v3666_v51 }
0x10db PF: > { %s25_s29 = sadd.s32 1, %s4583_s29  }
0x10dc   : > { %p22_p4 = scmp.ge.s32.totalorder %s25_s29, 4  }
0x10de   :  { %24 = sbr.rel (!%p22_p4) target bundleno = 1 (0x1), region = 132 }

</bundles_post_ra>
